<compile_context>
chip_gen: v7x
topology: tpu7x:2x2x1
jax: 0.10.0
libtpu: 0.0.40
codegen_flags: <defaults>
</compile_context>

<pallas_src>
import functools

import jax
import jax.numpy as jnp
from jax.experimental import pallas as pl
from jax.experimental.pallas import tpu as pltpu


# ----------------------------------------------------------------------------
# Small helpers
# ----------------------------------------------------------------------------
def _round_up(n, m):
    return ((n + m - 1) // m) * m


def _pad2(x, rows, cols):
    r, c = x.shape
    return jnp.pad(x, ((0, rows - r), (0, cols - c)))


def _pick_tile(padded, desired):
    """Largest multiple of 128 that is <= desired and divides `padded` (padded
    is itself a multiple of 128, so 128 always works)."""
    t = max(128, (min(desired, padded) // 128) * 128)
    while padded % t:
        t -= 128
    return t


def _vmem_budget_bytes():
    """Generation-aware usable VMEM (per TensorCore): ~85% of physical.
    v5e/v6e: 128 MiB -> ~108 MiB usable; v7x: 64 MiB -> ~54 MiB usable."""
    cap = 64 << 20  # conservative fallback (v7x-sized)
    try:
        info = pltpu.get_tpu_info()
        for name in ("vmem_capacity_bytes", "vmem_bytes", "vmem_size_bytes"):
            v = getattr(info, name, None)
            if v:
                cap = int(v)
                break
    except Exception:
        pass
    return int(cap * 0.85)


def _buffered_spec(block_shape, index_map, depth):
    """BlockSpec with deeper pipelining on streamed operands; falls back to the
    default double-buffering if this JAX build has no pipeline_mode kwarg."""
    try:
        return pl.BlockSpec(block_shape, index_map, pipeline_mode=pl.Buffered(depth))
    except (TypeError, AttributeError):
        return pl.BlockSpec(block_shape, index_map)


# ----------------------------------------------------------------------------
# Kernels
# ----------------------------------------------------------------------------
def _gcn_fused_kernel(*refs, layer_meta, compute_dtype, precision):
    """Whole GCNInfer forward fused into one invocation (small NodeFlows).

    refs layout: [features, (adj_0, norm_0, w_t_0, b_0), ..., out].
    All matmuls accumulate in f32; MXU inputs are `compute_dtype`.
    """
    feat_ref = refs[0]
    out_ref = refs[-1]

    h = feat_ref[...]                                     # f32 [N0_pad, F0_pad]
    for i, meta in enumerate(layer_meta):
        adj_ref, norm_ref, wt_ref, b_ref = refs[1 + 4 * i: 5 + 4 * i]
        # int8 0/1 adjacency -> compute dtype right before the MXU (exact).
        a = adj_ref[...].astype(jnp.float32).astype(compute_dtype)
        wt = wt_ref[...].astype(compute_dtype)            # pre-transposed [in_pad, out_pad]
        norm = norm_ref[...]                              # f32 [n_dst_pad, 1]
        b = b_ref[...]                                    # f32 [1, out_pad]
        hc = h.astype(compute_dtype)

        if meta["hw_first"]:
            # (A @ (H @ Wt)) * norm + b   -- cheaper when padded out << in.
            hw = jnp.dot(hc, wt, preferred_element_type=jnp.float32,
                         precision=precision)
            h = jnp.dot(a, hw.astype(compute_dtype),
                        preferred_element_type=jnp.float32,
                        precision=precision) * norm + b
        else:
            # ((A @ H) * norm) @ Wt + b
            agg = jnp.dot(a, hc, preferred_element_type=jnp.float32,
                          precision=precision) * norm
            h = jnp.dot(agg.astype(compute_dtype), wt,
                        preferred_element_type=jnp.float32,
                        precision=precision) + b

        if meta["relu"]:
            h = jnp.maximum(h, 0.0)

    out_ref[...] = h.astype(out_ref.dtype)


def _agg_layer_kernel(*refs, apply_wt, relu, compute_dtype, precision):
    """One GCN layer, tiled: grid = (dst_tile, src_tile).

    apply_wt=True : refs = (a, h,  norm, wt, b, o, acc)  -> ((A@H)*norm)@Wt + b
    apply_wt=False: refs = (a, hw, norm,     b, o, acc)  -> (A@HW)*norm + b
    The src axis (grid axis 1) is the reduction; the output block index is
    constant over it, so `o`/`acc` stay resident across the k loop.
    """
    if apply_wt:
        a_ref, h_ref, norm_ref, wt_ref, b_ref, o_ref, acc_ref = refs
    else:
        a_ref, h_ref, norm_ref, b_ref, o_ref, acc_ref = refs
        wt_ref = None

    k = pl.program_id(1)

    @pl.when(k == 0)
    def _init():
        acc_ref[...] = jnp.zeros_like(acc_ref)

    # int8 0/1 adjacency tile -> compute dtype in VMEM, right before the MXU.
    a = a_ref[...].astype(jnp.float32).astype(compute_dtype)
    h = h_ref[...].astype(compute_dtype)
    acc_ref[...] += jnp.dot(a, h, preferred_element_type=jnp.float32,
                            precision=precision)

    @pl.when(k == pl.num_programs(1) - 1)
    def _finalize():
        x = acc_ref[...] * norm_ref[...]
        if apply_wt:
            x = jnp.dot(x.astype(compute_dtype),
                        wt_ref[...].astype(compute_dtype),
                        preferred_element_type=jnp.float32,
                        precision=precision)
        x = x + b_ref[...]
        if relu:
            x = jnp.maximum(x, 0.0)
        o_ref[...] = x.astype(o_ref.dtype)


def _matmul_kernel(x_ref, w_ref, o_ref, *, compute_dtype, precision):
    """HW = H @ Wt precompute for the hw_first tiled layers (W is resident)."""
    o_ref[...] = jnp.dot(x_ref[...].astype(compute_dtype),
                         w_ref[...].astype(compute_dtype),
                         preferred_element_type=jnp.float32,
                         precision=precision).astype(o_ref.dtype)


# ----------------------------------------------------------------------------
# NodeFlow preparation (done ONCE per NodeFlow, not per forward call)
# ----------------------------------------------------------------------------
def prepare_nodeflow(features, adjs, norms, weights, biases):
    """Pad + convert the NodeFlow once.

    features: [N0, in_feats]; adjs[i]: [N_{i+1}, N_i] dense 0/1; norms[i]: [N_{i+1}, 1];
    weights[i]: [out, in] (PyTorch Linear); biases[i]: [1, out].
    The big adjacency is stored zero-padded int8 (exact, 1 B/elem); weights are
    stored padded f32 and pre-transposed to [in, out] (cast to the compute dtype
    in-kernel).  All padded dims are multiples of 128.
    """
    n_blocks = len(adjs)
    assert n_blocks == len(norms) == len(weights) == len(biases)

    node_counts = [features.shape[0]] + [a.shape[0] for a in adjs]
    feat_dims = [features.shape[1]] + [w.shape[0] for w in weights]
    n_pad = [_round_up(n, 128) for n in node_counts]
    f_pad = [_round_up(f, 128) for f in feat_dims]

    f32 = jnp.float32
    feats_p = _pad2(features.astype(f32), n_pad[0], f_pad[0])
    adjs_p, norms_p, wts_p, bs_p, meta = [], [], [], [], []
    for i in range(n_blocks):
        adjs_p.append(_pad2(adjs[i].astype(jnp.int8), n_pad[i + 1], n_pad[i]))
        norms_p.append(_pad2(norms[i].astype(f32), n_pad[i + 1], 1))
        wts_p.append(_pad2(weights[i].T.astype(f32), f_pad[i], f_pad[i + 1]))
        bs_p.append(_pad2(biases[i].reshape(1, -1).astype(f32), 1, f_pad[i + 1]))
        # Contraction-order choice on PADDED dims (actual MXU flop count).
        agg_flops = (2 * n_pad[i + 1] * n_pad[i] * f_pad[i]
                     + 2 * n_pad[i + 1] * f_pad[i] * f_pad[i + 1])
        hw_flops = (2 * n_pad[i] * f_pad[i] * f_pad[i + 1]
                    + 2 * n_pad[i + 1] * n_pad[i] * f_pad[i + 1])
        meta.append({"hw_first": hw_flops < agg_flops,
                     "relu": i != n_blocks - 1,
                     "flops": int(min(agg_flops, hw_flops))})

    return dict(node_counts=node_counts, feat_dims=feat_dims,
                n_pad=n_pad, f_pad=f_pad,
                features=feats_p, adjs=adjs_p, norms=norms_p,
                wts=wts_p, bs=bs_p, meta=meta)


# ----------------------------------------------------------------------------
# Forward paths
# ----------------------------------------------------------------------------
def _fused_forward(nf, compute_dtype, precision, vmem_limit):
    args = [nf["features"]]
    for i in range(len(nf["adjs"])):
        args += [nf["adjs"][i], nf["norms"][i], nf["wts"][i], nf["bs"][i]]
    out_shape = (nf["n_pad"][-1], nf["f_pad"][-1])

    in_specs = [pl.BlockSpec(a.shape, lambda: (0, 0)) for a in args]
    flops = sum(m["flops"] for m in nf["meta"])
    bytes_accessed = (sum(int(a.size) * a.dtype.itemsize for a in args)
                      + out_shape[0] * out_shape[1] * 4)

    kernel = functools.partial(_gcn_fused_kernel, layer_meta=tuple(nf["meta"]),
                               compute_dtype=compute_dtype, precision=precision)
    out = pl.pallas_call(
        kernel,
        out_shape=jax.ShapeDtypeStruct(out_shape, jnp.float32),
        in_specs=in_specs,
        out_specs=pl.BlockSpec(out_shape, lambda: (0, 0)),
        compiler_params=pltpu.CompilerParams(vmem_limit_bytes=int(vmem_limit)),
        cost_estimate=pl.CostEstimate(flops=int(flops), transcendentals=0,
                                      bytes_accessed=int(bytes_accessed)),
    )(*args)
    return out[:nf["node_counts"][-1], :nf["feat_dims"][-1]]


def _choose_agg_tiles(n_dst_pad, n_src_pad, f_h, f_out_pad, h_item, out_item, budget):
    """Pick (tm, tk): multiples of 128 that divide the padded dims and whose
    pipeline buffers fit the per-generation VMEM budget."""
    tm = _pick_tile(n_dst_pad, 256)
    tk = _pick_tile(n_src_pad, 512)   # >=256 keeps the MXU contraction full on v6e/v7x

    def need(tm_, tk_):
        return (3 * tm_ * tk_                      # int8 A tiles, Buffered(3)
                + 2 * tk_ * f_h * h_item           # H tiles (double-buffered)
                + 2 * f_h * f_out_pad * 4          # resident Wt (f32 in HBM)
                + 2 * tm_ * f_out_pad * out_item   # output tile
                + tm_ * f_h * 4                    # f32 accumulator scratch
                + 2 * (tm_ + f_out_pad) * 4        # norm + bias
                + (2 << 20))                       # slack

    while need(tm, tk) > budget:
        if tk > 128:
            tk = _pick_tile(n_src_pad, tk - 128)
        elif tm > 128:
            tm = _pick_tile(n_dst_pad, tm - 128)
        else:
            break
    return tm, tk, need(tm, tk)


def _tiled_layer(adj_p, h, norm_p, wt_p, b_p, *, hw_first, relu,
                 compute_dtype, out_dtype, precision, budget):
    n_dst_pad, n_src_pad = adj_p.shape
    f_in_pad, f_out_pad = wt_p.shape
    h_item = jnp.dtype(compute_dtype).itemsize
    out_item = jnp.dtype(out_dtype).itemsize

    apply_wt = not hw_first
    if hw_first:
        # Pre-apply the linear transform once per SOURCE node (cheaper by padded
        # flops), so the streamed aggregation contracts over the narrower width.
        tmh = _pick_tile(n_src_pad, 512)
        mm_vmem = (2 * tmh * f_in_pad * max(h_item, h.dtype.itemsize)
                   + 2 * f_in_pad * f_out_pad * 4
                   + 2 * tmh * f_out_pad * h_item + (2 << 20))
        h = pl.pallas_call(
            functools.partial(_matmul_kernel, compute_dtype=compute_dtype,
                              precision=precision),
            out_shape=jax.ShapeDtypeStruct((n_src_pad, f_out_pad), compute_dtype),
            grid_spec=pltpu.PrefetchScalarGridSpec(
                num_scalar_prefetch=0,
                grid=(n_src_pad // tmh,),
                in_specs=[pl.BlockSpec((tmh, f_in_pad), lambda i: (i, 0)),
                          pl.BlockSpec((f_in_pad, f_out_pad), lambda i: (0, 0))],
                out_specs=pl.BlockSpec((tmh, f_out_pad), lambda i: (i, 0))),
            compiler_params=pltpu.CompilerParams(
                dimension_semantics=("parallel",),
                vmem_limit_bytes=int(min(max(mm_vmem, 32 << 20), budget))),
            cost_estimate=pl.CostEstimate(
                flops=int(2 * n_src_pad * f_in_pad * f_out_pad),
                transcendentals=0,
                bytes_accessed=int(h.size * h.dtype.itemsize + wt_p.size * 4
                                   + n_src_pad * f_out_pad * h_item)),
        )(h, wt_p)

    f_h = h.shape[1]                      # contraction-output / accumulator width
    tm, tk, tile_bytes = _choose_agg_tiles(n_dst_pad, n_src_pad, f_h, f_out_pad,
                                           h.dtype.itemsize, out_item, budget)
    n_i, n_k = n_dst_pad // tm, n_src_pad // tk

    in_specs = [
        # Adjacency stream: int8 tiles, 3-deep buffering hides the HBM latency.
        _buffered_spec((tm, tk), lambda i, k: (i, k), 3),
        pl.BlockSpec((tk, f_h), lambda i, k: (k, 0)),
        pl.BlockSpec((tm, 1), lambda i, k: (i, 0)),
    ]
    args = [adj_p, h, norm_p]
    if apply_wt:
        in_specs.append(pl.BlockSpec((f_h, f_out_pad), lambda i, k: (0, 0)))
        args.append(wt_p)
    in_specs.append(pl.BlockSpec((1, f_out_pad), lambda i, k: (0, 0)))
    args.append(b_p)

    flops = 2 * n_dst_pad * n_src_pad * f_h
    if apply_wt:
        flops += 2 * n_dst_pad * f_h * f_out_pad
    bytes_accessed = (int(adj_p.size)                                   # int8
                      + n_i * int(h.size) * h.dtype.itemsize            # H re-streamed per dst tile
                      + (int(wt_p.size) * 4 if apply_wt else 0)
                      + int(norm_p.size) * 4 + int(b_p.size) * 4
                      + n_dst_pad * f_out_pad * out_item)

    return pl.pallas_call(
        functools.partial(_agg_layer_kernel, apply_wt=apply_wt, relu=relu,
                          compute_dtype=compute_dtype, precision=precision),
        out_shape=jax.ShapeDtypeStruct((n_dst_pad, f_out_pad), out_dtype),
        grid_spec=pltpu.PrefetchScalarGridSpec(
            num_scalar_prefetch=0,
            grid=(n_i, n_k),                         # reduction (src) axis last
            in_specs=in_specs,
            out_specs=pl.BlockSpec((tm, f_out_pad), lambda i, k: (i, 0)),
            scratch_shapes=[pltpu.VMEM((tm, f_h), jnp.float32)]),
        compiler_params=pltpu.CompilerParams(
            dimension_semantics=("parallel", "arbitrary"),   # dst tiles -> both v7x TCs
            vmem_limit_bytes=int(min(max(tile_bytes + (8 << 20), 32 << 20), budget))),
        cost_estimate=pl.CostEstimate(flops=int(flops), transcendentals=0,
                                      bytes_accessed=int(bytes_accessed)),
    )(*args)


def _tiled_forward(nf, compute_dtype, precision, budget):
    n_blocks = len(nf["adjs"])
    h = nf["features"]                      # f32, padded
    for i in range(n_blocks):
        last = (i == n_blocks - 1)
        h = _tiled_layer(nf["adjs"][i], h, nf["norms"][i], nf["wts"][i], nf["bs"][i],
                         hw_first=nf["meta"][i]["hw_first"],
                         relu=nf["meta"][i]["relu"],
                         compute_dtype=compute_dtype,
                         out_dtype=jnp.float32 if last else compute_dtype,
                         precision=precision, budget=budget)
    return h[:nf["node_counts"][-1], :nf["feat_dims"][-1]]


def gcn_infer_forward(nf, *, compute_dtype=jnp.bfloat16, mode="auto", precision=None):
    """GCNInfer forward over a prepared NodeFlow (see prepare_nodeflow).

    mode: "auto"  -> fused single kernel if the whole NodeFlow (operands + in-kernel
                     intermediates) fits this generation's VMEM budget, else the tiled
                     streaming path;  "fused" / "tiled" force a path.
    compute_dtype: MXU input dtype (bf16 fast path / f32 validation path); all
                   matmuls accumulate in f32.
    precision:     optional jax.lax.Precision for the f32 path (e.g. HIGHEST).
    """
    n_blocks = len(nf["adjs"])
    n_pad, f_pad = nf["n_pad"], nf["f_pad"]
    budget = _vmem_budget_bytes()
    h_item = jnp.dtype(compute_dtype).itemsize

    # Fused-path VMEM need: all operands + worst-layer in-kernel intermediates.
    operand_bytes = (int(nf["features"].size) * 4
                     + sum(int(a.size) for a in nf["adjs"])                      # int8
                     + sum(int(x.size) * 4 for x in nf["norms"] + nf["wts"] + nf["bs"])
                     + n_pad[-1] * f_pad[-1] * 4)                                # output
    interm_bytes = 0
    for i in range(n_blocks):
        interm_bytes = max(
            interm_bytes,
            n_pad[i] * f_pad[i] * (4 + h_item)                                   # h + bf16 cast
            + n_pad[i + 1] * max(f_pad[i], f_pad[i + 1]) * (4 + h_item)          # agg/hw + cast
            + n_pad[i + 1] * f_pad[i + 1] * 4)                                   # layer result
    fused_need = operand_bytes + interm_bytes + (4 << 20)

    if mode == "fused" or (mode == "auto" and fused_need <= budget):
        return _fused_forward(nf, compute_dtype, precision,
                              int(min(max(fused_need, 32 << 20), budget)))
    return _tiled_forward(nf, compute_dtype, precision, budget)


# ----------------------------------------------------------------------------
# Pure-JAX reference (PyTorch-module ordering, strict f32 matmuls)
# ----------------------------------------------------------------------------
def _reference(features, adjs, norms, weights, biases):
    hp = jax.lax.Precision.HIGHEST
    h = features
    for i in range(len(adjs)):
        h = jnp.dot(adjs[i], h, precision=hp)
        h = h * norms[i]
        h = jnp.dot(h, weights[i].T, precision=hp) + biases[i]
        if i != len(adjs) - 1:
            h = jnp.maximum(h, 0.0)
    return h


# ----------------------------------------------------------------------------
# Test harness
# ----------------------------------------------------------------------------
if __name__ == "__main__":
    # Module config: GCNInfer(in_feats, n_hidden, n_classes, n_layers, relu).
    in_feats, n_hidden, n_classes, n_layers = 16, 160, 8, 1
    # NodeFlow with n_layers + 2 node layers (src -> hidden -> dst).
    node_counts = [600, 250, 250]

    key = jax.random.PRNGKey(0)
    keys = jax.random.split(key, 16)

    features = jax.random.normal(keys[0], (node_counts[0], in_feats), dtype=jnp.float32)

    # Dense block adjacencies (binary) and destination norms (1/deg).
    adjs, norms = [], []
    for i in range(len(node_counts) - 1):
        n_dst, n_src = node_counts[i + 1], node_counts[i]
        a = (jax.random.uniform(keys[1 + i], (n_dst, n_src)) < 0.3).astype(jnp.float32)
        deg = jnp.maximum(a.sum(axis=1, keepdims=True), 1.0)
        adjs.append(a)
        norms.append(1.0 / deg)

    # Linear parameters: [NodeUpdate(16->160, relu), NodeUpdate(160->8, none)].
    layer_dims = ([(in_feats, n_hidden)]
                  + [(n_hidden, n_hidden) for _ in range(1, n_layers)]
                  + [(n_hidden, n_classes)])
    weights, biases = [], []
    for li, (fin, fout) in enumerate(layer_dims):
        w = jax.random.normal(keys[4 + li], (fout, fin), dtype=jnp.float32) / jnp.sqrt(fin)
        b = 0.1 * jax.random.normal(keys[10 + li], (1, fout), dtype=jnp.float32)
        weights.append(w)
        biases.append(b)

    ref = _reference(features, adjs, norms, weights, biases)

    # Pad + int8-convert the NodeFlow ONCE (no per-call re-pad/cast of the adjacency).
    nf = prepare_nodeflow(features, adjs, norms, weights, biases)

    # 1) auto path (fits VMEM at these shapes -> fused), f32 MXU inputs.
    out = jax.block_until_ready(gcn_infer_forward(nf, compute_dtype=jnp.float32, mode="auto"))
    assert out.shape == (node_counts[-1], n_classes)
    assert jnp.allclose(out, ref, atol=5e-3, rtol=5e-3)

    # 2) fused path, bf16 MXU inputs / f32 accumulation.
    out = jax.block_until_ready(gcn_infer_forward(nf, compute_dtype=jnp.bfloat16, mode="fused"))
    assert jnp.allclose(out, ref, atol=2e-2, rtol=2e-2)

    # 3) tiled streaming path (the large-NodeFlow path: int8 A stream, f32 acc,
    #    parallel dst tiles / arbitrary src reduction), bf16.
    out = jax.block_until_ready(gcn_infer_forward(nf, compute_dtype=jnp.bfloat16, mode="tiled"))
    assert out.shape == (node_counts[-1], n_classes)
    assert jnp.allclose(out, ref, atol=2e-2, rtol=2e-2)

    # 4) tiled streaming path, f32.
    out = jax.block_until_ready(gcn_infer_forward(nf, compute_dtype=jnp.float32, mode="tiled"))
    assert jnp.allclose(out, ref, atol=5e-3, rtol=5e-3)

    print("KERNEL_OK")
</pallas_src>

<mosaic_0001>
module attributes {stable_mosaic.version = 11 : i64} {
  func.func @_gcn_fused_kernel(%arg0: memref<640x128xf32, #tpu.memory_space<vmem>>, %arg1: memref<256x640xi8, #tpu.memory_space<vmem>>, %arg2: memref<256x1xf32, #tpu.memory_space<vmem>>, %arg3: memref<128x256xf32, #tpu.memory_space<vmem>>, %arg4: memref<1x256xf32, #tpu.memory_space<vmem>>, %arg5: memref<256x256xi8, #tpu.memory_space<vmem>>, %arg6: memref<256x1xf32, #tpu.memory_space<vmem>>, %arg7: memref<256x128xf32, #tpu.memory_space<vmem>>, %arg8: memref<1x128xf32, #tpu.memory_space<vmem>>, %arg9: memref<256x128xf32, #tpu.memory_space<vmem>>) attributes {dimension_semantics = [], scalar_prefetch = 0 : i64, scratch_operands = 0 : i64, tpu.core_type = #tpu.core_type<tc>} {
    %c0 = arith.constant 0 : index
    %c0_0 = arith.constant 0 : index
    %0 = vector.load %arg0[%c0, %c0_0] : memref<640x128xf32, #tpu.memory_space<vmem>>, vector<640x128xf32>
    %c0_1 = arith.constant 0 : index
    %c0_2 = arith.constant 0 : index
    %1 = vector.load %arg1[%c0_1, %c0_2] : memref<256x640xi8, #tpu.memory_space<vmem>>, vector<256x640xi8>
    %2 = arith.sitofp %1 : vector<256x640xi8> to vector<256x640xf32>
    %c0_3 = arith.constant 0 : index
    %c0_4 = arith.constant 0 : index
    %3 = vector.load %arg3[%c0_3, %c0_4] : memref<128x256xf32, #tpu.memory_space<vmem>>, vector<128x256xf32>
    %c0_5 = arith.constant 0 : index
    %c0_6 = arith.constant 0 : index
    %4 = vector.load %arg2[%c0_5, %c0_6] : memref<256x1xf32, #tpu.memory_space<vmem>>, vector<256x1xf32>
    %c0_7 = arith.constant 0 : index
    %c0_8 = arith.constant 0 : index
    %5 = vector.load %arg4[%c0_7, %c0_8] : memref<1x256xf32, #tpu.memory_space<vmem>>, vector<1x256xf32>
    %cst = arith.constant dense<0.000000e+00> : vector<256x128xf32>
    %6 = tpu.matmul %2, %0, %cst {dimension_numbers = #tpu.dot_dimension_numbers<[1], [0], [0], [1], [0, 0, 1, 1], [], []>} : vector<256x640xf32>, vector<640x128xf32>, vector<256x128xf32> -> vector<256x128xf32>
    %7 = vector.broadcast %4 : vector<256x1xf32> to vector<256x128xf32>
    %8 = arith.mulf %6, %7 : vector<256x128xf32>
    %cst_9 = arith.constant dense<0.000000e+00> : vector<256x256xf32>
    %9 = tpu.matmul %8, %3, %cst_9 {dimension_numbers = #tpu.dot_dimension_numbers<[1], [0], [0], [1], [0, 0, 1, 1], [], []>} : vector<256x128xf32>, vector<128x256xf32>, vector<256x256xf32> -> vector<256x256xf32>
    %10 = vector.broadcast %5 : vector<1x256xf32> to vector<256x256xf32>
    %11 = arith.addf %9, %10 : vector<256x256xf32>
    %cst_10 = arith.constant 0.000000e+00 : f32
    %12 = vector.broadcast %cst_10 : f32 to vector<256x256xf32>
    %13 = arith.maximumf %11, %12 : vector<256x256xf32>
    %c0_11 = arith.constant 0 : index
    %c0_12 = arith.constant 0 : index
    %14 = vector.load %arg5[%c0_11, %c0_12] : memref<256x256xi8, #tpu.memory_space<vmem>>, vector<256x256xi8>
    %15 = arith.sitofp %14 : vector<256x256xi8> to vector<256x256xf32>
    %c0_13 = arith.constant 0 : index
    %c0_14 = arith.constant 0 : index
    %16 = vector.load %arg7[%c0_13, %c0_14] : memref<256x128xf32, #tpu.memory_space<vmem>>, vector<256x128xf32>
    %c0_15 = arith.constant 0 : index
    %c0_16 = arith.constant 0 : index
    %17 = vector.load %arg6[%c0_15, %c0_16] : memref<256x1xf32, #tpu.memory_space<vmem>>, vector<256x1xf32>
    %c0_17 = arith.constant 0 : index
    %c0_18 = arith.constant 0 : index
    %18 = vector.load %arg8[%c0_17, %c0_18] : memref<1x128xf32, #tpu.memory_space<vmem>>, vector<1x128xf32>
    %cst_19 = arith.constant dense<0.000000e+00> : vector<256x128xf32>
    %19 = tpu.matmul %13, %16, %cst_19 {dimension_numbers = #tpu.dot_dimension_numbers<[1], [0], [0], [1], [0, 0, 1, 1], [], []>} : vector<256x256xf32>, vector<256x128xf32>, vector<256x128xf32> -> vector<256x128xf32>
    %cst_20 = arith.constant dense<0.000000e+00> : vector<256x128xf32>
    %20 = tpu.matmul %15, %19, %cst_20 {dimension_numbers = #tpu.dot_dimension_numbers<[1], [0], [0], [1], [0, 0, 1, 1], [], []>} : vector<256x256xf32>, vector<256x128xf32>, vector<256x128xf32> -> vector<256x128xf32>
    %21 = vector.broadcast %17 : vector<256x1xf32> to vector<256x128xf32>
    %22 = arith.mulf %20, %21 : vector<256x128xf32>
    %23 = vector.broadcast %18 : vector<1x128xf32> to vector<256x128xf32>
    %24 = arith.addf %22, %23 : vector<256x128xf32>
    %c0_21 = arith.constant 0 : index
    %c0_22 = arith.constant 0 : index
    %25 = vector.load %arg9[%c0_21, %c0_22] : memref<256x128xf32, #tpu.memory_space<vmem>>, vector<256x128xf32>
    tpu.vector_store %arg9[%c0_21, %c0_22], %24 {strides = array<i32>} : memref<256x128xf32, #tpu.memory_space<vmem>>, vector<256x128xf32>,
    return
  }
}

</mosaic_0001>

<bundles_post_ra>
// kernel: tpu_custom_call.1
= control target key start
LH: loop header
LB: loop body
LE: loop exit
PB: predicated region body
PF: predicated region fallthrough
CT: control target
= control target key end

     0   :  { %14 = vsyncpa [#allocation3], 0  ;;  %s4243_s0 = inlined_call_operand.hbm [shape: f32[640,128], index: 0, kind: input, shape index: {}]   ;;  %s4244_s1 = inlined_call_operand.vmem [shape: s8[256,640], index: 1, kind: input, shape index: {}]   ;;  %s4245_s2 = inlined_call_operand.vmem [shape: f32[256,1], index: 2, kind: input, shape index: {}]   ;;  %s4246_s3 = inlined_call_operand.hbm [shape: f32[128,256], index: 3, kind: input, shape index: {}]   ;;  %s4247_s4 = inlined_call_operand.vmem [shape: f32[1,256], index: 4, kind: input, shape index: {}]   ;;  %s4248_s5 = inlined_call_operand.vmem [shape: s8[256,256], index: 5, kind: input, shape index: {}]   ;;  %s4249_s6 = inlined_call_operand.vmem [shape: f32[256,1], index: 6, kind: input, shape index: {}]   ;;  %s4250_s7 = inlined_call_operand.hbm [shape: f32[256,128], index: 7, kind: input, shape index: {}]   ;;  %s4251_s8 = inlined_call_operand.vmem [shape: f32[1,128], index: 8, kind: input, shape index: {}]   ;;  %s4252_s9 = inlined_call_operand.hbm [shape: f32[256,128], index: 9, kind: output, shape index: {}]  }
   0x1   :  { %15 = vsyncpa [#allocation6], 0 }
   0x2   :  { %16 = vsyncpa [#allocation4], 0  ;;  %s3305_s30 = smov [#allocation5]   ;;  %s3211_s13 = scalar_lea.hbm %s4246_s3, 4096 }
   0x3   :  { %s38_s10 = sshll.u32 %s3305_s30, 4  ;;  %p3212_p0 = scmp.ne.s32.totalorder %s4246_s3, %s3211_s13  ;;  %s39_s10 = int_to_ptr.vmem [resolvable:$true] %s38_s10 }
   0x4   :  { %p3215_p1 = scmp.lt.u32.totalorder %s3211_s13, %s4246_s3 }
   0x6   :  { %p3217_p2 = pnand %p3215_p1, %p3212_p0 }
   0x8   :  { %3220 = shalt.err (!%p3217_p2)
}
   0x9   :  { %s3221_s18 = scalar_lea.vmem %s39_s10, 4096  ;;  %p3226_p4 = scmp.lt.s32.totalorder %s39_s10, %s39_s10 }
   0xa   :  { %p3222_p3 = scmp.ne.s32.totalorder %s39_s10, %s3221_s18  ;;  %p3227_p5 = scmp.lt.s32.totalorder %s3221_s18, %s3221_s18 }
   0xc   :  { %p3228_p6 = por %p3227_p5, %p3226_p4 }
   0xe   :  { %p3229_p7 = pnand %p3228_p6, %p3222_p3 }
  0x10   :  { %3232 = shalt.err (!%p3229_p7)
}
  0x11   :  { %s3306_s19 = smov 256   ;;  %s3307_s20 = smov 16  }
  0x12   :  { %44 = dma.hbm_to_vmem [thread:$0]  %s4246_s3, 4096, %s39_s10, [#allocation6], %s3306_s19, %s3306_s19, %s3307_s20  }
  0x13   :  { %s3308_s23 = smov [#allocation2]   ;;  %s3233_s27 = scalar_lea.hbm %s4243_s0, 10240 }
  0x14   :  { %s22_s24 = sshll.u32 %s3308_s23, 4  ;;  %p3234_p8 = scmp.ne.s32.totalorder %s4243_s0, %s3233_s27  ;;  %s23_s24 = int_to_ptr.vmem [resolvable:$true] %s22_s24 }
  0x15   :  { %p3237_p9 = scmp.lt.u32.totalorder %s3233_s27, %s4243_s0 }
  0x17   :  { %p3239_p10 = pnand %p3237_p9, %p3234_p8 }
  0x19   :  { %3242 = shalt.err (!%p3239_p10)
}
  0x1a   :  { %s3243_s12 = scalar_lea.vmem %s23_s24, 10240  ;;  %p3248_p12 = scmp.lt.s32.totalorder %s23_s24, %s23_s24 }
  0x1b   :  { %p3244_p11 = scmp.ne.s32.totalorder %s23_s24, %s3243_s12  ;;  %p3249_p13 = scmp.lt.s32.totalorder %s3243_s12, %s3243_s12 }
  0x1d   :  { %p3250_p0 = por %p3249_p13, %p3248_p12 }
  0x1f   :  { %p3251_p1 = pnand %p3250_p0, %p3244_p11 }
  0x21   :  { %3254 = shalt.err (!%p3251_p1)
}
  0x22   :  { %s3309_s3 = smov 128   ;;  %s3310_s10 = smov 8  }
  0x23   :  { %28 = dma.hbm_to_vmem [thread:$0]  %s4243_s0, 10240, %s23_s24, [#allocation3], %s3309_s3, %s3309_s3, %s3310_s10  }
  0x24   :  { %s3311_s15 = smov [#allocation7]   ;;  %s3255_s19 = scalar_lea.hbm %s4250_s7, 4096 }
  0x25   :  { %s56_s16 = sshll.u32 %s3311_s15, 4  ;;  %p3256_p2 = scmp.ne.s32.totalorder %s4250_s7, %s3255_s19  ;;  %s57_s16 = int_to_ptr.vmem [resolvable:$true] %s56_s16 }
  0x26   :  { %p3259_p3 = scmp.lt.u32.totalorder %s3255_s19, %s4250_s7 }
  0x28   :  { %p3261_p4 = pnand %p3259_p3, %p3256_p2 }
  0x2a   :  { %3264 = shalt.err (!%p3261_p4)
}
  0x2b   :  { %s3265_s25 = scalar_lea.vmem %s57_s16, 4096  ;;  %p3270_p6 = scmp.lt.s32.totalorder %s57_s16, %s57_s16 }
  0x2c   :  { %p3266_p5 = scmp.ne.s32.totalorder %s57_s16, %s3265_s25  ;;  %p3271_p7 = scmp.lt.s32.totalorder %s3265_s25, %s3265_s25 }
  0x2e   :  { %p3272_p8 = por %p3271_p7, %p3270_p6 }
  0x30   :  { %p3273_p9 = pnand %p3272_p8, %p3266_p5 }
  0x32   :  { %3276 = shalt.err (!%p3273_p9)
}
  0x33   :  { %62 = dma.hbm_to_vmem [thread:$0]  %s4250_s7, 4096, %s57_s16, [#allocation6], %s3309_s3, %s3309_s3, %s3310_s10  }
  0x34   :  { %3299 = dma.done.wait [#allocation3], 10240  }
  0x35   :  { %3300 = vsyncadd [#allocation3], 4294957056 }
  0x36   :  { %3301 = dma.done.wait [#allocation6], 8192  }
  0x37   :  { %3302 = vsyncadd [#allocation6], 4294959104  ;;  %v3312_v0 = vmov 0.0|0.0   ;;  %v74_v1 = vld [vmem:[#allocation2] sm:$0xff]  ;;  %v75_v2 = vld [vmem:[#allocation2 + $0x8] sm:$0xff]  ;;  %v3313_v42 = vmov 0  }
  0x38   :  { %2846 = vmatprep.subr.bf16.mxu0 %v3312_v0  ;;  %v76_v3 = vld [vmem:[#allocation2 + $0x10] sm:$0xff]  ;;  %v2847_v4 = vpack.c.bf16 %v75_v2, %v74_v1  ;;  %v77_v5 = vld [vmem:[#allocation2 + $0x18] sm:$0xff]  ;;  %v78_v7 = vld [vmem:[#allocation2 + $0x20] sm:$0xff]  ;;  %3209 = vset.pattern.permute.xlu0 %v3313_v42 }
  0x39   :  { %v2850_v6 = vpack.c.bf16 %v77_v5, %v76_v3  ;;  %v79_v8 = vld [vmem:[#allocation2 + $0x28] sm:$0xff]  ;;  %v80_v10 = vld [vmem:[#allocation2 + $0x30] sm:$0xff]  ;;  %v81_v11 = vld [vmem:[#allocation2 + $0x38] sm:$0xff]  ;;  %3210 = vset.pattern.permute.xlu1 %v3313_v42 }
  0x3a   :  { %2848 = vmatpush1.bf16.msra.mxu0 %v2847_v4  ;;  %v2853_v9 = vpack.c.bf16 %v79_v8, %v78_v7  ;;  %v3414_v12 = vld [vmem:[%s4244_s1 + $0x8] sm:$0xff]  ;;  %v2856_v13 = vpack.c.bf16 %v81_v11, %v80_v10  ;;  %v82_v15 = vld [vmem:[#allocation2 + $0x40] sm:$0xff]  ;;  %v84_v19 = vld [vmem:[#allocation2 + $0x50] sm:$0xff] }
  0x3b   :  { %2849 = vmatprep.subr.bf16.mxu0 %v3312_v0  ;;  %v195_v14 = vunpack.c.0.s8 %v3414_v12  ;;  %v83_v16 = vld [vmem:[#allocation2 + $0x48] sm:$0xff]  ;;  %v85_v20 = vld [vmem:[#allocation2 + $0x58] sm:$0xff]  ;;  %v86_v22 = vld [vmem:[#allocation2 + $0x60] sm:$0xff] }
  0x3c   :  { %v2859_v18 = vpack.c.bf16 %v83_v16, %v82_v15  ;;  %v2862_v21 = vpack.c.bf16 %v85_v20, %v84_v19  ;;  %v87_v23 = vld [vmem:[#allocation2 + $0x68] sm:$0xff]  ;;  %v88_v25 = vld [vmem:[#allocation2 + $0x70] sm:$0xff]  ;;  %v89_v26 = vld [vmem:[#allocation2 + $0x78] sm:$0xff] }
  0x3d   :  { %v355_v17 = vcvt.s32.f32 %v195_v14  ;;  %v2865_v24 = vpack.c.bf16 %v87_v23, %v86_v22  ;;  %v2868_v27 = vpack.c.bf16 %v89_v26, %v88_v25  ;;  %v90_v28 = vld [vmem:[#allocation2 + $0x80] sm:$0xff]  ;;  %v91_v29 = vld [vmem:[#allocation2 + $0x88] sm:$0xff]  ;;  %v92_v31 = vld [vmem:[#allocation2 + $0x90] sm:$0xff] }
  0x3e   :  { %2851 = vmatpush1.bf16.msra.mxu0 %v2850_v6  ;;  %v2871_v30 = vpack.c.bf16 %v91_v29, %v90_v28  ;;  %v93_v32 = vld [vmem:[#allocation2 + $0x98] sm:$0xff]  ;;  %v94_v33 = vld [vmem:[#allocation2 + $0xa0] sm:$0xff]  ;;  %v139_v37 = vld [vmem:[#allocation2 + $0x208] sm:$0xff] }
  0x3f   :  { %2852 = vmatprep.subr.bf16.mxu0 %v3312_v0  ;;  %643 = vmatprep.mubr.f32.mxu0 %v355_v17  ;;  %v546_v34 = vld [vmem:[%s4245_s2] sm:$0xff]  ;;  %v2874_v35 = vpack.c.bf16 %v93_v32, %v92_v31  ;;  %v548_v38 = vld [vmem:[%s4245_s2 + $0x10] sm:$0xff]  ;;  %v95_v39 = vld [vmem:[#allocation2 + $0xa8] sm:$0xff] }
  0x40   :  { %v138_v36 = vld [vmem:[#allocation2 + $0x200] sm:$0xff]  ;;  %v140_v40 = vld [vmem:[#allocation2 + $0x210] sm:$0xff]  ;;  %v141_v41 = vld [vmem:[#allocation2 + $0x218] sm:$0xff]  ;;  %1256 = vperm.xlu0 %3209, %v546_v34   ;;  %1266 = vperm.xlu1 %3210, %v548_v38   ;;  %v2877_v44 = vpack.c.bf16 %v95_v39, %v94_v33 }
  0x41   :  { %v2942_v43 = vpack.c.bf16 %v139_v37, %v138_v36  ;;  %v547_v45 = vld [vmem:[%s4245_s2 + $0x8] sm:$0xff]  ;;  %v2946_v46 = vpack.c.bf16 %v141_v41, %v140_v40  ;;  %v142_v47 = vld [vmem:[#allocation2 + $0x220] sm:$0xff]  ;;  %v96_v49 = vld [vmem:[#allocation2 + $0xb0] sm:$0xff]  ;;  %v205_v40 = vunpack.c.2.s8 %v3414_v12 }
  0x42   :  { %2854 = vmatpush1.bf16.msra.mxu0 %v2853_v9  ;;  %v143_v48 = vld [vmem:[#allocation2 + $0x228] sm:$0xff]  ;;  %v97_v50 = vld [vmem:[#allocation2 + $0xb8] sm:$0xff]  ;;  %v550_v54 = vld [vmem:[%s4245_s2 + $0x20] sm:$0xff] }
  0x43   :  { %2855 = vmatprep.subr.bf16.mxu0 %v3312_v0  ;;  %2943 = vmatprep.subr.bf16.mxu1 %v2942_v43  ;;  %v549_v51 = vld [vmem:[%s4245_s2 + $0x18] sm:$0xff]  ;;  %v2950_v52 = vpack.c.bf16 %v143_v48, %v142_v47  ;;  %v2880_v53 = vpack.c.bf16 %v97_v50, %v96_v49  ;;  %v144_v55 = vld [vmem:[#allocation2 + $0x230] sm:$0xff]  ;;  %v98_v57 = vld [vmem:[#allocation2 + $0xc0] sm:$0xff]  ;;  %v365_v49 = vcvt.s32.f32 %v205_v40  ;;  %v210_v50 = vunpack.c.3.s8 %v3414_v12 }
  0x44   :  { %2945 = vmatpush3.bf16.msra.mxu1 %v2942_v43  ;;  %1261 = vperm.xlu0 %3209, %v547_v45   ;;  %v145_v56 = vld [vmem:[#allocation2 + $0x238] sm:$0xff]  ;;  %v99_v58 = vld [vmem:[#allocation2 + $0xc8] sm:$0xff]  ;;  %v552_v62 = vld [vmem:[%s4245_s2 + $0x30] sm:$0xff] }
  0x45   :  { %2947 = vmatprep.subr.bf16.mxu1 %v2946_v46  ;;  %1271 = vperm.xlu1 %3210, %v549_v51   ;;  %v551_v59 = vld [vmem:[%s4245_s2 + $0x28] sm:$0xff]  ;;  %v2954_v60 = vpack.c.bf16 %v145_v56, %v144_v55  ;;  %v2883_v61 = vpack.c.bf16 %v99_v58, %v98_v57  ;;  %v146_v63 = vld [vmem:[#allocation2 + $0x240] sm:$0xff]  ;;  %v100_v2 = vld [vmem:[#allocation2 + $0xd0] sm:$0xff] }
  0x46   :  { %2857 = vmatpush1.bf16.msra.mxu0 %v2856_v13  ;;  %v147_v1 = vld [vmem:[#allocation2 + $0x248] sm:$0xff]  ;;  %v101_v3 = vld [vmem:[#allocation2 + $0xd8] sm:$0xff]  ;;  %v554_v7 = vld [vmem:[%s4245_s2 + $0x40] sm:$0xff] }
  0x47   :  { %2858 = vmatprep.subr.bf16.mxu0 %v3312_v0  ;;  %v553_v4 = vld [vmem:[%s4245_s2 + $0x38] sm:$0xff]  ;;  %v2958_v5 = vpack.c.bf16 %v147_v1, %v146_v63  ;;  %v2886_v6 = vpack.c.bf16 %v101_v3, %v100_v2  ;;  %v148_v8 = vld [vmem:[#allocation2 + $0x250] sm:$0xff]  ;;  %v102_v10 = vld [vmem:[#allocation2 + $0xe0] sm:$0xff] }
  0x48   :  { %2949 = vmatpush3.bf16.msra.mxu1 %v2946_v46  ;;  %1276 = vperm.xlu0 %3209, %v550_v54   ;;  %v149_v9 = vld [vmem:[#allocation2 + $0x258] sm:$0xff]  ;;  %v103_v11 = vld [vmem:[#allocation2 + $0xe8] sm:$0xff]  ;;  %v3461_v14 = vld [vmem:[%s4244_s1] sm:$0xff] }
  0x49   :  { %2951 = vmatprep.subr.bf16.mxu1 %v2950_v52  ;;  %1281 = vperm.xlu1 %3210, %v551_v59   ;;  %v555_v13 = vld [vmem:[%s4245_s2 + $0x48] sm:$0xff]  ;;  %v2962_v15 = vpack.c.bf16 %v149_v9, %v148_v8  ;;  %v2889_v16 = vpack.c.bf16 %v103_v11, %v102_v10  ;;  %v556_v17 = vld [vmem:[%s4245_s2 + $0x50] sm:$0xff]  ;;  %v557_v22 = vld [vmem:[%s4245_s2 + $0x58] sm:$0xff]  ;;  %v194_v23 = vunpack.c.0.s8 %v3461_v14  ;;  %v199_v37 = vunpack.c.1.s8 %v3461_v14 }
  0x4a   :  { %2860 = vmatpush1.bf16.msra.mxu0 %v2859_v18  ;;  %v150_v18 = vld [vmem:[#allocation2 + $0x260] sm:$0xff]  ;;  %v151_v19 = vld [vmem:[#allocation2 + $0x268] sm:$0xff]  ;;  %v104_v20 = vld [vmem:[#allocation2 + $0xf0] sm:$0xff]  ;;  %v204_v47 = vunpack.c.2.s8 %v3461_v14 }
  0x4b   :  { %2861 = vmatprep.subr.bf16.mxu0 %v3312_v0  ;;  %v3474_v25 = vld [vmem:[%s4244_s1 + $0x20] sm:$0xff]  ;;  %v107_v31 = vld [vmem:[#allocation2 + $0x108] sm:$0xff]  ;;  %v152_v33 = vld [vmem:[#allocation2 + $0x270] sm:$0xff]  ;;  %v354_v36 = vcvt.s32.f32 %v194_v23  ;;  %v359_v46 = vcvt.s32.f32 %v199_v37 }
  0x4c   :  { %2953 = vmatpush3.bf16.msra.mxu1 %v2950_v52  ;;  %1286 = vperm.xlu0 %3209, %v552_v62   ;;  %v558_v28 = vld [vmem:[%s4245_s2 + $0x60] sm:$0xff]  ;;  %v198_v29 = vunpack.c.0.s8 %v3474_v25  ;;  %v559_v32 = vld [vmem:[%s4245_s2 + $0x68] sm:$0xff]  ;;  %v153_v34 = vld [vmem:[#allocation2 + $0x278] sm:$0xff]  ;;  %v203_v45 = vunpack.c.1.s8 %v3474_v25  ;;  %v364_v59 = vcvt.s32.f32 %v204_v47  ;;  %v370_v62 = vcvt.s32.f32 %v210_v50 }
  0x4d   :  { %2955 = vmatprep.subr.bf16.mxu1 %v2954_v60  ;;  %1291 = vperm.xlu1 %3210, %v553_v4   ;;  %v560_v41 = vld [vmem:[%s4245_s2 + $0x70] sm:$0xff]  ;;  %v109_v43 = vld [vmem:[#allocation2 + $0x118] sm:$0xff]  ;;  %v562_v52 = vld [vmem:[%s4245_s2 + $0x80] sm:$0xff] }
  0x4e   :  { %2863 = vmatpush1.bf16.msra.mxu0 %v2862_v21  ;;  %v105_v21 = vld [vmem:[#allocation2 + $0xf8] sm:$0xff]  ;;  %v108_v42 = vld [vmem:[#allocation2 + $0x110] sm:$0xff]  ;;  %v110_v55 = vld [vmem:[#allocation2 + $0x120] sm:$0xff]  ;;  %v363_v57 = vcvt.s32.f32 %v203_v45 }
  0x4f   :  { %2864 = vmatprep.subr.bf16.mxu0 %v3312_v0  ;;  %v2892_v26 = vpack.c.bf16 %v105_v21, %v104_v20  ;;  %v561_v48 = vld [vmem:[%s4245_s2 + $0x78] sm:$0xff]  ;;  %v2898_v51 = vpack.c.bf16 %v109_v43, %v108_v42  ;;  %v3505_v54 = vld [vmem:[%s4244_s1 + $0x30] sm:$0xff]  ;;  %v111_v56 = vld [vmem:[#allocation2 + $0x128] sm:$0xff] }
  0x50   :  { %2957 = vmatpush3.bf16.msra.mxu1 %v2954_v60  ;;  %1296 = vperm.xlu0 %3209, %v554_v7   ;;  %v209_v60 = vunpack.c.3.s8 %v3461_v14  ;;  %v215_v63 = vunpack.c.0.s8 %v3505_v54  ;;  %v3516_v1 = vld [vmem:[%s4244_s1 + $0x28] sm:$0xff]  ;;  %v2901_v2 = vpack.c.bf16 %v111_v56, %v110_v55  ;;  %v564_v3 = vld [vmem:[%s4245_s2 + $0x90] sm:$0xff]  ;;  %v565_v9 = vld [vmem:[%s4245_s2 + $0x98] sm:$0xff] }
  0x51   :  { %2959 = vmatprep.subr.bf16.mxu1 %v2958_v5  ;;  %1301 = vperm.xlu1 %3210, %v555_v13   ;;  %v112_v4 = vld [vmem:[#allocation2 + $0x130] sm:$0xff]  ;;  %v214_v8 = vunpack.c.0.s8 %v3516_v1  ;;  %v163_v10 = vld [vmem:[%s4244_s1 + $0x48] sm:$0xff]  ;;  %v220_v13 = vunpack.c.1.s8 %v3505_v54  ;;  %v570_v37 = vld [vmem:[%s4245_s2 + $0xc0] sm:$0xff]  ;;  %v229_v45 = vunpack.c.3.s8 %v3516_v1 }
  0x52   :  { %2866 = vmatpush1.bf16.msra.mxu0 %v2865_v24  ;;  %v2966_v24 = vpack.c.bf16 %v151_v19, %v150_v18  ;;  %v369_v7 = vcvt.s32.f32 %v209_v60  ;;  %v375_v11 = vcvt.s32.f32 %v215_v63  ;;  %v115_v18 = vld [vmem:[#allocation2 + $0x148] sm:$0xff]  ;;  %v223_v19 = vunpack.c.1.s8 %v163_v10  ;;  %v118_v40 = vld [vmem:[#allocation2 + $0x160] sm:$0xff]  ;;  %v3565_v50 = vld [vmem:[%s4244_s1 + $0x50] sm:$0xff] }
  0x53   :  { %2867 = vmatprep.subr.bf16.mxu0 %v3312_v0  ;;  %v374_v21 = vcvt.s32.f32 %v214_v8  ;;  %v567_v23 = vld [vmem:[%s4245_s2 + $0xa8] sm:$0xff]  ;;  %v233_v42 = vunpack.c.3.s8 %v163_v10  ;;  %v389_v55 = vcvt.s32.f32 %v229_v45  ;;  %v234_v56 = vunpack.c.0.s8 %v3565_v50  ;;  %v122_v63 = vld [vmem:[#allocation2 + $0x180] sm:$0xff] }
  0x54   :  { %2961 = vmatpush3.bf16.msra.mxu1 %v2958_v5  ;;  %1306 = vperm.xlu0 %3209, %v556_v17   ;;  %v113_v5 = vld [vmem:[#allocation2 + $0x138] sm:$0xff]  ;;  %v114_v17 = vld [vmem:[#allocation2 + $0x140] sm:$0xff] }
  0x55   :  { %2963 = vmatprep.subr.bf16.mxu1 %v2962_v15  ;;  %1311 = vperm.xlu1 %3210, %v557_v22   ;;  %v2904_v14 = vpack.c.bf16 %v113_v5, %v112_v4  ;;  %v219_v22 = vunpack.c.1.s8 %v3516_v1  ;;  %v393_v47 = vcvt.s32.f32 %v233_v42  ;;  %v394_v4 = vcvt.s32.f32 %v234_v56  ;;  %v173_v42 = vld [vmem:[%s4244_s1 + $0x98] sm:$0xff] }
  0x56   :  { %2869 = vmatpush1.bf16.msra.mxu0 %v2868_v27  ;;  %v200_v27 = vunpack.c.1.s8 %v3414_v12  ;;  %v213_v12 = vunpack.c.3.s8 %v3474_v25  ;;  %v239_v5 = vunpack.c.1.s8 %v3565_v50 }
  0x57   :  { %2870 = vmatprep.subr.bf16.mxu0 %v3312_v0 }
  0x58   :  { %2965 = vmatpush3.bf16.msra.mxu1 %v2962_v15  ;;  %1316 = vperm.xlu0 %3209, %v558_v28   ;;  %v360_v38 = vcvt.s32.f32 %v200_v27  ;;  %v566_v15 = vld [vmem:[%s4245_s2 + $0xa0] sm:$0xff]  ;;  %v2907_v27 = vpack.c.bf16 %v115_v18, %v114_v17  ;;  %v568_v28 = vld [vmem:[%s4245_s2 + $0xb0] sm:$0xff]  ;;  %v577_v17 = vld [vmem:[%s4245_s2 + $0xf8] sm:$0xff] }
  0x59   :  { %2967 = vmatprep.subr.bf16.mxu1 %v2966_v24  ;;  %1321 = vperm.xlu1 %3210, %v559_v32   ;;  %v224_v32 = vunpack.c.2.s8 %v3516_v1  ;;  %v123_v1 = vld [vmem:[#allocation2 + $0x188] sm:$0xff] }
  0x5a   :  { %2872 = vmatpush1.bf16.msra.mxu0 %v2871_v30  ;;  %v106_v30 = vld [vmem:[#allocation2 + $0x100] sm:$0xff] }
  0x5b   :  { %2873 = vmatprep.subr.bf16.mxu0 %v3312_v0  ;;  %v2895_v39 = vpack.c.bf16 %v107_v31, %v106_v30  ;;  %v117_v30 = vld [vmem:[#allocation2 + $0x158] sm:$0xff]  ;;  %v379_v31 = vcvt.s32.f32 %v219_v22 }
  0x5c   :  { %2969 = vmatpush3.bf16.msra.mxu1 %v2966_v24  ;;  %1326 = vperm.xlu0 %3209, %v560_v41   ;;  %v383_v24 = vcvt.s32.f32 %v223_v19  ;;  %v119_v41 = vld [vmem:[#allocation2 + $0x168] sm:$0xff] }
  0x5d   :  { %1331 = vperm.xlu1 %3210, %v561_v48  }
  0x5e   :  { %2875 = vmatpush1.bf16.msra.mxu0 %v2874_v35  ;;  %v358_v35 = vcvt.s32.f32 %v198_v29  ;;  %v116_v29 = vld [vmem:[#allocation2 + $0x150] sm:$0xff] }
  0x5f   :  { %2876 = vmatprep.subr.bf16.mxu0 %v3312_v0 }
  0x60   :  { %2798 = vmatprep.mubr.f32.mxu1 %v358_v35  ;;  %1336 = vperm.xlu0 %3209, %v562_v52   ;;  %v230_v35 = vunpack.c.3.s8 %v3505_v54  ;;  %v572_v52 = vld [vmem:[%s4245_s2 + $0xd0] sm:$0xff] }
  0x62   :  { %2878 = vmatpush1.bf16.msra.mxu0 %v2877_v44  ;;  %v2970_v44 = vpack.c.bf16 %v153_v34, %v152_v33  ;;  %v569_v33 = vld [vmem:[%s4245_s2 + $0xb8] sm:$0xff]  ;;  %v390_v48 = vcvt.s32.f32 %v230_v35 }
  0x63   :  { %2879 = vmatprep.subr.bf16.mxu0 %v3312_v0 }
  0x64   :  { %2971 = vmatprep.subr.bf16.mxu1 %v2970_v44  ;;  %1346 = vperm.xlu0 %3209, %v564_v3  }
  0x65   :  { %2973 = vmatpush3.bf16.msra.mxu1 %v2970_v44  ;;  %v384_v44 = vcvt.s32.f32 %v224_v32 }
  0x66   :  { %2881 = vmatpush1.bf16.msra.mxu0 %v2880_v53  ;;  %v208_v53 = vunpack.c.2.s8 %v3474_v25  ;;  %v380_v25 = vcvt.s32.f32 %v220_v13  ;;  %v124_v13 = vld [vmem:[#allocation2 + $0x190] sm:$0xff] }
  0x67   :  { %2882 = vmatprep.subr.bf16.mxu0 %v3312_v0 }
  0x68   :  { %v368_v58 = vcvt.s32.f32 %v208_v53  ;;  %2799 = vmatmul.mubr.f32.vlgmr.msra.gmra.mrb[0].mxu1 %v363_v57  ;;  %1356 = vperm.xlu0 %3209, %v566_v15   ;;  %v120_v53 = vld [vmem:[#allocation2 + $0x170] sm:$0xff]  ;;  %v573_v57 = vld [vmem:[%s4245_s2 + $0xd8] sm:$0xff]  ;;  %v399_v15 = vcvt.s32.f32 %v239_v5  ;;  %v268_v5 = vunpack.c.2.s8 %v173_v42 }
  0x6a   :  { %2884 = vmatpush1.bf16.msra.mxu0 %v2883_v61  ;;  %v563_v61 = vld [vmem:[%s4245_s2 + $0x88] sm:$0xff]  ;;  %2801 = vmatprep.mubr.f32.mxu1 %v368_v58 }
  0x6b   :  { %2885 = vmatprep.subr.bf16.mxu0 %v3312_v0  ;;  %1341 = vperm.xlu1 %3210, %v563_v61   ;;  %v574_v61 = vld [vmem:[%s4245_s2 + $0xe0] sm:$0xff] }
  0x6c   :  { %1366 = vperm.xlu0 %3209, %v568_v28  }
  0x6e   :  { %2887 = vmatpush1.bf16.msra.mxu0 %v2886_v6  ;;  %v373_v6 = vcvt.s32.f32 %v213_v12  ;;  %v168_v12 = vld [vmem:[%s4244_s1 + $0x70] sm:$0xff] }
  0x6f   :  { %2888 = vmatprep.subr.bf16.mxu0 %v3312_v0  ;;  %1351 = vperm.xlu1 %3210, %v565_v9   ;;  %v248_v22 = vunpack.c.2.s8 %v168_v12 }
  0x70   :  { %2802 = vmatmul.mubr.f32.gmra.mrb[2].mxu1 %v373_v6  ;;  %1376 = vperm.xlu0 %3209, %v570_v37   ;;  %v575_v6 = vld [vmem:[%s4245_s2 + $0xe8] sm:$0xff]  ;;  %v128_v37 = vld [vmem:[#allocation2 + $0x1b0] sm:$0xff] }
  0x72   :  { %2890 = vmatpush1.bf16.msra.mxu0 %v2889_v16  ;;  %v218_v16 = vunpack.c.0.s8 %v163_v10 }
  0x73   :  { %2891 = vmatprep.subr.bf16.mxu0 %v3312_v0  ;;  %1361 = vperm.xlu1 %3210, %v567_v23   ;;  %v3603_v23 = vld [vmem:[%s4244_s1 + $0x80] sm:$0xff] }
  0x74   :  { %v378_v20 = vcvt.s32.f32 %v218_v16  ;;  %1386 = vperm.xlu0 %3209, %v572_v52   ;;  %v244_v16 = vunpack.c.2.s8 %v3565_v50 }
  0x76   :  { %2893 = vmatpush1.bf16.msra.mxu0 %v2892_v26  ;;  %v225_v26 = vunpack.c.2.s8 %v3505_v54  ;;  %2804 = vmatprep.mubr.f32.mxu1 %v378_v20  ;;  %v121_v54 = vld [vmem:[#allocation2 + $0x178] sm:$0xff]  ;;  %v404_v28 = vcvt.s32.f32 %v244_v16 }
  0x77   :  { %2894 = vmatprep.subr.bf16.mxu0 %v3312_v0  ;;  %2805 = vmatmul.mubr.f32.gmra.mrb[4].mxu1 %v383_v24  ;;  %v2916_v60 = vpack.c.bf16 %v121_v54, %v120_v53  ;;  %v126_v24 = vld [vmem:[#allocation2 + $0x1a0] sm:$0xff]  ;;  %v1959_v54 = vld [vmem:[%s4249_s6 + $0x28] sm:$0xff] }
  0x78   :  { %v385_v34 = vcvt.s32.f32 %v225_v26  ;;  %1371 = vperm.xlu1 %3210, %v569_v33   ;;  %1396 = vperm.xlu0 %3209, %v574_v61   ;;  %v253_v26 = vunpack.c.3.s8 %v168_v12  ;;  %v255_v33 = vunpack.c.0.s8 %v3603_v23 }
  0x79   :  { %644 = vmatmul.mubr.f32.vlgmr.msra.gmra.mrb[0].mxu0 %v354_v36  ;;  %v2910_v36 = vpack.c.bf16 %v117_v30, %v116_v29  ;;  %v249_v29 = vunpack.c.3.s8 %v3565_v50  ;;  %v1955_v30 = vld [vmem:[%s4249_s6 + $0x8] sm:$0xff]  ;;  %v263_v50 = vunpack.c.1.s8 %v173_v42 }
  0x7a   :  { %648 = vmatprep.mubr.f32.mxu0 %v360_v38  ;;  %2896 = vmatpush1.bf16.msra.mxu0 %v2895_v39  ;;  %v228_v38 = vunpack.c.2.s8 %v163_v10  ;;  %v3554_v39 = vld [vmem:[%s4244_s1 + $0x58] sm:$0xff]  ;;  %v2919_v10 = vpack.c.bf16 %v123_v1, %v122_v63 }
  0x7b   :  { %2897 = vmatprep.subr.bf16.mxu0 %v3312_v0  ;;  %v245_v9 = vunpack.c.2.s8 %v3554_v39  ;;  %v250_v19 = vunpack.c.3.s8 %v3554_v39  ;;  %v1961_v63 = vld [vmem:[%s4249_s6 + $0x38] sm:$0xff] }
  0x7c   :  { %v388_v43 = vcvt.s32.f32 %v228_v38  ;;  %v129_v38 = vld [vmem:[#allocation2 + $0x1b8] sm:$0xff] }
  0x7d   :  { %649 = vmatmul.mubr.f32.gmra.mrb[2].mxu0 %v359_v46  ;;  %v571_v46 = vld [vmem:[%s4245_s2 + $0xc8] sm:$0xff]  ;;  %v405_v18 = vcvt.s32.f32 %v245_v9  ;;  %v410_v32 = vcvt.s32.f32 %v250_v19  ;;  %v2928_v45 = vpack.c.bf16 %v129_v38, %v128_v37  ;;  %v273_v9 = vunpack.c.3.s8 %v173_v42 }
  0x7e   :  { %653 = vmatprep.mubr.f32.mxu0 %v365_v49  ;;  %2899 = vmatpush1.bf16.msra.mxu0 %v2898_v51  ;;  %v235_v49 = vunpack.c.0.s8 %v3554_v39  ;;  %v2913_v51 = vpack.c.bf16 %v119_v41, %v118_v40  ;;  %v1957_v41 = vld [vmem:[%s4249_s6 + $0x18] sm:$0xff] }
  0x7f   :  { %2900 = vmatprep.subr.bf16.mxu0 %v3312_v0  ;;  %2807 = vmatprep.mubr.f32.mxu1 %v388_v43  ;;  %v415_v43 = vcvt.s32.f32 %v255_v33 }
  0x80   :  { %1381 = vperm.xlu1 %3210, %v571_v46   ;;  %2808 = vmatmul.mubr.f32.gmra.mrb[6].mxu1 %v393_v47  ;;  %v395_v58 = vcvt.s32.f32 %v235_v49  ;;  %v1958_v46 = vld [vmem:[%s4249_s6 + $0x20] sm:$0xff]  ;;  %v258_v47 = vunpack.c.0.s8 %v173_v42  ;;  %v131_v49 = vld [vmem:[#allocation2 + $0x1c8] sm:$0xff] }
  0x81   :  { %654 = vmatmul.mubr.f32.gmra.mrb[4].mxu0 %v364_v59  ;;  %v240_v59 = vunpack.c.1.s8 %v3554_v39  ;;  %v409_v39 = vcvt.s32.f32 %v249_v29 }
  0x82   :  { %658 = vmatprep.mubr.f32.mxu0 %v370_v62  ;;  %2902 = vmatpush1.bf16.msra.mxu0 %v2901_v2  ;;  %v238_v62 = vunpack.c.0.s8 %v168_v12  ;;  %v243_v2 = vunpack.c.1.s8 %v168_v12 }
  0x83   :  { %2903 = vmatprep.subr.bf16.mxu0 %v3312_v0  ;;  %v400_v8 = vcvt.s32.f32 %v240_v59  ;;  %v132_v59 = vld [vmem:[#allocation2 + $0x1d0] sm:$0xff] }
  0x84   :  { %1391 = vperm.xlu1 %3210, %v573_v57   ;;  %v398_v3 = vcvt.s32.f32 %v238_v62  ;;  %v265_v57 = vunpack.c.2.s8 %v3603_v23 }
  0x85   :  { %659 = vmatmul.mubr.f32.gmra.mrb[6].mxu0 %v369_v7  ;;  %v403_v7 = vcvt.s32.f32 %v243_v2  ;;  %v270_v2 = vunpack.c.3.s8 %v3603_v23 }
  0x86   :  { %663 = vmatprep.mubr.f32.mxu0 %v375_v11  ;;  %2905 = vmatpush1.bf16.msra.mxu0 %v2904_v14  ;;  %v576_v11 = vld [vmem:[%s4245_s2 + $0xf0] sm:$0xff]  ;;  %v125_v14 = vld [vmem:[#allocation2 + $0x198] sm:$0xff]  ;;  %v425_v1 = vcvt.s32.f32 %v265_v57  ;;  %v179_v57 = vld [vmem:[%s4244_s1 + $0xc8] sm:$0xff] }
  0x87   :  { %2906 = vmatprep.subr.bf16.mxu0 %v3312_v0  ;;  %2810 = vmatprep.mubr.f32.mxu1 %v398_v3  ;;  %v2922_v20 = vpack.c.bf16 %v125_v14, %v124_v13  ;;  %v1963_v14 = vld [vmem:[%s4249_s6 + $0x48] sm:$0xff]  ;;  %v430_v16 = vcvt.s32.f32 %v270_v2 }
  0x88   :  { %1401 = vperm.xlu1 %3210, %v575_v6   ;;  %2811 = vmatmul.mubr.f32.gmra.mrb[8].mxu1 %v403_v7  ;;  %v3652_v6 = vld [vmem:[%s4244_s1 + $0xa8] sm:$0xff]  ;;  %v134_v7 = vld [vmem:[#allocation2 + $0x1e0] sm:$0xff] }
  0x89   :  { %664 = vmatmul.mubr.f32.gmra.mrb[8].mxu0 %v374_v21  ;;  %1406 = vperm.xlu0 %3209, %v576_v11   ;;  %v1954_v21 = vld [vmem:[%s4249_s6] sm:$0xff] }
  0x8a   :  { %668 = vmatprep.mubr.f32.mxu0 %v380_v25  ;;  %2908 = vmatpush1.bf16.msra.mxu0 %v2907_v27  ;;  %v127_v25 = vld [vmem:[#allocation2 + $0x1a8] sm:$0xff]  ;;  %v408_v27 = vcvt.s32.f32 %v248_v22  ;;  %v137_v22 = vld [vmem:[#allocation2 + $0x1f8] sm:$0xff] }
  0x8b   :  { %2909 = vmatprep.subr.bf16.mxu0 %v3312_v0  ;;  %v2925_v35 = vpack.c.bf16 %v127_v25, %v126_v24  ;;  %v1965_v25 = vld [vmem:[%s4249_s6 + $0x58] sm:$0xff] }
  0x8c   :  { %1411 = vperm.xlu1 %3210, %v577_v17   ;;  %2813 = vmatprep.mubr.f32.mxu1 %v408_v27  ;;  %v275_v17 = vunpack.c.0.s8 %v3652_v6 }
  0x8d   :  { %669 = vmatmul.mubr.f32.gmra.mrb[10].mxu0 %v379_v31  ;;  %2439 = vperm.xlu0 %3209, %v1954_v21   ;;  %v413_v31 = vcvt.s32.f32 %v253_v26  ;;  %v136_v21 = vld [vmem:[#allocation2 + $0x1f0] sm:$0xff]  ;;  %v178_v26 = vld [vmem:[%s4244_s1 + $0xc0] sm:$0xff] }
  0x8e   :  { %673 = vmatprep.mubr.f32.mxu0 %v385_v34  ;;  %2911 = vmatpush1.bf16.msra.mxu0 %v2910_v36  ;;  %v3614_v34 = vld [vmem:[%s4244_s1 + $0x78] sm:$0xff]  ;;  %v1956_v36 = vld [vmem:[%s4249_s6 + $0x10] sm:$0xff]  ;;  %v435_v27 = vcvt.s32.f32 %v275_v17  ;;  %v2940_v29 = vpack.c.bf16 %v137_v22, %v136_v21 }
  0x8f   :  { %2912 = vmatprep.subr.bf16.mxu0 %v3312_v0  ;;  %2814 = vmatmul.mubr.f32.gmra.mrb[10].mxu1 %v413_v31  ;;  %v254_v40 = vunpack.c.0.s8 %v3614_v34  ;;  %v259_v53 = vunpack.c.1.s8 %v3614_v34  ;;  %v264_v62 = vunpack.c.2.s8 %v3614_v34  ;;  %v269_v13 = vunpack.c.3.s8 %v3614_v34 }
  0x90   :  { %2444 = vperm.xlu1 %3210, %v1955_v30   ;;  %v1966_v30 = vld [vmem:[%s4249_s6 + $0x60] sm:$0xff]  ;;  %v278_v31 = vunpack.c.0.s8 %v178_v26 }
  0x91   :  { %674 = vmatmul.mubr.f32.gmra.mrb[12].mxu0 %v384_v44  ;;  %2449 = vperm.xlu0 %3209, %v1956_v36   ;;  %v260_v44 = vunpack.c.1.s8 %v3603_v23  ;;  %v414_v52 = vcvt.s32.f32 %v254_v40  ;;  %v419_v61 = vcvt.s32.f32 %v259_v53  ;;  %v424_v11 = vcvt.s32.f32 %v264_v62  ;;  %v1967_v36 = vld [vmem:[%s4249_s6 + $0x68] sm:$0xff]  ;;  %v1968_v40 = vld [vmem:[%s4249_s6 + $0x70] sm:$0xff] }
  0x92   :  { %678 = vmatprep.mubr.f32.mxu0 %v390_v48  ;;  %2914 = vmatpush1.bf16.msra.mxu0 %v2913_v51  ;;  %v130_v48 = vld [vmem:[#allocation2 + $0x1c0] sm:$0xff]  ;;  %v418_v51 = vcvt.s32.f32 %v258_v47  ;;  %v429_v23 = vcvt.s32.f32 %v269_v13  ;;  %v438_v33 = vcvt.s32.f32 %v278_v31  ;;  %v288_v47 = vunpack.c.2.s8 %v178_v26  ;;  %v1971_v53 = vld [vmem:[%s4249_s6 + $0x88] sm:$0xff] }
  0x93   :  { %2915 = vmatprep.subr.bf16.mxu0 %v3312_v0  ;;  %v420_v56 = vcvt.s32.f32 %v260_v44  ;;  %v2931_v12 = vpack.c.bf16 %v131_v49, %v130_v48  ;;  %v3701_v48 = vld [vmem:[%s4244_s1 + $0xd0] sm:$0xff]  ;;  %v293_v49 = vunpack.c.3.s8 %v178_v26 }
  0x94   :  { %2454 = vperm.xlu1 %3210, %v1957_v41   ;;  %2816 = vmatprep.mubr.f32.mxu1 %v418_v51  ;;  %v310_v17 = vunpack.c.3.s8 %v3701_v48 }
  0x95   :  { %679 = vmatmul.mubr.f32.gmra.mrb[14].mxu0 %v389_v55  ;;  %2459 = vperm.xlu0 %3209, %v1958_v46   ;;  %v423_v55 = vcvt.s32.f32 %v263_v50  ;;  %v1970_v46 = vld [vmem:[%s4249_s6 + $0x80] sm:$0xff]  ;;  %v448_v50 = vcvt.s32.f32 %v288_v47  ;;  %v1984_v47 = vld [vmem:[%s4249_s6 + $0xf0] sm:$0xff] }
  0x96   :  { %683 = vmatprep.mubr.f32.mxu0 %v395_v58  ;;  %2917 = vmatpush1.bf16.msra.mxu0 %v2916_v60  ;;  %v1960_v58 = vld [vmem:[%s4249_s6 + $0x30] sm:$0xff]  ;;  %v133_v60 = vld [vmem:[#allocation2 + $0x1d8] sm:$0xff] }
  0x97   :  { %2918 = vmatprep.subr.bf16.mxu0 %v3312_v0  ;;  %2817 = vmatmul.mubr.f32.gmra.mrb[12].mxu1 %v423_v55  ;;  %v2934_v3 = vpack.c.bf16 %v133_v60, %v132_v59  ;;  %v294_v59 = vunpack.c.0.s8 %v179_v57  ;;  %v1973_v60 = vld [vmem:[%s4249_s6 + $0x98] sm:$0xff] }
  0x98   :  { %2464 = vperm.xlu1 %3210, %v1959_v54   ;;  %v453_v54 = vcvt.s32.f32 %v293_v49 }
  0x99   :  { %684 = vmatmul.mubr.f32.gmra.mrb[16].mxu0 %v394_v4  ;;  %2469 = vperm.xlu0 %3209, %v1960_v58   ;;  %v1962_v4 = vld [vmem:[%s4249_s6 + $0x40] sm:$0xff] }
  0x9a   :  { %688 = vmatprep.mubr.f32.mxu0 %v400_v8  ;;  %2920 = vmatpush1.bf16.msra.mxu0 %v2919_v10  ;;  %v135_v8 = vld [vmem:[#allocation2 + $0x1e8] sm:$0xff]  ;;  %v428_v10 = vcvt.s32.f32 %v268_v5  ;;  %v454_v5 = vcvt.s32.f32 %v294_v59 }
  0x9b   :  { %2921 = vmatprep.subr.bf16.mxu0 %v3312_v0  ;;  %v2937_v19 = vpack.c.bf16 %v135_v8, %v134_v7  ;;  %v1975_v7 = vld [vmem:[%s4249_s6 + $0xa8] sm:$0xff] }
  0x9c   :  { %2474 = vperm.xlu1 %3210, %v1961_v63   ;;  %2819 = vmatprep.mubr.f32.mxu1 %v428_v10  ;;  %v300_v63 = vunpack.c.1.s8 %v3701_v48  ;;  %v305_v10 = vunpack.c.2.s8 %v3701_v48 }
  0x9d   :  { %689 = vmatmul.mubr.f32.gmra.mrb[18].mxu0 %v399_v15  ;;  %2479 = vperm.xlu0 %3209, %v1962_v4   ;;  %v433_v15 = vcvt.s32.f32 %v273_v9 }
  0x9e   :  { %693 = vmatprep.mubr.f32.mxu0 %v405_v18  ;;  %2923 = vmatpush1.bf16.msra.mxu0 %v2922_v20  ;;  %v3663_v18 = vld [vmem:[%s4244_s1 + $0xa0] sm:$0xff]  ;;  %v1964_v20 = vld [vmem:[%s4249_s6 + $0x50] sm:$0xff]  ;;  %v460_v9 = vcvt.s32.f32 %v300_v63 }
  0x9f   :  { %2924 = vmatprep.subr.bf16.mxu0 %v3312_v0  ;;  %2820 = vmatmul.mubr.f32.gmra.mrb[14].mxu1 %v433_v15  ;;  %v274_v24 = vunpack.c.0.s8 %v3663_v18  ;;  %v284_v42 = vunpack.c.2.s8 %v3663_v18  ;;  %v1977_v15 = vld [vmem:[%s4249_s6 + $0xb8] sm:$0xff] }
  0xa0   :  { %2484 = vperm.xlu1 %3210, %v1963_v14   ;;  %2822 = vmatprep.mubr.f32.mxu1 %v438_v33  ;;  %v304_v14 = vunpack.c.2.s8 %v179_v57  ;;  %v1981_v33 = vld [vmem:[%s4249_s6 + $0xd8] sm:$0xff] }
  0xa1   :  { %694 = vmatmul.mubr.f32.gmra.mrb[20].mxu0 %v404_v28  ;;  %2489 = vperm.xlu0 %3209, %v1964_v20   ;;  %v280_v28 = vunpack.c.1.s8 %v3652_v6  ;;  %v434_v34 = vcvt.s32.f32 %v274_v24  ;;  %v444_v51 = vcvt.s32.f32 %v284_v42  ;;  %v3741_v20 = vld [vmem:[%s4244_s1 + $0xf8] sm:$0xff]  ;;  %v309_v24 = vunpack.c.3.s8 %v179_v57 }
  0xa2   :  { %698 = vmatprep.mubr.f32.mxu0 %v410_v32  ;;  %2926 = vmatpush1.bf16.msra.mxu0 %v2925_v35  ;;  %v283_v32 = vunpack.c.1.s8 %v178_v26  ;;  %v279_v35 = vunpack.c.1.s8 %v3663_v18 }
  0xa3   :  { %2927 = vmatprep.subr.bf16.mxu0 %v3312_v0  ;;  %v440_v38 = vcvt.s32.f32 %v280_v28  ;;  %v315_v28 = vunpack.c.0.s8 %v3741_v20  ;;  %v469_v31 = vcvt.s32.f32 %v309_v24 }
  0xa4   :  { %2494 = vperm.xlu1 %3210, %v1965_v25   ;;  %v443_v37 = vcvt.s32.f32 %v283_v32  ;;  %v439_v41 = vcvt.s32.f32 %v279_v35  ;;  %v1979_v25 = vld [vmem:[%s4249_s6 + $0xc8] sm:$0xff] }
  0xa5   :  { %699 = vmatmul.mubr.f32.gmra.mrb[22].mxu0 %v409_v39  ;;  %2499 = vperm.xlu0 %3209, %v1966_v30   ;;  %v285_v39 = vunpack.c.2.s8 %v3652_v6  ;;  %v1980_v30 = vld [vmem:[%s4249_s6 + $0xd0] sm:$0xff]  ;;  %v475_v35 = vcvt.s32.f32 %v315_v28 }
  0xa6   :  { %703 = vmatprep.mubr.f32.mxu0 %v415_v43  ;;  %2929 = vmatpush1.bf16.msra.mxu0 %v2928_v45  ;;  %v1969_v43 = vld [vmem:[%s4249_s6 + $0x78] sm:$0xff]  ;;  %v290_v45 = vunpack.c.3.s8 %v3652_v6  ;;  %v299_v6 = vunpack.c.1.s8 %v179_v57 }
  0xa7   :  { %2930 = vmatprep.subr.bf16.mxu0 %v3312_v0  ;;  %2823 = vmatmul.mubr.f32.gmra.mrb[16].mxu1 %v443_v37  ;;  %v445_v44 = vcvt.s32.f32 %v285_v39  ;;  %v1982_v37 = vld [vmem:[%s4249_s6 + $0xe0] sm:$0xff] }
  0xa8   :  { %2504 = vperm.xlu1 %3210, %v1967_v36   ;;  %v450_v55 = vcvt.s32.f32 %v290_v45  ;;  %2825 = vmatprep.mubr.f32.mxu1 %v448_v50  ;;  %v459_v13 = vcvt.s32.f32 %v299_v6  ;;  %v320_v36 = vunpack.c.1.s8 %v3741_v20  ;;  %v1985_v50 = vld [vmem:[%s4249_s6 + $0xf8] sm:$0xff] }
  0xa9   :  { %704 = vmatmul.mubr.f32.gmra.mrb[24].mxu0 %v414_v52  ;;  %2509 = vperm.xlu0 %3209, %v1968_v40   ;;  %v289_v52 = vunpack.c.3.s8 %v3663_v18  ;;  %v1978_v18 = vld [vmem:[%s4249_s6 + $0xc0] sm:$0xff] }
  0xaa   :  { %708 = vmatprep.mubr.f32.mxu0 %v420_v56  ;;  %2932 = vmatpush1.bf16.msra.mxu0 %v2931_v12  ;;  %v295_v56 = vunpack.c.0.s8 %v3701_v48  ;;  %v1972_v12 = vld [vmem:[%s4249_s6 + $0x90] sm:$0xff]  ;;  %v480_v45 = vcvt.s32.f32 %v320_v36 }
  0xab   :  { %2933 = vmatprep.subr.bf16.mxu0 %v3312_v0  ;;  %2826 = vmatmul.mubr.f32.gmra.mrb[18].mxu1 %v453_v54  ;;  %v449_v58 = vcvt.s32.f32 %v289_v52  ;;  %v330_v52 = vunpack.c.3.s8 %v3741_v20  ;;  %v190_v54 = vld [vmem:[%s4244_s1 + $0x120] sm:$0xff] }
  0xac   :  { %2514 = vperm.xlu1 %3210, %v1969_v43   ;;  %v455_v62 = vcvt.s32.f32 %v295_v56  ;;  %v1983_v43 = vld [vmem:[%s4249_s6 + $0xe8] sm:$0xff] }
  0xad   :  { %709 = vmatmul.mubr.f32.gmra.mrb[26].mxu0 %v419_v61  ;;  %2519 = vperm.xlu0 %3209, %v1970_v46   ;;  %v183_v61 = vld [vmem:[%s4244_s1 + $0xe8] sm:$0xff]  ;;  %v325_v46 = vunpack.c.2.s8 %v3741_v20  ;;  %v490_v59 = vcvt.s32.f32 %v330_v52 }
  0xae   :  { %713 = vmatprep.mubr.f32.mxu0 %v425_v1  ;;  %2935 = vmatpush1.bf16.msra.mxu0 %v2934_v3  ;;  %v1974_v1 = vld [vmem:[%s4249_s6 + $0xa0] sm:$0xff]  ;;  %v298_v2 = vunpack.c.0.s8 %v183_v61  ;;  %v303_v3 = vunpack.c.1.s8 %v183_v61  ;;  %v313_v21 = vunpack.c.3.s8 %v183_v61 }
  0xaf   :  { %2936 = vmatprep.subr.bf16.mxu0 %v3312_v0 }
  0xb0   :  { %2524 = vperm.xlu1 %3210, %v1971_v53   ;;  %v458_v4 = vcvt.s32.f32 %v298_v2  ;;  %v463_v8 = vcvt.s32.f32 %v303_v3  ;;  %v473_v26 = vcvt.s32.f32 %v313_v21  ;;  %v340_v3 = vunpack.c.1.s8 %v190_v54 }
  0xb1   :  { %714 = vmatmul.mubr.f32.gmra.mrb[28].mxu0 %v424_v11  ;;  %2529 = vperm.xlu0 %3209, %v1972_v12   ;;  %v1976_v11 = vld [vmem:[%s4249_s6 + $0xb0] sm:$0xff] }
  0xb2   :  { %718 = vmatprep.mubr.f32.mxu0 %v430_v16  ;;  %2938 = vmatpush1.bf16.msra.mxu0 %v2937_v19  ;;  %v465_v16 = vcvt.s32.f32 %v305_v10  ;;  %v308_v19 = vunpack.c.2.s8 %v183_v61  ;;  %v189_v61 = vld [vmem:[%s4244_s1 + $0x118] sm:$0xff]  ;;  %v500_v10 = vcvt.s32.f32 %v340_v3  ;;  %v528_v3 = vld [vmem:[#allocation5 + $0x70] sm:$0xff] }
  0xb3   :  { %2939 = vmatprep.subr.bf16.mxu0 %v3312_v0  ;;  %2828 = vmatprep.mubr.f32.mxu1 %v458_v4  ;;  %v334_v63 = vunpack.c.0.s8 %v189_v61 }
  0xb4   :  { %2534 = vperm.xlu1 %3210, %v1973_v60   ;;  %2829 = vmatmul.mubr.f32.gmra.mrb[20].mxu1 %v463_v8  ;;  %v468_v22 = vcvt.s32.f32 %v308_v19  ;;  %v335_v60 = vunpack.c.0.s8 %v190_v54  ;;  %v339_v8 = vunpack.c.1.s8 %v189_v61 }
  0xb5   :  { %719 = vmatmul.mubr.f32.gmra.mrb[30].mxu0 %v429_v23  ;;  %2539 = vperm.xlu0 %3209, %v1974_v1   ;;  %v464_v23 = vcvt.s32.f32 %v304_v14  ;;  %v193_v1 = vld [vmem:[%s4244_s1 + $0x138] sm:$0xff]  ;;  %v344_v14 = vunpack.c.2.s8 %v189_v61 }
  0xb6   :  { %723 = vmatprep.mubr.f32.mxu0 %v435_v27  ;;  %2941 = vmatpush1.bf16.msra.mxu0 %v2940_v29  ;;  %v470_v27 = vcvt.s32.f32 %v310_v17  ;;  %v184_v29 = vld [vmem:[%s4244_s1 + $0xf0] sm:$0xff]  ;;  %v495_v2 = vcvt.s32.f32 %v335_v60  ;;  %v338_v4 = vunpack.c.0.s8 %v193_v1  ;;  %v348_v17 = vunpack.c.2.s8 %v193_v1 }
  0xb7   :  { %3054 = vmatprep.subr.bf16.mxu0 %v3312_v0  ;;  %2831 = vmatprep.mubr.f32.mxu1 %v468_v22  ;;  %v314_v32 = vunpack.c.0.s8 %v184_v29  ;;  %v319_v42 = vunpack.c.1.s8 %v184_v29  ;;  %v324_v49 = vunpack.c.2.s8 %v184_v29  ;;  %v329_v12 = vunpack.c.3.s8 %v184_v29 }
  0xb8   :  { %2544 = vperm.xlu1 %3210, %v1975_v7   ;;  %2832 = vmatmul.mubr.f32.gmra.mrb[22].mxu1 %v473_v26  ;;  %v498_v6 = vcvt.s32.f32 %v338_v4  ;;  %v494_v7 = vcvt.s32.f32 %v334_v63  ;;  %v353_v19 = vunpack.c.3.s8 %v193_v1  ;;  %v508_v20 = vcvt.s32.f32 %v348_v17  ;;  %v156_v26 = vld [vmem:[%s4244_s1 + $0x10] sm:$0xff]  ;;  %v161_v63 = vld [vmem:[%s4244_s1 + $0x38] sm:$0xff]  ;;  %v531_v4 = vld [vmem:[#allocation5 + $0x88] sm:$0xff] }
  0xb9   :  { %724 = vmatmul.mubr.f32.gmra.mrb[32].mxu0 %v434_v34  ;;  %2549 = vperm.xlu0 %3209, %v1976_v11   ;;  %v188_v34 = vld [vmem:[%s4244_s1 + $0x110] sm:$0xff]  ;;  %v479_v48 = vcvt.s32.f32 %v319_v42  ;;  %v484_v57 = vcvt.s32.f32 %v324_v49  ;;  %v345_v11 = vunpack.c.2.s8 %v190_v54  ;;  %v504_v21 = vcvt.s32.f32 %v344_v14 }
  0xba   :  { %728 = vmatprep.mubr.f32.mxu0 %v440_v38  ;;  %v318_v38 = vunpack.c.0.s8 %v188_v34  ;;  %v323_v39 = vunpack.c.1.s8 %v188_v34  ;;  %v328_v53 = vunpack.c.2.s8 %v188_v34  ;;  %v349_v22 = vunpack.c.3.s8 %v189_v61  ;;  %v532_v14 = vld [vmem:[#allocation5 + $0x90] sm:$0xff] }
  0xbb   :  { %v196_v28 = vunpack.c.0.s8 %v156_v26  ;;  %v206_v49 = vunpack.c.2.s8 %v156_v26 }
  0xbc   :  { %2554 = vperm.xlu1 %3210, %v1977_v15   ;;  %v478_v40 = vcvt.s32.f32 %v318_v38  ;;  %v488_v56 = vcvt.s32.f32 %v328_v53  ;;  %v505_v15 = vcvt.s32.f32 %v345_v11 }
  0xbd   :  { %729 = vmatmul.mubr.f32.gmra.mrb[34].mxu0 %v439_v41  ;;  %2559 = vperm.xlu0 %3209, %v1978_v18   ;;  %v474_v41 = vcvt.s32.f32 %v314_v32  ;;  %v157_v18 = vld [vmem:[%s4244_s1 + $0x18] sm:$0xff]  ;;  %v201_v32 = vunpack.c.1.s8 %v156_v26 }
  0xbe   :  { %733 = vmatprep.mubr.f32.mxu0 %v445_v44  ;;  %v483_v44 = vcvt.s32.f32 %v323_v39  ;;  %2834 = vmatprep.mubr.f32.mxu1 %v478_v40  ;;  %v516_v39 = vld [vmem:[#allocation5 + $0x10] sm:$0xff]  ;;  %v519_v40 = vld [vmem:[#allocation5 + $0x28] sm:$0xff]  ;;  %v212_v52 = vunpack.c.3.s8 %v157_v18 }
  0xc0   :  { %2564 = vperm.xlu1 %3210, %v1979_v25   ;;  %2835 = vmatmul.mubr.f32.gmra.mrb[24].mxu1 %v483_v44  ;;  %v197_v25 = vunpack.c.0.s8 %v157_v18  ;;  %v518_v44 = vld [vmem:[#allocation5 + $0x20] sm:$0xff]  ;;  %v372_v61 = vcvt.s32.f32 %v212_v52 }
  0xc1   :  { %734 = vmatmul.mubr.f32.gmra.mrb[36].mxu0 %v444_v51  ;;  %2569 = vperm.xlu0 %3209, %v1980_v30   ;;  %v485_v51 = vcvt.s32.f32 %v325_v46  ;;  %v202_v30 = vunpack.c.1.s8 %v157_v18  ;;  %v523_v46 = vld [vmem:[#allocation5 + $0x48] sm:$0xff] }
  0xc2   :  { %738 = vmatprep.mubr.f32.mxu0 %v450_v55  ;;  %v333_v55 = vunpack.c.3.s8 %v188_v34  ;;  %2837 = vmatprep.mubr.f32.mxu1 %v488_v56  ;;  %v357_v29 = vcvt.s32.f32 %v197_v25  ;;  %v517_v34 = vld [vmem:[#allocation5 + $0x18] sm:$0xff]  ;;  %v3792_v56 = vld [vmem:[%s4244_s1 + $0x40] sm:$0xff]  ;;  %v539_v25 = vld [vmem:[#allocation5 + $0xc8] sm:$0xff] }
  0xc3   :  { %v362_v36 = vcvt.s32.f32 %v202_v30 }
  0xc4   :  { %2574 = vperm.xlu1 %3210, %v1981_v33   ;;  %v515_v33 = vld [vmem:[#allocation5 + $0x8] sm:$0xff] }
  0xc5   :  { %739 = vmatmul.mubr.f32.gmra.mrb[38].mxu0 %v449_v58  ;;  %2579 = vperm.xlu0 %3209, %v1982_v37   ;;  %v493_v58 = vcvt.s32.f32 %v333_v55  ;;  %v207_v37 = vunpack.c.2.s8 %v157_v18  ;;  %v2974_v38 = vpack.c.bf16 %v517_v34, %v515_v33  ;;  %v524_v55 = vld [vmem:[#allocation5 + $0x50] sm:$0xff]  ;;  %v221_v18 = vunpack.c.1.s8 %v161_v63  ;;  %v538_v33 = vld [vmem:[#allocation5 + $0xc0] sm:$0xff] }
  0xc6   :  { %743 = vmatprep.mubr.f32.mxu0 %v455_v62  ;;  %v489_v62 = vcvt.s32.f32 %v329_v12  ;;  %v529_v12 = vld [vmem:[#allocation5 + $0x78] sm:$0xff]  ;;  %v540_v34 = vld [vmem:[#allocation5 + $0xd0] sm:$0xff] }
  0xc7   :  { %2838 = vmatmul.mubr.f32.gmra.mrb[26].mxu1 %v493_v58  ;;  %2975 = vmatprep.subr.bf16.mxu1 %v2974_v38  ;;  %v366_v58 = vcvt.s32.f32 %v206_v49  ;;  %v3000_v38 = vpack.c.bf16 %v540_v34, %v538_v33 }
  0xc8   :  { %2584 = vperm.xlu1 %3210, %v1983_v43   ;;  %2840 = vmatprep.mubr.f32.mxu1 %v498_v6 }
  0xc9   :  { %744 = vmatmul.mubr.f32.gmra.mrb[40].mxu0 %v454_v5  ;;  %2589 = vperm.xlu0 %3209, %v1984_v47   ;;  %v343_v5 = vunpack.c.1.s8 %v193_v1  ;;  %v525_v47 = vld [vmem:[#allocation5 + $0x58] sm:$0xff] }
  0xca   :  { %748 = vmatprep.mubr.f32.mxu0 %v460_v9  ;;  %v2982_v53 = vpack.c.bf16 %v525_v47, %v523_v46 }
  0xcb   :  { %v503_v9 = vcvt.s32.f32 %v343_v5  ;;  %v533_v5 = vld [vmem:[#allocation5 + $0x98] sm:$0xff] }
  0xcc   :  { %2594 = vperm.xlu1 %3210, %v1985_v50   ;;  %v2990_v11 = vpack.c.bf16 %v533_v5, %v531_v4 }
  0xcd   :  { %749 = vmatmul.mubr.f32.gmra.mrb[42].mxu0 %v459_v13  ;;  %2841 = vmatmul.mubr.f32.gmra.mrb[28].mxu1 %v503_v9  ;;  %v499_v13 = vcvt.s32.f32 %v339_v8 }
  0xce   :  { %753 = vmatprep.mubr.f32.mxu0 %v465_v16  ;;  %v350_v16 = vunpack.c.3.s8 %v190_v54  ;;  %2843 = vmatprep.mubr.f32.mxu1 %v508_v20  ;;  %v522_v54 = vld [vmem:[#allocation5 + $0x40] sm:$0xff] }
  0xcf   :  { %v2984_v60 = vpack.c.bf16 %v524_v55, %v522_v54  ;;  %v172_v54 = vld [vmem:[%s4244_s1 + $0x90] sm:$0xff] }
  0xd0   :  { %v510_v24 = vcvt.s32.f32 %v350_v16  ;;  %v537_v16 = vld [vmem:[#allocation5 + $0xb8] sm:$0xff] }
  0xd1   :  { %754 = vmatmul.mubr.f32.gmra.mrb[44].mxu0 %v464_v23  ;;  %v513_v23 = vcvt.s32.f32 %v353_v19 }
  0xd2   :  { %758 = vmatprep.mubr.f32.mxu0 %v470_v27  ;;  %v509_v27 = vcvt.s32.f32 %v349_v22 }
  0xd3   :  { %2844 = vmatmul.mubr.f32.gmra.mrb[30].mxu1 %v513_v23  ;;  %v534_v23 = vld [vmem:[#allocation5 + $0xa0] sm:$0xff] }
  0xd5   :  { %759 = vmatmul.mubr.f32.gmra.mrb[46].mxu0 %v469_v31  ;;  %v356_v31 = vcvt.s32.f32 %v196_v28  ;;  %v226_v28 = vunpack.c.2.s8 %v161_v63 }
  0xd6   :  { %763 = vmatprep.mubr.f32.mxu0 %v475_v35  ;;  %v514_v35 = vld [vmem:[#allocation5] sm:$0xff] }
  0xd7   :  { %v2976_v42 = vpack.c.bf16 %v516_v39, %v514_v35  ;;  %v167_v35 = vld [vmem:[%s4244_s1 + $0x68] sm:$0xff] }
  0xd8   :  { %v247_v49 = vunpack.c.2.s8 %v167_v35 }
  0xd9   :  { %764 = vmatmul.mubr.f32.gmra.mrb[48].mxu0 %v474_v41  ;;  %v521_v41 = vld [vmem:[#allocation5 + $0x38] sm:$0xff]  ;;  %2977 = vmatpush1.bf16.msra.mxu1 %v2976_v42 }
  0xda   :  { %768 = vmatprep.mubr.f32.mxu0 %v480_v45  ;;  %v2978_v43 = vpack.c.bf16 %v521_v41, %v519_v40  ;;  %v520_v45 = vld [vmem:[#allocation5 + $0x30] sm:$0xff]  ;;  %v237_v40 = vunpack.c.0.s8 %v167_v35  ;;  %v166_v41 = vld [vmem:[%s4244_s1 + $0x60] sm:$0xff]  ;;  %v407_v52 = vcvt.s32.f32 %v247_v49 }
  0xdb   :  { %v2980_v50 = vpack.c.bf16 %v520_v45, %v518_v44  ;;  %v242_v45 = vunpack.c.1.s8 %v167_v35  ;;  %v241_v47 = vunpack.c.1.s8 %v166_v41  ;;  %v542_v49 = vld [vmem:[#allocation5 + $0xe0] sm:$0xff] }
  0xdc   :  { %2979 = vmatprep.subr.bf16.mxu1 %v2978_v43  ;;  %v236_v43 = vunpack.c.0.s8 %v166_v41  ;;  %v397_v44 = vcvt.s32.f32 %v237_v40 }
  0xdd   :  { %769 = vmatmul.mubr.f32.gmra.mrb[50].mxu0 %v479_v48  ;;  %v361_v48 = vcvt.s32.f32 %v201_v32  ;;  %2981 = vmatpush1.bf16.msra.mxu1 %v2980_v50  ;;  %v401_v50 = vcvt.s32.f32 %v241_v47  ;;  %v187_v47 = vld [vmem:[%s4244_s1 + $0x108] sm:$0xff] }
  0xde   :  { %773 = vmatprep.mubr.f32.mxu0 %v485_v51  ;;  %v367_v51 = vcvt.s32.f32 %v207_v37  ;;  %2983 = vmatprep.subr.bf16.mxu1 %v2982_v53  ;;  %v231_v37 = vunpack.c.3.s8 %v161_v63  ;;  %v396_v46 = vcvt.s32.f32 %v236_v43  ;;  %v252_v53 = vunpack.c.3.s8 %v167_v35 }
  0xe0   :  { %v391_v42 = vcvt.s32.f32 %v231_v37 }
  0xe1   :  { %774 = vmatmul.mubr.f32.gmra.mrb[52].mxu0 %v484_v57  ;;  %v527_v57 = vld [vmem:[#allocation5 + $0x68] sm:$0xff]  ;;  %2985 = vmatpush1.bf16.msra.mxu1 %v2984_v60 }
  0xe2   :  { %778 = vmatprep.mubr.f32.mxu0 %v490_v59  ;;  %v211_v59 = vunpack.c.3.s8 %v156_v26  ;;  %v2986_v1 = vpack.c.bf16 %v529_v12, %v527_v57  ;;  %v541_v26 = vld [vmem:[#allocation5 + $0xd8] sm:$0xff]  ;;  %v412_v57 = vcvt.s32.f32 %v252_v53  ;;  %v257_v12 = vunpack.c.0.s8 %v172_v54 }
  0xe3   :  { %v2998_v32 = vpack.c.bf16 %v541_v26, %v539_v25 }
  0xe4   :  { %v371_v6 = vcvt.s32.f32 %v211_v59  ;;  %2987 = vmatprep.subr.bf16.mxu1 %v2986_v1 }
  0xe5   :  { %779 = vmatmul.mubr.f32.gmra.mrb[54].mxu0 %v489_v62  ;;  %v217_v62 = vunpack.c.0.s8 %v3792_v56 }
  0xe6   :  { %783 = vmatprep.mubr.f32.mxu0 %v495_v2  ;;  %v526_v2 = vld [vmem:[#allocation5 + $0x60] sm:$0xff] }
  0xe7   :  { %v2988_v8 = vpack.c.bf16 %v528_v3, %v526_v2  ;;  %v377_v9 = vcvt.s32.f32 %v217_v62  ;;  %v262_v62 = vunpack.c.1.s8 %v172_v54  ;;  %v267_v3 = vunpack.c.2.s8 %v172_v54 }
  0xe9   :  { %784 = vmatmul.mubr.f32.gmra.mrb[56].mxu0 %v494_v7  ;;  %v216_v7 = vunpack.c.0.s8 %v161_v63  ;;  %2989 = vmatpush1.bf16.msra.mxu1 %v2988_v8  ;;  %v422_v2 = vcvt.s32.f32 %v262_v62  ;;  %v177_v8 = vld [vmem:[%s4244_s1 + $0xb8] sm:$0xff] }
  0xea   :  { %788 = vmatprep.mubr.f32.mxu0 %v500_v10  ;;  %v222_v10 = vunpack.c.1.s8 %v3792_v56  ;;  %2991 = vmatprep.subr.bf16.mxu1 %v2990_v11  ;;  %v292_v26 = vunpack.c.3.s8 %v177_v8 }
  0xeb   :  { %v376_v17 = vcvt.s32.f32 %v216_v7  ;;  %v272_v7 = vunpack.c.3.s8 %v172_v54 }
  0xec   :  { %v382_v20 = vcvt.s32.f32 %v222_v10 }
  0xed   :  { %789 = vmatmul.mubr.f32.gmra.mrb[58].mxu0 %v499_v13  ;;  %v530_v13 = vld [vmem:[#allocation5 + $0x80] sm:$0xff]  ;;  %v432_v11 = vcvt.s32.f32 %v272_v7 }
  0xee   :  { %793 = vmatprep.mubr.f32.mxu0 %v505_v15  ;;  %v535_v15 = vld [vmem:[#allocation5 + $0xa8] sm:$0xff]  ;;  %v2992_v19 = vpack.c.bf16 %v532_v14, %v530_v13  ;;  %v277_v13 = vunpack.c.0.s8 %v177_v8  ;;  %v176_v14 = vld [vmem:[%s4244_s1 + $0xb0] sm:$0xff] }
  0xef   :  { %v2994_v22 = vpack.c.bf16 %v537_v16, %v535_v15  ;;  %v276_v16 = vunpack.c.0.s8 %v176_v14 }
  0xf0   :  { %2993 = vmatpush1.bf16.msra.mxu1 %v2992_v19 }
  0xf1   :  { %794 = vmatmul.mubr.f32.gmra.mrb[60].mxu0 %v504_v21  ;;  %v227_v21 = vunpack.c.2.s8 %v3792_v56  ;;  %2995 = vmatprep.subr.bf16.mxu1 %v2994_v22  ;;  %v436_v19 = vcvt.s32.f32 %v276_v16  ;;  %v287_v22 = vunpack.c.2.s8 %v177_v8 }
  0xf2   :  { %798 = vmatprep.mubr.f32.mxu0 %v510_v24  ;;  %v536_v24 = vld [vmem:[#allocation5 + $0xb0] sm:$0xff] }
  0xf3   :  { %v387_v30 = vcvt.s32.f32 %v227_v21  ;;  %v447_v25 = vcvt.s32.f32 %v287_v22 }
  0xf5   :  { %799 = vmatmul.mubr.f32.gmra.mrb[62].mxu0 %v509_v27  ;;  %v381_v27 = vcvt.s32.f32 %v221_v18  ;;  %v282_v18 = vunpack.c.1.s8 %v177_v8 }
  0xf6   :  { %868 = vmatprep.mubr.f32.mxu0 %v357_v29  ;;  %v2996_v29 = vpack.c.bf16 %v536_v24, %v534_v23  ;;  %v286_v24 = vunpack.c.2.s8 %v176_v14 }
  0xf7   :  { %v442_v21 = vcvt.s32.f32 %v282_v18  ;;  %v191_v18 = vld [vmem:[%s4244_s1 + $0x128] sm:$0xff] }
  0xf8   :  { %2997 = vmatpush1.bf16.msra.mxu1 %v2996_v29  ;;  %v291_v29 = vunpack.c.3.s8 %v176_v14 }
  0xf9   :  { %869 = vmatmul.mubr.f32.vlgmr.msra.gmra.mrb[0].mxu0 %v356_v31  ;;  %v232_v31 = vunpack.c.3.s8 %v3792_v56  ;;  %2999 = vmatprep.subr.bf16.mxu1 %v2998_v32  ;;  %v251_v56 = vunpack.c.3.s8 %v166_v41  ;;  %v181_v32 = vld [vmem:[%s4244_s1 + $0xd8] sm:$0xff] }
  0xfa   :  { %873 = vmatprep.mubr.f32.mxu0 %v362_v36  ;;  %v386_v36 = vcvt.s32.f32 %v226_v28  ;;  %v446_v28 = vcvt.s32.f32 %v286_v24  ;;  %v451_v33 = vcvt.s32.f32 %v291_v29  ;;  %v296_v34 = vunpack.c.0.s8 %v181_v32 }
  0xfb   :  { %v392_v39 = vcvt.s32.f32 %v232_v31  ;;  %v411_v59 = vcvt.s32.f32 %v251_v56  ;;  %v311_v53 = vunpack.c.3.s8 %v181_v32  ;;  %v186_v56 = vld [vmem:[%s4244_s1 + $0x100] sm:$0xff] }
  0xfc   :  { %3001 = vmatpush1.bf16.msra.mxu1 %v3000_v38  ;;  %v456_v37 = vcvt.s32.f32 %v296_v34  ;;  %v301_v38 = vunpack.c.1.s8 %v181_v32  ;;  %v326_v7 = vunpack.c.2.s8 %v186_v56 }
  0xfd   :  { %874 = vmatmul.mubr.f32.gmra.mrb[2].mxu0 %v361_v48  ;;  %v402_v48 = vcvt.s32.f32 %v242_v45  ;;  %v543_v45 = vld [vmem:[#allocation5 + $0xe8] sm:$0xff] }
  0xfe   :  { %878 = vmatprep.mubr.f32.mxu0 %v367_v51  ;;  %v246_v51 = vunpack.c.2.s8 %v166_v41  ;;  %v461_v41 = vcvt.s32.f32 %v301_v38 }
 0x100   :  { %v406_v55 = vcvt.s32.f32 %v246_v51 }
 0x101   :  { %879 = vmatmul.mubr.f32.gmra.mrb[4].mxu0 %v366_v58  ;;  %v171_v58 = vld [vmem:[%s4244_s1 + $0x88] sm:$0xff] }
 0x102   :  { %883 = vmatprep.mubr.f32.mxu0 %v372_v61  ;;  %v256_v60 = vunpack.c.0.s8 %v171_v58  ;;  %v417_v61 = vcvt.s32.f32 %v257_v12  ;;  %v261_v1 = vunpack.c.1.s8 %v171_v58  ;;  %v266_v5 = vunpack.c.2.s8 %v171_v58 }
 0x103   :  { %v271_v10 = vunpack.c.3.s8 %v171_v58  ;;  %v471_v12 = vcvt.s32.f32 %v311_v53  ;;  %v316_v58 = vunpack.c.0.s8 %v186_v56 }
 0x104   :  { %v416_v63 = vcvt.s32.f32 %v256_v60  ;;  %v421_v4 = vcvt.s32.f32 %v261_v1  ;;  %v322_v60 = vunpack.c.1.s8 %v187_v47  ;;  %v321_v1 = vunpack.c.1.s8 %v186_v56 }
 0x105   :  { %884 = vmatmul.mubr.f32.gmra.mrb[6].mxu0 %v371_v6  ;;  %v427_v6 = vcvt.s32.f32 %v267_v3  ;;  %v431_v15 = vcvt.s32.f32 %v271_v10  ;;  %v327_v3 = vunpack.c.2.s8 %v187_v47  ;;  %v192_v10 = vld [vmem:[%s4244_s1 + $0x130] sm:$0xff] }
 0x106   :  { %888 = vmatprep.mubr.f32.mxu0 %v377_v9  ;;  %v426_v9 = vcvt.s32.f32 %v266_v5  ;;  %v342_v22 = vunpack.c.1.s8 %v192_v10 }
 0x107   :  { %v487_v8 = vcvt.s32.f32 %v327_v3 }
 0x109   :  { %889 = vmatmul.mubr.f32.gmra.mrb[8].mxu0 %v376_v17  ;;  %v437_v17 = vcvt.s32.f32 %v277_v13 }
 0x10a   :  { %893 = vmatprep.mubr.f32.mxu0 %v382_v20  ;;  %v281_v20 = vunpack.c.1.s8 %v176_v14  ;;  %v486_v14 = vcvt.s32.f32 %v326_v7 }
 0x10c   :  { %v441_v23 = vcvt.s32.f32 %v281_v20  ;;  %v336_v20 = vunpack.c.0.s8 %v191_v18 }
 0x10d   :  { %894 = vmatmul.mubr.f32.gmra.mrb[10].mxu0 %v381_v27  ;;  %v182_v27 = vld [vmem:[%s4244_s1 + $0xe0] sm:$0xff] }
 0x10e   :  { %898 = vmatprep.mubr.f32.mxu0 %v387_v30  ;;  %v452_v30 = vcvt.s32.f32 %v292_v26  ;;  %v297_v31 = vunpack.c.0.s8 %v182_v27  ;;  %v307_v40 = vunpack.c.2.s8 %v182_v27  ;;  %v341_v26 = vunpack.c.1.s8 %v191_v18 }
 0x110   :  { %v457_v35 = vcvt.s32.f32 %v297_v31  ;;  %v467_v43 = vcvt.s32.f32 %v307_v40  ;;  %v501_v29 = vcvt.s32.f32 %v341_v26 }
 0x111   :  { %899 = vmatmul.mubr.f32.gmra.mrb[12].mxu0 %v386_v36  ;;  %v302_v36 = vunpack.c.1.s8 %v182_v27 }
 0x112   :  { %903 = vmatprep.mubr.f32.mxu0 %v392_v39 }
 0x113   :  { %v462_v39 = vcvt.s32.f32 %v302_v36  ;;  %v351_v36 = vunpack.c.3.s8 %v191_v18 }
 0x115   :  { %904 = vmatmul.mubr.f32.gmra.mrb[14].mxu0 %v391_v42  ;;  %v306_v42 = vunpack.c.2.s8 %v181_v32  ;;  %v352_v32 = vunpack.c.3.s8 %v192_v10  ;;  %v511_v38 = vcvt.s32.f32 %v351_v36 }
 0x116   :  { %908 = vmatprep.mubr.f32.mxu0 %v397_v44  ;;  %v312_v44 = vunpack.c.3.s8 %v182_v27  ;;  %v502_v27 = vcvt.s32.f32 %v342_v22  ;;  %v1267_v22 = vpop.permute.xlu1 %1266 }
 0x118   :  { %v472_v54 = vcvt.s32.f32 %v312_v44 }
 0x119   :  { %909 = vmatmul.mubr.f32.gmra.mrb[16].mxu0 %v396_v46  ;;  %v545_v46 = vld [vmem:[#allocation5 + $0xf8] sm:$0xff] }
 0x11a   :  { %913 = vmatprep.mubr.f32.mxu0 %v402_v48  ;;  %v3002_v48 = vpack.c.bf16 %v545_v46, %v543_v45  ;;  %v1272_v36 = vpop.permute.xlu1 %1271 }
 0x11c   :  { %3003 = vmatprep.subr.bf16.mxu1 %v3002_v48 }
 0x11d   :  { %914 = vmatmul.mubr.f32.gmra.mrb[18].mxu0 %v401_v50  ;;  %v544_v50 = vld [vmem:[#allocation5 + $0xf0] sm:$0xff] }
 0x11e   :  { %918 = vmatprep.mubr.f32.mxu0 %v407_v52  ;;  %v3004_v51 = vpack.c.bf16 %v544_v50, %v542_v49  ;;  %v466_v52 = vcvt.s32.f32 %v306_v42 }
 0x120   :  { %3005 = vmatpush1.bf16.msra.mxu1 %v3004_v51 }
 0x121   :  { %919 = vmatmul.mubr.f32.gmra.mrb[20].mxu0 %v406_v55  ;;  %v317_v55 = vunpack.c.0.s8 %v187_v47  ;;  %3006 = vmatprep.subr.bf16.mxu1 %v3312_v0 }
 0x122   :  { %923 = vmatprep.mubr.f32.mxu0 %v412_v57  ;;  %v3314_v57 = vmov 0.0  }
 0x123   :  { %1521 = vmatprep.mubr.f32.mxu1 %v3314_v57 }
 0x125   :  { %924 = vmatmul.mubr.f32.gmra.mrb[22].mxu0 %v411_v59  ;;  %v477_v59 = vcvt.s32.f32 %v317_v55 }
 0x126   :  { %928 = vmatprep.mubr.f32.mxu0 %v417_v61 }
 0x129   :  { %929 = vmatmul.mubr.f32.gmra.mrb[24].mxu0 %v416_v63  ;;  %v476_v63 = vcvt.s32.f32 %v316_v58 }
 0x12a   :  { %933 = vmatprep.mubr.f32.mxu0 %v422_v2  ;;  %v482_v2 = vcvt.s32.f32 %v322_v60 }
 0x12d   :  { %934 = vmatmul.mubr.f32.gmra.mrb[26].mxu0 %v421_v4 }
 0x12e   :  { %938 = vmatprep.mubr.f32.mxu0 %v427_v6  ;;  %v481_v6 = vcvt.s32.f32 %v321_v1  ;;  %v1923_v1 = vld [vmem:[#allocation7 + $0x8] sm:$0xff] }
 0x131   :  { %939 = vmatmul.mubr.f32.gmra.mrb[28].mxu0 %v426_v9  ;;  %v332_v9 = vunpack.c.3.s8 %v187_v47 }
 0x132   :  { %943 = vmatprep.mubr.f32.mxu0 %v432_v11 }
 0x133   :  { %v492_v16 = vcvt.s32.f32 %v332_v9 }
 0x135   :  { %944 = vmatmul.mubr.f32.gmra.mrb[30].mxu0 %v431_v15  ;;  %v331_v15 = vunpack.c.3.s8 %v186_v56 }
 0x136   :  { %948 = vmatprep.mubr.f32.mxu0 %v437_v17  ;;  %v337_v17 = vunpack.c.0.s8 %v192_v10 }
 0x139   :  { %949 = vmatmul.mubr.f32.gmra.mrb[32].mxu0 %v436_v19  ;;  %v491_v19 = vcvt.s32.f32 %v331_v15 }
 0x13a   :  { %953 = vmatprep.mubr.f32.mxu0 %v442_v21  ;;  %v497_v21 = vcvt.s32.f32 %v337_v17 }
 0x13b   :  { %v3833_v61 = vpop.f32.mrb[0].mxu1 }
 0x13c   :  { %v3835_v62 = vpop.f32.mrb[1].mxu1 }
 0x13d   :  { %954 = vmatmul.mubr.f32.gmra.mrb[34].mxu0 %v441_v23 }
 0x13e   :  { %958 = vmatprep.mubr.f32.mxu0 %v447_v25  ;;  %v496_v25 = vcvt.s32.f32 %v336_v20 }
 0x141   :  { %959 = vmatmul.mubr.f32.gmra.mrb[36].mxu0 %v446_v28  ;;  %v347_v28 = vunpack.c.2.s8 %v192_v10  ;;  %v1924_v10 = vld [vmem:[#allocation7 + $0x10] sm:$0xff] }
 0x142   :  { %963 = vmatprep.mubr.f32.mxu0 %v452_v30  ;;  %v346_v30 = vunpack.c.2.s8 %v191_v18 }
 0x143   :  { %v3837_v4 = vpop.f32.mrb[2].mxu1  ;;  %v507_v31 = vcvt.s32.f32 %v347_v28 }
 0x144   :  { %v3839_v5 = vpop.f32.mrb[3].mxu1 }
 0x145   :  { %964 = vmatmul.mubr.f32.gmra.mrb[38].mxu0 %v451_v33 }
 0x146   :  { %968 = vmatprep.mubr.f32.mxu0 %v457_v35  ;;  %v506_v35 = vcvt.s32.f32 %v346_v30  ;;  %v1929_v30 = vld [vmem:[#allocation7 + $0x38] sm:$0xff] }
 0x149   :  { %969 = vmatmul.mubr.f32.gmra.mrb[40].mxu0 %v456_v37  ;;  %v512_v37 = vcvt.s32.f32 %v352_v32 }
 0x14a   :  { %973 = vmatprep.mubr.f32.mxu0 %v462_v39  ;;  %v3844_v11 = vpop.f32.mrb[4].mxu1 }
 0x14b   :  { %v3846_v13 = vpop.f32.mrb[5].mxu1 }
 0x14d   :  { %974 = vmatmul.mubr.f32.gmra.mrb[42].mxu0 %v461_v41 }
 0x14e   :  { %978 = vmatprep.mubr.f32.mxu0 %v467_v43 }
 0x151   :  { %979 = vmatmul.mubr.f32.gmra.mrb[44].mxu0 %v466_v52 }
 0x152   :  { %983 = vmatprep.mubr.f32.mxu0 %v472_v54 }
 0x153   :  { %v3851_v23 = vpop.f32.mrb[6].mxu1 }
 0x154   :  { %v3853_v24 = vpop.f32.mrb[7].mxu1 }
 0x155   :  { %984 = vmatmul.mubr.f32.gmra.mrb[46].mxu0 %v471_v12 }
 0x156   :  { %988 = vmatprep.mubr.f32.mxu0 %v477_v59 }
 0x159   :  { %989 = vmatmul.mubr.f32.gmra.mrb[48].mxu0 %v476_v63  ;;  %v1922_v63 = vld [vmem:[#allocation7] sm:$0xff] }
 0x15a   :  { %993 = vmatprep.mubr.f32.mxu0 %v482_v2  ;;  %v1257_v2 = vpop.permute.xlu0 %1256 }
 0x15b   :  { %v3855_v33 = vpop.f32.mrb[8].mxu1 }
 0x15c   :  { %v3857_v34 = vpop.f32.mrb[9].mxu1 }
 0x15d   :  { %994 = vmatmul.mubr.f32.gmra.mrb[50].mxu0 %v481_v6 }
 0x15e   :  { %998 = vmatprep.mubr.f32.mxu0 %v487_v8  ;;  %v3007_v8 = vpack.c.bf16 %v1923_v1, %v1922_v63  ;;  %v1262_v18 = vpop.permute.xlu0 %1261  ;;  %v1931_v63 = vld [vmem:[#allocation7 + $0x48] sm:$0xff] }
 0x161   :  { %999 = vmatmul.mubr.f32.gmra.mrb[52].mxu0 %v486_v14  ;;  %v1925_v14 = vld [vmem:[#allocation7 + $0x18] sm:$0xff] }
 0x162   :  { %1003 = vmatprep.mubr.f32.mxu0 %v492_v16  ;;  %v3859_v39 = vpop.f32.mrb[10].mxu1 }
 0x163   :  { %v3861_v40 = vpop.f32.mrb[11].mxu1 }
 0x165   :  { %1004 = vmatmul.mubr.f32.gmra.mrb[54].mxu0 %v491_v19  ;;  %v3010_v19 = vpack.c.bf16 %v1925_v14, %v1924_v10 }
 0x166   :  { %1008 = vmatprep.mubr.f32.mxu0 %v497_v21  ;;  %v1926_v21 = vld [vmem:[#allocation7 + $0x20] sm:$0xff] }
 0x169   :  { %1009 = vmatmul.mubr.f32.gmra.mrb[56].mxu0 %v496_v25 }
 0x16a   :  { %1013 = vmatprep.mubr.f32.mxu0 %v502_v27  ;;  %v3863_v41 = vpop.f32.mrb[12].mxu1 }
 0x16b   :  { %v3865_v42 = vpop.f32.mrb[13].mxu1 }
 0x16d   :  { %1014 = vmatmul.mubr.f32.gmra.mrb[58].mxu0 %v501_v29  ;;  %v1928_v29 = vld [vmem:[#allocation7 + $0x30] sm:$0xff] }
 0x16e   :  { %1018 = vmatprep.mubr.f32.mxu0 %v507_v31 }
 0x171   :  { %1019 = vmatmul.mubr.f32.gmra.mrb[60].mxu0 %v506_v35 }
 0x172   :  { %1023 = vmatprep.mubr.f32.mxu0 %v512_v37  ;;  %v3867_v43 = vpop.f32.mrb[14].mxu1 }
 0x173   :  { %v3869_v44 = vpop.f32.mrb[15].mxu1 }
 0x175   :  { %1024 = vmatmul.mubr.f32.gmra.mrb[62].mxu0 %v511_v38  ;;  %v1930_v38 = vld [vmem:[#allocation7 + $0x40] sm:$0xff] }
 0x17a   :  { %v3871_v45 = vpop.f32.mrb[16].mxu1 }
 0x17b   :  { %v3873_v46 = vpop.f32.mrb[17].mxu1 }
 0x17e   :  { %v3875_v47 = vpop.f32.mrb[18].mxu1 }
 0x17f   :  { %v3877_v48 = vpop.f32.mrb[19].mxu1 }
 0x187   :  { %v3879_v49 = vpop.f32.mrb[20].mxu1 }
 0x188   :  { %v3881_v50 = vpop.f32.mrb[21].mxu1 }
 0x18b   :  { %v3883_v51 = vpop.f32.mrb[22].mxu1 }
 0x18c   :  { %v3885_v52 = vpop.f32.mrb[23].mxu1 }
 0x193   :  { %v3887_v53 = vpop.f32.mrb[24].mxu1 }
 0x194   :  { %v3889_v54 = vpop.f32.mrb[25].mxu1 }
 0x19a   :  { %v3891_v55 = vpop.f32.mrb[26].mxu1 }
 0x19b   :  { %v3893_v56 = vpop.f32.mrb[27].mxu1 }
 0x1a0   :  { %v3895_v12 = vpop.f32.mrb[28].mxu1 }
 0x1a1   :  { %v3897_v58 = vpop.f32.mrb[29].mxu1 }
 0x1a6   :  { %v3899_v59 = vpop.f32.mrb[30].mxu1 }
 0x1a7   :  { %v3901_v60 = vpop.f32.mrb[31].mxu1 }
 0x1cc   :  { %v870_v3 = vpop.f32.mrb[0].mxu0 }
 0x1cd   :  { %v1096_v6 = vadd.f32 %v3835_v62, %v870_v3  ;;  %v872_v7 = vpop.f32.mrb[1].mxu0  ;;  %v1927_v62 = vld [vmem:[#allocation7 + $0x28] sm:$0xff] }
 0x1cf   :  { %v1414_v9 = vmul.f32 %v1257_v2, %v1096_v6  ;;  %v1277_v6 = vpop.permute.xlu0 %1276 }
 0x1d0   :  { %v875_v15 = vpop.f32.mrb[2].mxu0 }
 0x1d1   :  { %v1101_v16 = vadd.f32 %v3833_v61, %v875_v15  ;;  %v877_v17 = vpop.f32.mrb[3].mxu0  ;;  %1522 = vmatmul.mubr.f32.vlgmr.msra.gmra.mrb[32].mxu1 %v1414_v9  ;;  %v3013_v61 = vpack.c.bf16 %v1927_v62, %v1926_v21  ;;  %v1933_v9 = vld [vmem:[#allocation7 + $0x58] sm:$0xff] }
 0x1d2   :  { %1527 = vmatprep.mubr.f32.mxu1 %v3314_v57  ;;  %3008 = vmatpush1.bf16.msra.mxu1 %v3007_v8  ;;  %v1932_v8 = vld [vmem:[#allocation7 + $0x50] sm:$0xff] }
 0x1d3   :  { %v1415_v20 = vmul.f32 %v1262_v18, %v1101_v16  ;;  %3009 = vmatprep.subr.bf16.mxu1 %v3312_v0  ;;  %v1282_v16 = vpop.permute.xlu1 %1281  ;;  %v1934_v18 = vld [vmem:[#allocation7 + $0x60] sm:$0xff] }
 0x1d4   :  { %v880_v25 = vpop.f32.mrb[4].mxu0 }
 0x1d5   :  { %v1106_v26 = vadd.f32 %v3839_v5, %v880_v25  ;;  %v882_v27 = vpop.f32.mrb[5].mxu0  ;;  %1528 = vmatmul.mubr.f32.gmra.mrb[34].mxu1 %v1415_v20  ;;  %v3016_v5 = vpack.c.bf16 %v1929_v30, %v1928_v29 }
 0x1d6   :  { %1533 = vmatprep.mubr.f32.mxu1 %v3314_v57  ;;  %3011 = vmatpush1.bf16.msra.mxu1 %v3010_v19  ;;  %v1935_v19 = vld [vmem:[#allocation7 + $0x68] sm:$0xff]  ;;  %v1937_v27 = vld [vmem:[#allocation7 + $0x78] sm:$0xff] }
 0x1d7   :  { %v1416_v28 = vmul.f32 %v1267_v22, %v1106_v26  ;;  %3012 = vmatprep.subr.bf16.mxu1 %v3312_v0  ;;  %v1287_v22 = vpop.permute.xlu0 %1286  ;;  %v1936_v26 = vld [vmem:[#allocation7 + $0x70] sm:$0xff]  ;;  %v1292_v30 = vpop.permute.xlu1 %1291 }
 0x1d8   :  { %v885_v31 = vpop.f32.mrb[6].mxu0 }
 0x1d9   :  { %v1111_v32 = vadd.f32 %v3837_v4, %v885_v31  ;;  %v887_v35 = vpop.f32.mrb[7].mxu0  ;;  %1534 = vmatmul.mubr.f32.gmra.mrb[36].mxu1 %v1416_v28  ;;  %v3019_v4 = vpack.c.bf16 %v1931_v63, %v1930_v38 }
 0x1da   :  { %1539 = vmatprep.mubr.f32.mxu1 %v3314_v57  ;;  %3014 = vmatpush1.bf16.msra.mxu1 %v3013_v61  ;;  %v1939_v35 = vld [vmem:[#allocation7 + $0x88] sm:$0xff] }
 0x1db   :  { %v1417_v37 = vmul.f32 %v1272_v36, %v1111_v32  ;;  %3015 = vmatprep.subr.bf16.mxu1 %v3312_v0  ;;  %v1938_v32 = vld [vmem:[#allocation7 + $0x80] sm:$0xff]  ;;  %v1297_v38 = vpop.permute.xlu0 %1296 }
 0x1dc   :  { %v890_v1 = vpop.f32.mrb[8].mxu0 }
 0x1dd   :  { %v1116_v2 = vadd.f32 %v3846_v13, %v890_v1  ;;  %v892_v3 = vpop.f32.mrb[9].mxu0  ;;  %1540 = vmatmul.mubr.f32.gmra.mrb[38].mxu1 %v1417_v37  ;;  %v3022_v13 = vpack.c.bf16 %v1933_v9, %v1932_v8  ;;  %v1940_v1 = vld [vmem:[#allocation7 + $0x90] sm:$0xff]  ;;  %v1942_v9 = vld [vmem:[#allocation7 + $0xa0] sm:$0xff] }
 0x1de   :  { %1545 = vmatprep.mubr.f32.mxu1 %v3314_v57  ;;  %3017 = vmatpush1.bf16.msra.mxu1 %v3016_v5 }
 0x1df   :  { %v1418_v7 = vmul.f32 %v1277_v6, %v1116_v2  ;;  %3018 = vmatprep.subr.bf16.mxu1 %v3312_v0  ;;  %v1941_v2 = vld [vmem:[#allocation7 + $0x98] sm:$0xff] }
 0x1e0   :  { %v895_v10 = vpop.f32.mrb[10].mxu0 }
 0x1e1   :  { %v1121_v14 = vadd.f32 %v3844_v11, %v895_v10  ;;  %v897_v15 = vpop.f32.mrb[11].mxu0  ;;  %1546 = vmatmul.mubr.f32.gmra.mrb[40].mxu1 %v1418_v7  ;;  %v3025_v11 = vpack.c.bf16 %v1935_v19, %v1934_v18  ;;  %v1302_v7 = vpop.permute.xlu1 %1301  ;;  %v1943_v10 = vld [vmem:[#allocation7 + $0xa8] sm:$0xff]  ;;  %v1944_v18 = vld [vmem:[#allocation7 + $0xb0] sm:$0xff]  ;;  %v1945_v19 = vld [vmem:[#allocation7 + $0xb8] sm:$0xff] }
 0x1e2   :  { %1551 = vmatprep.mubr.f32.mxu1 %v3314_v57  ;;  %3020 = vmatpush1.bf16.msra.mxu1 %v3019_v4 }
 0x1e3   :  { %v1419_v17 = vmul.f32 %v1282_v16, %v1121_v14  ;;  %3021 = vmatprep.subr.bf16.mxu1 %v3312_v0 }
 0x1e4   :  { %v900_v20 = vpop.f32.mrb[12].mxu0 }
 0x1e5   :  { %v1126_v21 = vadd.f32 %v3853_v24, %v900_v20  ;;  %v902_v62 = vpop.f32.mrb[13].mxu0  ;;  %1552 = vmatmul.mubr.f32.gmra.mrb[42].mxu1 %v1419_v17  ;;  %v3028_v24 = vpack.c.bf16 %v1937_v27, %v1936_v26  ;;  %v1947_v26 = vld [vmem:[#allocation7 + $0xc8] sm:$0xff] }
 0x1e6   :  { %1557 = vmatprep.mubr.f32.mxu1 %v3314_v57  ;;  %3023 = vmatpush1.bf16.msra.mxu1 %v3022_v13  ;;  %v1307_v13 = vpop.permute.xlu0 %1306 }
 0x1e7   :  { %v1420_v25 = vmul.f32 %v1287_v22, %v1126_v21  ;;  %3024 = vmatprep.subr.bf16.mxu1 %v3312_v0  ;;  %v1312_v22 = vpop.permute.xlu1 %1311 }
 0x1e8   :  { %v905_v61 = vpop.f32.mrb[14].mxu0 }
 0x1e9   :  { %v1131_v28 = vadd.f32 %v3851_v23, %v905_v61  ;;  %v907_v29 = vpop.f32.mrb[15].mxu0  ;;  %1558 = vmatmul.mubr.f32.gmra.mrb[44].mxu1 %v1420_v25  ;;  %v3031_v23 = vpack.c.bf16 %v1939_v35, %v1938_v32  ;;  %v1946_v25 = vld [vmem:[#allocation7 + $0xc0] sm:$0xff] }
 0x1ea   :  { %1563 = vmatprep.mubr.f32.mxu1 %v3314_v57  ;;  %3026 = vmatpush1.bf16.msra.mxu1 %v3025_v11  ;;  %v1317_v29 = vpop.permute.xlu0 %1316 }
 0x1eb   :  { %v1421_v31 = vmul.f32 %v1292_v30, %v1131_v28  ;;  %3027 = vmatprep.subr.bf16.mxu1 %v3312_v0 }
 0x1ec   :  { %v910_v36 = vpop.f32.mrb[16].mxu0 }
 0x1ed   :  { %v1136_v5 = vadd.f32 %v3857_v34, %v910_v36  ;;  %v912_v37 = vpop.f32.mrb[17].mxu0  ;;  %1564 = vmatmul.mubr.f32.gmra.mrb[46].mxu1 %v1421_v31  ;;  %v3034_v34 = vpack.c.bf16 %v1941_v2, %v1940_v1  ;;  %v1949_v31 = vld [vmem:[#allocation7 + $0xd8] sm:$0xff] }
 0x1ee   :  { %1569 = vmatprep.mubr.f32.mxu1 %v3314_v57  ;;  %3029 = vmatpush1.bf16.msra.mxu1 %v3028_v24  ;;  %v1948_v24 = vld [vmem:[#allocation7 + $0xd0] sm:$0xff] }
 0x1ef   :  { %v1422_v63 = vmul.f32 %v1297_v38, %v1136_v5  ;;  %3030 = vmatprep.subr.bf16.mxu1 %v3312_v0  ;;  %v1322_v5 = vpop.permute.xlu1 %1321  ;;  %v1950_v38 = vld [vmem:[#allocation7 + $0xe0] sm:$0xff] }
 0x1f0   :  { %v915_v3 = vpop.f32.mrb[18].mxu0 }
 0x1f1   :  { %v1141_v6 = vadd.f32 %v3855_v33, %v915_v3  ;;  %v917_v4 = vpop.f32.mrb[19].mxu0  ;;  %1570 = vmatmul.mubr.f32.gmra.mrb[48].mxu1 %v1422_v63  ;;  %v3037_v33 = vpack.c.bf16 %v1943_v10, %v1942_v9  ;;  %v1327_v3 = vpop.permute.xlu0 %1326 }
 0x1f2   :  { %1575 = vmatprep.mubr.f32.mxu1 %v3314_v57  ;;  %3032 = vmatpush1.bf16.msra.mxu1 %v3031_v23  ;;  %v1951_v23 = vld [vmem:[#allocation7 + $0xe8] sm:$0xff] }
 0x1f3   :  { %v1423_v8 = vmul.f32 %v1302_v7, %v1141_v6  ;;  %3033 = vmatprep.subr.bf16.mxu1 %v3312_v0 }
 0x1f4   :  { %v920_v14 = vpop.f32.mrb[20].mxu0 }
 0x1f5   :  { %v1146_v15 = vadd.f32 %v3861_v40, %v920_v14  ;;  %v922_v16 = vpop.f32.mrb[21].mxu0  ;;  %1576 = vmatmul.mubr.f32.gmra.mrb[50].mxu1 %v1423_v8  ;;  %v3040_v40 = vpack.c.bf16 %v1945_v19, %v1944_v18  ;;  %v1332_v8 = vpop.permute.xlu1 %1331 }
 0x1f6   :  { %1581 = vmatprep.mubr.f32.mxu1 %v3314_v57  ;;  %3035 = vmatpush1.bf16.msra.mxu1 %v3034_v34 }
 0x1f7   :  { %v1424_v17 = vmul.f32 %v1307_v13, %v1146_v15  ;;  %3036 = vmatprep.subr.bf16.mxu1 %v3312_v0  ;;  %v1337_v15 = vpop.permute.xlu0 %1336 }
 0x1f8   :  { %v925_v20 = vpop.f32.mrb[22].mxu0 }
 0x1f9   :  { %v1151_v21 = vadd.f32 %v3859_v39, %v925_v20  ;;  %v927_v62 = vpop.f32.mrb[23].mxu0  ;;  %1582 = vmatmul.mubr.f32.gmra.mrb[52].mxu1 %v1424_v17  ;;  %v3043_v39 = vpack.c.bf16 %v1947_v26, %v1946_v25  ;;  %v1342_v17 = vpop.permute.xlu1 %1341 }
 0x1fa   :  { %1587 = vmatprep.mubr.f32.mxu1 %v3314_v57  ;;  %3038 = vmatpush1.bf16.msra.mxu1 %v3037_v33 }
 0x1fb   :  { %v1425_v11 = vmul.f32 %v1312_v22, %v1151_v21  ;;  %3039 = vmatprep.subr.bf16.mxu1 %v3312_v0 }
 0x1fc   :  { %v930_v27 = vpop.f32.mrb[24].mxu0 }
 0x1fd   :  { %v1156_v61 = vadd.f32 %v3865_v42, %v930_v27  ;;  %v932_v28 = vpop.f32.mrb[25].mxu0  ;;  %1588 = vmatmul.mubr.f32.gmra.mrb[54].mxu1 %v1425_v11  ;;  %v3046_v42 = vpack.c.bf16 %v1949_v31, %v1948_v24 }
 0x1fe   :  { %1593 = vmatprep.mubr.f32.mxu1 %v3314_v57  ;;  %3041 = vmatpush1.bf16.msra.mxu1 %v3040_v40 }
 0x1ff   :  { %v1426_v30 = vmul.f32 %v1317_v29, %v1156_v61  ;;  %3042 = vmatprep.subr.bf16.mxu1 %v3312_v0 }
 0x200   :  { %v935_v32 = vpop.f32.mrb[26].mxu0 }
 0x201   :  { %v1161_v35 = vadd.f32 %v3863_v41, %v935_v32  ;;  %v937_v36 = vpop.f32.mrb[27].mxu0  ;;  %1594 = vmatmul.mubr.f32.gmra.mrb[56].mxu1 %v1426_v30  ;;  %v3049_v41 = vpack.c.bf16 %v1951_v23, %v1950_v38 }
 0x202   :  { %1599 = vmatprep.mubr.f32.mxu1 %v3314_v57  ;;  %3044 = vmatpush1.bf16.msra.mxu1 %v3043_v39  ;;  %v1953_v36 = vld [vmem:[#allocation7 + $0xf8] sm:$0xff] }
 0x203   :  { %v1427_v37 = vmul.f32 %v1322_v5, %v1161_v35  ;;  %3045 = vmatprep.subr.bf16.mxu1 %v3312_v0 }
 0x204   :  { %v940_v63 = vpop.f32.mrb[28].mxu0 }
 0x205   :  { %v1166_v1 = vadd.f32 %v3869_v44, %v940_v63  ;;  %v942_v2 = vpop.f32.mrb[29].mxu0  ;;  %1600 = vmatmul.mubr.f32.gmra.mrb[58].mxu1 %v1427_v37 }
 0x206   :  { %1605 = vmatprep.mubr.f32.mxu1 %v3314_v57  ;;  %3047 = vmatpush1.bf16.msra.mxu1 %v3046_v42 }
 0x207   :  { %v1428_v6 = vmul.f32 %v1327_v3, %v1166_v1  ;;  %3048 = vmatprep.subr.bf16.mxu1 %v3312_v0 }
 0x208   :  { %v945_v4 = vpop.f32.mrb[30].mxu0 }
 0x209   :  { %v1171_v7 = vadd.f32 %v3867_v43, %v945_v4  ;;  %v947_v34 = vpop.f32.mrb[31].mxu0  ;;  %1606 = vmatmul.mubr.f32.gmra.mrb[60].mxu1 %v1428_v6 }
 0x20a   :  { %1611 = vmatprep.mubr.f32.mxu1 %v3314_v57  ;;  %3050 = vmatpush1.bf16.msra.mxu1 %v3049_v41 }
 0x20b   :  { %v1429_v44 = vmul.f32 %v1332_v8, %v1171_v7  ;;  %3051 = vmatprep.subr.bf16.mxu1 %v3312_v0 }
 0x20c   :  { %v950_v9 = vpop.f32.mrb[32].mxu0 }
 0x20d   :  { %v1176_v10 = vadd.f32 %v3873_v46, %v950_v9  ;;  %v952_v14 = vpop.f32.mrb[33].mxu0  ;;  %1612 = vmatmul.mubr.f32.gmra.mrb[62].mxu1 %v1429_v44  ;;  %v1347_v46 = vpop.permute.xlu0 %1346 }
 0x20e   :  { %1617 = vmatprep.mubr.f32.mxu1 %v3314_v57 }
 0x20f   :  { %v1430_v16 = vmul.f32 %v1337_v15, %v1176_v10 }
 0x210   :  { %v955_v13 = vpop.f32.mrb[34].mxu0 }
 0x211   :  { %v1181_v43 = vadd.f32 %v3871_v45, %v955_v13  ;;  %v957_v33 = vpop.f32.mrb[35].mxu0  ;;  %1618 = vmatmul.mubr.f32.gmra.mrb[64].mxu1 %v1430_v16  ;;  %v1352_v45 = vpop.permute.xlu1 %1351 }
 0x212   :  { %1623 = vmatprep.mubr.f32.mxu1 %v3314_v57 }
 0x213   :  { %v1431_v18 = vmul.f32 %v1342_v17, %v1181_v43 }
 0x214   :  { %v960_v19 = vpop.f32.mrb[36].mxu0 }
 0x215   :  { %v1186_v20 = vadd.f32 %v3877_v48, %v960_v19  ;;  %v962_v21 = vpop.f32.mrb[37].mxu0  ;;  %1624 = vmatmul.mubr.f32.gmra.mrb[66].mxu1 %v1431_v18  ;;  %v1357_v48 = vpop.permute.xlu0 %1356 }
 0x216   :  { %1629 = vmatprep.mubr.f32.mxu1 %v3314_v57 }
 0x217   :  { %v1432_v62 = vmul.f32 %v1347_v46, %v1186_v20 }
 0x218   :  { %v965_v22 = vpop.f32.mrb[38].mxu0 }
 0x219   :  { %v1191_v40 = vadd.f32 %v3875_v47, %v965_v22  ;;  %v967_v11 = vpop.f32.mrb[39].mxu0  ;;  %1630 = vmatmul.mubr.f32.gmra.mrb[68].mxu1 %v1432_v62  ;;  %v1362_v47 = vpop.permute.xlu1 %1361 }
 0x21a   :  { %1635 = vmatprep.mubr.f32.mxu1 %v3314_v57  ;;  %v1367_v5 = vpop.permute.xlu0 %1366 }
 0x21b   :  { %v1433_v25 = vmul.f32 %v1352_v45, %v1191_v40 }
 0x21c   :  { %v970_v26 = vpop.f32.mrb[40].mxu0 }
 0x21d   :  { %v1196_v27 = vadd.f32 %v3881_v50, %v970_v26  ;;  %v972_v61 = vpop.f32.mrb[41].mxu0  ;;  %1636 = vmatmul.mubr.f32.gmra.mrb[70].mxu1 %v1433_v25  ;;  %v1952_v50 = vld [vmem:[#allocation7 + $0xf0] sm:$0xff]  ;;  %v1372_v63 = vpop.permute.xlu1 %1371 }
 0x21e   :  { %1641 = vmatprep.mubr.f32.mxu1 %v3314_v57  ;;  %v3052_v42 = vpack.c.bf16 %v1953_v36, %v1952_v50  ;;  %v1377_v41 = vpop.permute.xlu0 %1376 }
 0x21f   :  { %v1434_v28 = vmul.f32 %v1357_v48, %v1196_v27  ;;  %v1447_v48 = vlaneseq }
 0x220   :  { %v975_v29 = vpop.f32.mrb[42].mxu0  ;;  %3053 = vmatpush1.bf16.msra.mxu1 %v3052_v42 }
 0x221   :  { %v1201_v39 = vadd.f32 %v3879_v49, %v975_v29  ;;  %v977_v30 = vpop.f32.mrb[43].mxu0  ;;  %1642 = vmatmul.mubr.f32.gmra.mrb[72].mxu1 %v1434_v28  ;;  %3102 = vmatprep.subr.bf16.mxu1 %v3312_v0  ;;  %v1382_v34 = vpop.permute.xlu1 %1381  ;;  %v1448_v28 = vshrl.u32 %v1447_v48, 7 }
 0x222   :  { %1647 = vmatprep.mubr.f32.mxu1 %v3314_v57 }
 0x223   :  { %v1435_v24 = vmul.f32 %v1362_v47, %v1201_v39  ;;  %v1449_v29 = vsub.s32 0, %v1448_v28  ;;  %v1453_v39 = vsub.s32 1, %v1448_v28 }
 0x224   :  { %v980_v31 = vpop.f32.mrb[44].mxu0 }
 0x225   :  { %v1206_v32 = vadd.f32 %v3885_v52, %v980_v31  ;;  %v982_v35 = vpop.f32.mrb[45].mxu0  ;;  %1648 = vmatmul.mubr.f32.gmra.mrb[74].mxu1 %v1435_v24 }
 0x226   :  { %1653 = vmatprep.mubr.f32.mxu1 %v3314_v57 }
 0x227   :  { %v1436_v37 = vmul.f32 %v1367_v5, %v1206_v32 }
 0x228   :  { %v985_v38 = vpop.f32.mrb[46].mxu0 }
 0x229   :  { %v1211_v49 = vadd.f32 %v3883_v51, %v985_v38  ;;  %v987_v23 = vpop.f32.mrb[47].mxu0  ;;  %1654 = vmatmul.mubr.f32.gmra.mrb[76].mxu1 %v1436_v37 }
 0x22a   :  { %1659 = vmatprep.mubr.f32.mxu1 %v3314_v57 }
 0x22b   :  { %v1437_v52 = vmul.f32 %v1372_v63, %v1211_v49 }
 0x22c   :  { %v990_v1 = vpop.f32.mrb[48].mxu0 }
 0x22d   :  { %v1216_v2 = vadd.f32 %v3889_v54, %v990_v1  ;;  %v992_v3 = vpop.f32.mrb[49].mxu0  ;;  %1660 = vmatmul.mubr.f32.gmra.mrb[78].mxu1 %v1437_v52  ;;  %v1387_v54 = vpop.permute.xlu0 %1386 }
 0x22e   :  { %1665 = vmatprep.mubr.f32.mxu1 %v3314_v57 }
 0x22f   :  { %v1438_v6 = vmul.f32 %v1377_v41, %v1216_v2 }
 0x230   :  { %v995_v4 = vpop.f32.mrb[50].mxu0 }
 0x231   :  { %v1221_v51 = vadd.f32 %v3887_v53, %v995_v4  ;;  %v997_v7 = vpop.f32.mrb[51].mxu0  ;;  %1666 = vmatmul.mubr.f32.gmra.mrb[80].mxu1 %v1438_v6  ;;  %v1392_v53 = vpop.permute.xlu1 %1391 }
 0x232   :  { %1671 = vmatprep.mubr.f32.mxu1 %v3314_v57 }
 0x233   :  { %v1439_v8 = vmul.f32 %v1382_v34, %v1221_v51 }
 0x234   :  { %v1000_v44 = vpop.f32.mrb[52].mxu0 }
 0x235   :  { %v1226_v9 = vadd.f32 %v3893_v56, %v1000_v44  ;;  %v1002_v10 = vpop.f32.mrb[53].mxu0  ;;  %1672 = vmatmul.mubr.f32.gmra.mrb[82].mxu1 %v1439_v8  ;;  %v1397_v56 = vpop.permute.xlu0 %1396 }
 0x236   :  { %1677 = vmatprep.mubr.f32.mxu1 %v3314_v57 }
 0x237   :  { %v1440_v14 = vmul.f32 %v1387_v54, %v1226_v9 }
 0x238   :  { %v1005_v15 = vpop.f32.mrb[54].mxu0 }
 0x239   :  { %v1231_v16 = vadd.f32 %v3891_v55, %v1005_v15  ;;  %v1007_v13 = vpop.f32.mrb[55].mxu0  ;;  %1678 = vmatmul.mubr.f32.gmra.mrb[84].mxu1 %v1440_v14  ;;  %v1402_v55 = vpop.permute.xlu1 %1401 }
 0x23a   :  { %1683 = vmatprep.mubr.f32.mxu1 %v3314_v57 }
 0x23b   :  { %v1441_v43 = vmul.f32 %v1392_v53, %v1231_v16 }
 0x23c   :  { %v1010_v33 = vpop.f32.mrb[56].mxu0 }
 0x23d   :  { %v1236_v17 = vadd.f32 %v3897_v58, %v1010_v33  ;;  %v1012_v18 = vpop.f32.mrb[57].mxu0  ;;  %1684 = vmatmul.mubr.f32.gmra.mrb[86].mxu1 %v1441_v43  ;;  %v1407_v58 = vpop.permute.xlu0 %1406 }
 0x23e   :  { %1689 = vmatprep.mubr.f32.mxu1 %v3314_v57 }
 0x23f   :  { %v1442_v19 = vmul.f32 %v1397_v56, %v1236_v17 }
 0x240   :  { %v1015_v20 = vpop.f32.mrb[58].mxu0 }
 0x241   :  { %v1241_v21 = vadd.f32 %v3895_v12, %v1015_v20  ;;  %v1017_v46 = vpop.f32.mrb[59].mxu0  ;;  %1690 = vmatmul.mubr.f32.gmra.mrb[88].mxu1 %v1442_v19  ;;  %v1412_v12 = vpop.permute.xlu1 %1411 }
 0x242   :  { %1695 = vmatprep.mubr.f32.mxu1 %v3314_v57 }
 0x243   :  { %v1443_v62 = vmul.f32 %v1402_v55, %v1241_v21 }
 0x244   :  { %v1020_v22 = vpop.f32.mrb[60].mxu0 }
 0x245   :  { %v1246_v40 = vadd.f32 %v3901_v60, %v1020_v22  ;;  %v1022_v11 = vpop.f32.mrb[61].mxu0  ;;  %1696 = vmatmul.mubr.f32.gmra.mrb[90].mxu1 %v1443_v62  ;;  %v578_v60 = vld [vmem:[%s4247_s4] sm:$0x3] }
 0x246   :  { %1701 = vmatprep.mubr.f32.mxu1 %v3314_v57  ;;  %v3985_v30 = vrot.slane %v578_v60, %v1449_v29  ;;  %v3987_v47 = vrot.slane %v578_v60, %v1453_v39 }
 0x247   :  { %v1444_v45 = vmul.f32 %v1407_v58, %v1246_v40 }
 0x248   :  { %v1025_v25 = vpop.f32.mrb[62].mxu0 }
 0x249   :  { %v1251_v26 = vadd.f32 %v3899_v59, %v1025_v25  ;;  %v1027_v27 = vpop.f32.mrb[63].mxu0  ;;  %1702 = vmatmul.mubr.f32.gmra.mrb[92].mxu1 %v1444_v45 }
 0x24a   :  { %1707 = vmatprep.mubr.f32.mxu1 %v3314_v57 }
 0x24b   :  { %v1445_v61 = vmul.f32 %v1412_v12, %v1251_v26 }
 0x24d   :  { %1708 = vmatmul.mubr.f32.gmra.mrb[94].mxu1 %v1445_v61 }
 0x2a4   :  { %v1523_v59 = vpop.f32.mrb[32].mxu1 }
 0x2a5   :  { %v1524_v24 = vadd.f32 %v1523_v59, %v3985_v30  ;;  %v1525_v31 = vpop.f32.mrb[33].mxu1 }
 0x2a6   :  { %v1526_v57 = vadd.f32 %v1525_v31, %v3987_v47 }
 0x2a7   :  { %v1714_v50 = vmax.f32 %v1524_v24, 0.0 }
 0x2a8   :  { %v1715_v32 = vmax.f32 %v1526_v57, 0.0  ;;  %v1529_v35 = vpop.f32.mrb[34].mxu1 }
 0x2a9   :  { %v1530_v36 = vadd.f32 %v1529_v35, %v3985_v30  ;;  %v1531_v5 = vpop.f32.mrb[35].mxu1 }
 0x2aa   :  { %v1532_v42 = vadd.f32 %v1531_v5, %v3987_v47  ;;  %2051 = vmatprep.mubr.f32.mxu1 %v1715_v32 }
 0x2ab   :  { %2052 = vmatmul.mubr.f32.vlgmr.msra.gmra.mrb[96].mxu1 %v1714_v50  ;;  %v1716_v49 = vmax.f32 %v1530_v36, 0.0 }
 0x2ac   :  { %v1717_v37 = vmax.f32 %v1532_v42, 0.0  ;;  %v1535_v38 = vpop.f32.mrb[36].mxu1 }
 0x2ad   :  { %v1536_v23 = vadd.f32 %v1535_v38, %v3985_v30  ;;  %v1537_v63 = vpop.f32.mrb[37].mxu1 }
 0x2ae   :  { %v1538_v52 = vadd.f32 %v1537_v63, %v3987_v47  ;;  %2056 = vmatprep.mubr.f32.mxu1 %v1717_v37 }
 0x2af   :  { %2057 = vmatmul.mubr.f32.gmra.mrb[98].mxu1 %v1716_v49  ;;  %v1718_v3 = vmax.f32 %v1536_v23, 0.0 }
 0x2b0   :  { %v1719_v1 = vmax.f32 %v1538_v52, 0.0  ;;  %v1541_v2 = vpop.f32.mrb[38].mxu1 }
 0x2b1   :  { %v1542_v41 = vadd.f32 %v1541_v2, %v3985_v30  ;;  %v1543_v6 = vpop.f32.mrb[39].mxu1 }
 0x2b2   :  { %v1544_v4 = vadd.f32 %v1543_v6, %v3987_v47  ;;  %2061 = vmatprep.mubr.f32.mxu1 %v1719_v1 }
 0x2b3   :  { %2062 = vmatmul.mubr.f32.gmra.mrb[100].mxu1 %v1718_v3  ;;  %v1720_v34 = vmax.f32 %v1542_v41, 0.0 }
 0x2b4   :  { %v1721_v51 = vmax.f32 %v1544_v4, 0.0  ;;  %v1547_v7 = vpop.f32.mrb[40].mxu1 }
 0x2b5   :  { %v1548_v8 = vadd.f32 %v1547_v7, %v3985_v30  ;;  %v1549_v44 = vpop.f32.mrb[41].mxu1 }
 0x2b6   :  { %v1550_v9 = vadd.f32 %v1549_v44, %v3987_v47  ;;  %2066 = vmatprep.mubr.f32.mxu1 %v1721_v51 }
 0x2b7   :  { %2067 = vmatmul.mubr.f32.gmra.mrb[102].mxu1 %v1720_v34  ;;  %v1722_v14 = vmax.f32 %v1548_v8, 0.0 }
 0x2b8   :  { %v1723_v10 = vmax.f32 %v1550_v9, 0.0  ;;  %v1553_v54 = vpop.f32.mrb[42].mxu1 }
 0x2b9   :  { %v1554_v15 = vadd.f32 %v1553_v54, %v3985_v30  ;;  %v1555_v16 = vpop.f32.mrb[43].mxu1 }
 0x2ba   :  { %v1556_v13 = vadd.f32 %v1555_v16, %v3987_v47  ;;  %2071 = vmatprep.mubr.f32.mxu1 %v1723_v10 }
 0x2bb   :  { %2072 = vmatmul.mubr.f32.gmra.mrb[104].mxu1 %v1722_v14  ;;  %v1724_v33 = vmax.f32 %v1554_v15, 0.0 }
 0x2bc   :  { %v1725_v53 = vmax.f32 %v1556_v13, 0.0  ;;  %v1559_v43 = vpop.f32.mrb[44].mxu1 }
 0x2bd   :  { %v1560_v17 = vadd.f32 %v1559_v43, %v3985_v30  ;;  %v1561_v18 = vpop.f32.mrb[45].mxu1 }
 0x2be   :  { %v1562_v56 = vadd.f32 %v1561_v18, %v3987_v47  ;;  %2076 = vmatprep.mubr.f32.mxu1 %v1725_v53 }
 0x2bf   :  { %2077 = vmatmul.mubr.f32.gmra.mrb[106].mxu1 %v1724_v33  ;;  %v1726_v21 = vmax.f32 %v1560_v17, 0.0 }
 0x2c0   :  { %v1727_v19 = vmax.f32 %v1562_v56, 0.0  ;;  %v1565_v20 = vpop.f32.mrb[46].mxu1 }
 0x2c1   :  { %v1566_v46 = vadd.f32 %v1565_v20, %v3985_v30  ;;  %v1567_v55 = vpop.f32.mrb[47].mxu1 }
 0x2c2   :  { %v1568_v62 = vadd.f32 %v1567_v55, %v3987_v47  ;;  %2081 = vmatprep.mubr.f32.mxu1 %v1727_v19 }
 0x2c3   :  { %2082 = vmatmul.mubr.f32.gmra.mrb[108].mxu1 %v1726_v21  ;;  %v1728_v11 = vmax.f32 %v1566_v46, 0.0 }
 0x2c4   :  { %v1729_v22 = vmax.f32 %v1568_v62, 0.0  ;;  %v1571_v40 = vpop.f32.mrb[48].mxu1 }
 0x2c5   :  { %v1572_v58 = vadd.f32 %v1571_v40, %v3985_v30  ;;  %v1573_v45 = vpop.f32.mrb[49].mxu1 }
 0x2c6   :  { %v1574_v25 = vadd.f32 %v1573_v45, %v3987_v47  ;;  %2086 = vmatprep.mubr.f32.mxu1 %v1729_v22 }
 0x2c7   :  { %2087 = vmatmul.mubr.f32.gmra.mrb[110].mxu1 %v1728_v11  ;;  %v1730_v12 = vmax.f32 %v1572_v58, 0.0 }
 0x2c8   :  { %v1731_v26 = vmax.f32 %v1574_v25, 0.0  ;;  %v1577_v27 = vpop.f32.mrb[50].mxu1 }
 0x2c9   :  { %v1578_v61 = vadd.f32 %v1577_v27, %v3985_v30  ;;  %v1579_v48 = vpop.f32.mrb[51].mxu1 }
 0x2ca   :  { %v1580_v28 = vadd.f32 %v1579_v48, %v3987_v47  ;;  %2091 = vmatprep.mubr.f32.mxu1 %v1731_v26 }
 0x2cb   :  { %2092 = vmatmul.mubr.f32.gmra.mrb[112].mxu1 %v1730_v12  ;;  %v1732_v39 = vmax.f32 %v1578_v61, 0.0 }
 0x2cc   :  { %v1733_v29 = vmax.f32 %v1580_v28, 0.0  ;;  %v1583_v60 = vpop.f32.mrb[52].mxu1 }
 0x2cd   :  { %v1584_v59 = vadd.f32 %v1583_v60, %v3985_v30  ;;  %v1585_v24 = vpop.f32.mrb[53].mxu1 }
 0x2ce   :  { %v1586_v31 = vadd.f32 %v1585_v24, %v3987_v47  ;;  %2096 = vmatprep.mubr.f32.mxu1 %v1733_v29 }
 0x2cf   :  { %2097 = vmatmul.mubr.f32.gmra.mrb[114].mxu1 %v1732_v39  ;;  %v1734_v35 = vmax.f32 %v1584_v59, 0.0 }
 0x2d0   :  { %v1735_v57 = vmax.f32 %v1586_v31, 0.0  ;;  %v1589_v32 = vpop.f32.mrb[54].mxu1 }
 0x2d1   :  { %v1590_v50 = vadd.f32 %v1589_v32, %v3985_v30  ;;  %v1591_v36 = vpop.f32.mrb[55].mxu1 }
 0x2d2   :  { %v1592_v5 = vadd.f32 %v1591_v36, %v3987_v47  ;;  %2101 = vmatprep.mubr.f32.mxu1 %v1735_v57 }
 0x2d3   :  { %2102 = vmatmul.mubr.f32.gmra.mrb[116].mxu1 %v1734_v35  ;;  %v1736_v38 = vmax.f32 %v1590_v50, 0.0 }
 0x2d4   :  { %v1737_v42 = vmax.f32 %v1592_v5, 0.0  ;;  %v1595_v37 = vpop.f32.mrb[56].mxu1 }
 0x2d5   :  { %v1596_v49 = vadd.f32 %v1595_v37, %v3985_v30  ;;  %v1597_v23 = vpop.f32.mrb[57].mxu1 }
 0x2d6   :  { %v1598_v63 = vadd.f32 %v1597_v23, %v3987_v47  ;;  %2106 = vmatprep.mubr.f32.mxu1 %v1737_v42 }
 0x2d7   :  { %2107 = vmatmul.mubr.f32.gmra.mrb[118].mxu1 %v1736_v38  ;;  %v1738_v2 = vmax.f32 %v1596_v49, 0.0 }
 0x2d8   :  { %v1739_v52 = vmax.f32 %v1598_v63, 0.0  ;;  %v1601_v1 = vpop.f32.mrb[58].mxu1 }
 0x2d9   :  { %v1602_v3 = vadd.f32 %v1601_v1, %v3985_v30  ;;  %v1603_v41 = vpop.f32.mrb[59].mxu1 }
 0x2da   :  { %v1604_v6 = vadd.f32 %v1603_v41, %v3987_v47  ;;  %2111 = vmatprep.mubr.f32.mxu1 %v1739_v52 }
 0x2db   :  { %2112 = vmatmul.mubr.f32.gmra.mrb[120].mxu1 %v1738_v2  ;;  %v1740_v7 = vmax.f32 %v1602_v3, 0.0 }
 0x2dc   :  { %v1741_v4 = vmax.f32 %v1604_v6, 0.0  ;;  %v1607_v51 = vpop.f32.mrb[60].mxu1 }
 0x2dd   :  { %v1608_v34 = vadd.f32 %v1607_v51, %v3985_v30  ;;  %v1609_v8 = vpop.f32.mrb[61].mxu1 }
 0x2de   :  { %v1610_v44 = vadd.f32 %v1609_v8, %v3987_v47  ;;  %2116 = vmatprep.mubr.f32.mxu1 %v1741_v4 }
 0x2df   :  { %2117 = vmatmul.mubr.f32.gmra.mrb[122].mxu1 %v1740_v7  ;;  %v1742_v54 = vmax.f32 %v1608_v34, 0.0 }
 0x2e0   :  { %v1743_v9 = vmax.f32 %v1610_v44, 0.0  ;;  %v1613_v10 = vpop.f32.mrb[62].mxu1 }
 0x2e1   :  { %v1614_v14 = vadd.f32 %v1613_v10, %v3985_v30  ;;  %v1615_v15 = vpop.f32.mrb[63].mxu1 }
 0x2e2   :  { %v1616_v16 = vadd.f32 %v1615_v15, %v3987_v47  ;;  %2121 = vmatprep.mubr.f32.mxu1 %v1743_v9 }
 0x2e3   :  { %2122 = vmatmul.mubr.f32.gmra.mrb[124].mxu1 %v1742_v54  ;;  %v1744_v43 = vmax.f32 %v1614_v14, 0.0 }
 0x2e4   :  { %v1745_v13 = vmax.f32 %v1616_v16, 0.0  ;;  %v1619_v53 = vpop.f32.mrb[64].mxu1 }
 0x2e5   :  { %v1620_v33 = vadd.f32 %v1619_v53, %v3985_v30  ;;  %v1621_v17 = vpop.f32.mrb[65].mxu1 }
 0x2e6   :  { %v1622_v18 = vadd.f32 %v1621_v17, %v3987_v47  ;;  %2126 = vmatprep.mubr.f32.mxu1 %v1745_v13 }
 0x2e7   :  { %2127 = vmatmul.mubr.f32.gmra.mrb[126].mxu1 %v1744_v43  ;;  %v1746_v20 = vmax.f32 %v1620_v33, 0.0 }
 0x2e8   :  { %v1747_v56 = vmax.f32 %v1622_v18, 0.0  ;;  %v1625_v19 = vpop.f32.mrb[66].mxu1 }
 0x2e9   :  { %v1626_v21 = vadd.f32 %v1625_v19, %v3985_v30  ;;  %v1627_v46 = vpop.f32.mrb[67].mxu1 }
 0x2ea   :  { %v1628_v55 = vadd.f32 %v1627_v46, %v3987_v47  ;;  %2131 = vmatprep.mubr.f32.mxu1 %v1747_v56 }
 0x2eb   :  { %2132 = vmatmul.mubr.f32.gmra.mrb[128].mxu1 %v1746_v20  ;;  %v1748_v40 = vmax.f32 %v1626_v21, 0.0 }
 0x2ec   :  { %v1749_v62 = vmax.f32 %v1628_v55, 0.0  ;;  %v1631_v22 = vpop.f32.mrb[68].mxu1 }
 0x2ed   :  { %v1632_v11 = vadd.f32 %v1631_v22, %v3985_v30  ;;  %v1633_v58 = vpop.f32.mrb[69].mxu1 }
 0x2ee   :  { %v1634_v45 = vadd.f32 %v1633_v58, %v3987_v47  ;;  %2136 = vmatprep.mubr.f32.mxu1 %v1749_v62 }
 0x2ef   :  { %2137 = vmatmul.mubr.f32.gmra.mrb[130].mxu1 %v1748_v40  ;;  %v1750_v27 = vmax.f32 %v1632_v11, 0.0 }
 0x2f0   :  { %v1751_v25 = vmax.f32 %v1634_v45, 0.0  ;;  %v1637_v26 = vpop.f32.mrb[70].mxu1 }
 0x2f1   :  { %v1638_v12 = vadd.f32 %v1637_v26, %v3985_v30  ;;  %v1639_v61 = vpop.f32.mrb[71].mxu1 }
 0x2f2   :  { %v1640_v48 = vadd.f32 %v1639_v61, %v3987_v47  ;;  %2141 = vmatprep.mubr.f32.mxu1 %v1751_v25 }
 0x2f3   :  { %2142 = vmatmul.mubr.f32.gmra.mrb[132].mxu1 %v1750_v27  ;;  %v1752_v60 = vmax.f32 %v1638_v12, 0.0 }
 0x2f4   :  { %v1753_v28 = vmax.f32 %v1640_v48, 0.0  ;;  %v1643_v29 = vpop.f32.mrb[72].mxu1 }
 0x2f5   :  { %v1644_v39 = vadd.f32 %v1643_v29, %v3985_v30  ;;  %v1645_v59 = vpop.f32.mrb[73].mxu1 }
 0x2f6   :  { %v1646_v24 = vadd.f32 %v1645_v59, %v3987_v47  ;;  %2146 = vmatprep.mubr.f32.mxu1 %v1753_v28 }
 0x2f7   :  { %2147 = vmatmul.mubr.f32.gmra.mrb[134].mxu1 %v1752_v60  ;;  %v1754_v32 = vmax.f32 %v1644_v39, 0.0 }
 0x2f8   :  { %v1755_v31 = vmax.f32 %v1646_v24, 0.0  ;;  %v1649_v57 = vpop.f32.mrb[74].mxu1 }
 0x2f9   :  { %v1650_v35 = vadd.f32 %v1649_v57, %v3985_v30  ;;  %v1651_v50 = vpop.f32.mrb[75].mxu1 }
 0x2fa   :  { %v1652_v36 = vadd.f32 %v1651_v50, %v3987_v47  ;;  %2151 = vmatprep.mubr.f32.mxu1 %v1755_v31 }
 0x2fb   :  { %2152 = vmatmul.mubr.f32.gmra.mrb[136].mxu1 %v1754_v32  ;;  %v1756_v37 = vmax.f32 %v1650_v35, 0.0 }
 0x2fc   :  { %v1757_v5 = vmax.f32 %v1652_v36, 0.0  ;;  %v1655_v42 = vpop.f32.mrb[76].mxu1 }
 0x2fd   :  { %v1656_v38 = vadd.f32 %v1655_v42, %v3985_v30  ;;  %v1657_v49 = vpop.f32.mrb[77].mxu1  ;;  %v4056_v42 = vld [vmem:[%s4248_s5 + $0x8] sm:$0xff] }
 0x2fe   :  { %v1658_v23 = vadd.f32 %v1657_v49, %v3987_v47  ;;  %2156 = vmatprep.mubr.f32.mxu1 %v1757_v5 }
 0x2ff   :  { %2157 = vmatmul.mubr.f32.gmra.mrb[138].mxu1 %v1756_v37  ;;  %v1758_v1 = vmax.f32 %v1656_v38, 0.0  ;;  %v4061_v37 = vld [vmem:[%s4248_s5 + $0x58] sm:$0xff] }
 0x300   :  { %v1759_v63 = vmax.f32 %v1658_v23, 0.0  ;;  %v1661_v52 = vpop.f32.mrb[78].mxu1 }
 0x301   :  { %v1662_v2 = vadd.f32 %v1661_v52, %v3985_v30  ;;  %v1663_v3 = vpop.f32.mrb[79].mxu1 }
 0x302   :  { %v1664_v41 = vadd.f32 %v1663_v3, %v3987_v47  ;;  %2161 = vmatprep.mubr.f32.mxu1 %v1759_v63 }
 0x303   :  { %2162 = vmatmul.mubr.f32.gmra.mrb[140].mxu1 %v1758_v1  ;;  %v1760_v51 = vmax.f32 %v1662_v2, 0.0 }
 0x304   :  { %v1761_v6 = vmax.f32 %v1664_v41, 0.0  ;;  %v1667_v4 = vpop.f32.mrb[80].mxu1 }
 0x305   :  { %v1668_v7 = vadd.f32 %v1667_v4, %v3985_v30  ;;  %v1669_v34 = vpop.f32.mrb[81].mxu1 }
 0x306   :  { %v1670_v8 = vadd.f32 %v1669_v34, %v3987_v47  ;;  %2166 = vmatprep.mubr.f32.mxu1 %v1761_v6 }
 0x307   :  { %2167 = vmatmul.mubr.f32.gmra.mrb[142].mxu1 %v1760_v51  ;;  %v1762_v10 = vmax.f32 %v1668_v7, 0.0 }
 0x308   :  { %v1763_v44 = vmax.f32 %v1670_v8, 0.0  ;;  %v1673_v9 = vpop.f32.mrb[82].mxu1 }
 0x309   :  { %v1674_v54 = vadd.f32 %v1673_v9, %v3985_v30  ;;  %v1675_v14 = vpop.f32.mrb[83].mxu1 }
 0x30a   :  { %v1676_v15 = vadd.f32 %v1675_v14, %v3987_v47  ;;  %2171 = vmatprep.mubr.f32.mxu1 %v1763_v44 }
 0x30b   :  { %2172 = vmatmul.mubr.f32.gmra.mrb[144].mxu1 %v1762_v10  ;;  %v1764_v53 = vmax.f32 %v1674_v54, 0.0 }
 0x30c   :  { %v1765_v16 = vmax.f32 %v1676_v15, 0.0  ;;  %v1679_v13 = vpop.f32.mrb[84].mxu1 }
 0x30d   :  { %v1680_v43 = vadd.f32 %v1679_v13, %v3985_v30  ;;  %v1681_v33 = vpop.f32.mrb[85].mxu1 }
 0x30e   :  { %v1682_v17 = vadd.f32 %v1681_v33, %v3987_v47  ;;  %2176 = vmatprep.mubr.f32.mxu1 %v1765_v16 }
 0x30f   :  { %2177 = vmatmul.mubr.f32.gmra.mrb[146].mxu1 %v1764_v53  ;;  %v1766_v19 = vmax.f32 %v1680_v43, 0.0 }
 0x310   :  { %v1767_v18 = vmax.f32 %v1682_v17, 0.0  ;;  %v1685_v56 = vpop.f32.mrb[86].mxu1 }
 0x311   :  { %v1686_v20 = vadd.f32 %v1685_v56, %v3985_v30  ;;  %v1687_v21 = vpop.f32.mrb[87].mxu1 }
 0x312   :  { %v1688_v46 = vadd.f32 %v1687_v21, %v3987_v47  ;;  %2181 = vmatprep.mubr.f32.mxu1 %v1767_v18 }
 0x313   :  { %2182 = vmatmul.mubr.f32.gmra.mrb[148].mxu1 %v1766_v19  ;;  %v1768_v22 = vmax.f32 %v1686_v20, 0.0 }
 0x314   :  { %v1769_v55 = vmax.f32 %v1688_v46, 0.0  ;;  %v1691_v62 = vpop.f32.mrb[88].mxu1 }
 0x315   :  { %v1692_v40 = vadd.f32 %v1691_v62, %v3985_v30  ;;  %v1693_v11 = vpop.f32.mrb[89].mxu1 }
 0x316   :  { %v1694_v58 = vadd.f32 %v1693_v11, %v3987_v47  ;;  %2186 = vmatprep.mubr.f32.mxu1 %v1769_v55 }
 0x317   :  { %2187 = vmatmul.mubr.f32.gmra.mrb[150].mxu1 %v1768_v22  ;;  %v1770_v26 = vmax.f32 %v1692_v40, 0.0 }
 0x318   :  { %v1771_v45 = vmax.f32 %v1694_v58, 0.0  ;;  %v1697_v25 = vpop.f32.mrb[90].mxu1 }
 0x319   :  { %v1698_v27 = vadd.f32 %v1697_v25, %v3985_v30  ;;  %v1699_v12 = vpop.f32.mrb[91].mxu1 }
 0x31a   :  { %v1700_v61 = vadd.f32 %v1699_v12, %v3987_v47  ;;  %2191 = vmatprep.mubr.f32.mxu1 %v1771_v45 }
 0x31b   :  { %2192 = vmatmul.mubr.f32.gmra.mrb[152].mxu1 %v1770_v26  ;;  %v1772_v29 = vmax.f32 %v1698_v27, 0.0 }
 0x31c   :  { %v1773_v48 = vmax.f32 %v1700_v61, 0.0  ;;  %v1703_v28 = vpop.f32.mrb[92].mxu1 }
 0x31d   :  { %v1704_v60 = vadd.f32 %v1703_v28, %v3985_v30  ;;  %v1705_v39 = vpop.f32.mrb[93].mxu1 }
 0x31e   :  { %v1706_v59 = vadd.f32 %v1705_v39, %v3987_v47  ;;  %2196 = vmatprep.mubr.f32.mxu1 %v1773_v48 }
 0x31f   :  { %2197 = vmatmul.mubr.f32.gmra.mrb[154].mxu1 %v1772_v29  ;;  %v1774_v57 = vmax.f32 %v1704_v60, 0.0 }
 0x320   :  { %v1775_v24 = vmax.f32 %v1706_v59, 0.0  ;;  %v1709_v31 = vpop.f32.mrb[94].mxu1 }
 0x321   :  { %v1710_v32 = vadd.f32 %v1709_v31, %v3985_v30  ;;  %v1711_v35 = vpop.f32.mrb[95].mxu1  ;;  %v1795_v30 = vunpack.c.0.s8 %v4056_v42 }
 0x322   :  { %v1712_v50 = vadd.f32 %v1711_v35, %v3987_v47  ;;  %2201 = vmatprep.mubr.f32.mxu1 %v1775_v24  ;;  %v1835_v47 = vunpack.c.0.s8 %v4061_v37 }
 0x323   :  { %2202 = vmatmul.mubr.f32.gmra.mrb[156].mxu1 %v1774_v57  ;;  %v1776_v5 = vmax.f32 %v1710_v32, 0.0  ;;  %v1859_v38 = vcvt.s32.f32 %v1795_v30 }
 0x324   :  { %v1777_v36 = vmax.f32 %v1712_v50, 0.0  ;;  %v1899_v49 = vcvt.s32.f32 %v1835_v47 }
 0x325   :  { %2276 = vmatprep.mubr.f32.mxu0 %v1859_v38 }
 0x326   :  { %2206 = vmatprep.mubr.f32.mxu1 %v1777_v36 }
 0x327   :  { %2207 = vmatmul.mubr.f32.gmra.mrb[158].mxu1 %v1776_v5 }
 0x328   :  { %2376 = vmatprep.mubr.f32.mxu1 %v1899_v49 }
 0x37e   :  { %v2053_v23 = vpop.f32.mrb[96].mxu1 }
 0x37f   :  { %v2055_v63 = vpop.f32.mrb[97].mxu1 }
 0x382   :  { %v2058_v52 = vpop.f32.mrb[98].mxu1 }
 0x383   :  { %v3055_v1 = vpack.c.bf16 %v2058_v52, %v2053_v23  ;;  %v2060_v2 = vpop.f32.mrb[99].mxu1 }
 0x385   :  { %3056 = vmatpush1.bf16.msra.mxu0 %v3055_v1  ;;  %3118 = vmatpush1.bf16.msra.mxu1 %v3055_v1 }
 0x386   :  { %v2063_v3 = vpop.f32.mrb[100].mxu1  ;;  %3057 = vmatprep.subr.bf16.mxu0 %v3312_v0  ;;  %3103 = vmatprep.subr.bf16.mxu1 %v3312_v0 }
 0x387   :  { %v2065_v41 = vpop.f32.mrb[101].mxu1 }
 0x38a   :  { %v2068_v6 = vpop.f32.mrb[102].mxu1 }
 0x38b   :  { %v3058_v4 = vpack.c.bf16 %v2068_v6, %v2063_v3  ;;  %v2070_v51 = vpop.f32.mrb[103].mxu1 }
 0x38d   :  { %3059 = vmatpush1.bf16.msra.mxu0 %v3058_v4  ;;  %3119 = vmatpush1.bf16.msra.mxu1 %v3058_v4 }
 0x38e   :  { %v2073_v7 = vpop.f32.mrb[104].mxu1  ;;  %3060 = vmatprep.subr.bf16.mxu0 %v3312_v0  ;;  %3104 = vmatprep.subr.bf16.mxu1 %v3312_v0 }
 0x38f   :  { %v2075_v34 = vpop.f32.mrb[105].mxu1 }
 0x392   :  { %v2078_v8 = vpop.f32.mrb[106].mxu1 }
 0x393   :  { %v3061_v44 = vpack.c.bf16 %v2078_v8, %v2073_v7  ;;  %v2080_v9 = vpop.f32.mrb[107].mxu1 }
 0x394   :  { %v1778_v9 = vld [vmem:[%s4248_s5] sm:$0xff] }
 0x395   :  { %3062 = vmatpush1.bf16.msra.mxu0 %v3061_v44  ;;  %3120 = vmatpush1.bf16.msra.mxu1 %v3061_v44 }
 0x396   :  { %v2083_v10 = vpop.f32.mrb[108].mxu1  ;;  %3063 = vmatprep.subr.bf16.mxu0 %v3312_v0  ;;  %3105 = vmatprep.subr.bf16.mxu1 %v3312_v0 }
 0x397   :  { %v2085_v54 = vpop.f32.mrb[109].mxu1 }
 0x39a   :  { %v2088_v14 = vpop.f32.mrb[110].mxu1 }
 0x39b   :  { %v3064_v15 = vpack.c.bf16 %v2088_v14, %v2083_v10  ;;  %v2090_v16 = vpop.f32.mrb[111].mxu1  ;;  %v1788_v10 = vld [vmem:[%s4248_s5 + $0x50] sm:$0xff] }
 0x39c   :  { %v1834_v16 = vunpack.c.0.s8 %v1788_v10 }
 0x39d   :  { %3065 = vmatpush1.bf16.msra.mxu0 %v3064_v15  ;;  %3121 = vmatpush1.bf16.msra.mxu1 %v3064_v15  ;;  %v1794_v15 = vunpack.c.0.s8 %v1778_v9 }
 0x39e   :  { %v2093_v13 = vpop.f32.mrb[112].mxu1  ;;  %3066 = vmatprep.subr.bf16.mxu0 %v3312_v0  ;;  %3106 = vmatprep.subr.bf16.mxu1 %v3312_v0 }
 0x39f   :  { %v2095_v53 = vpop.f32.mrb[113].mxu1 }
 0x3a0   :  { %v1837_v53 = vunpack.c.1.s8 %v4061_v37 }
 0x3a2   :  { %v2098_v43 = vpop.f32.mrb[114].mxu1 }
 0x3a3   :  { %v3067_v33 = vpack.c.bf16 %v2098_v43, %v2093_v13  ;;  %v2100_v17 = vpop.f32.mrb[115].mxu1  ;;  %v1797_v13 = vunpack.c.1.s8 %v4056_v42 }
 0x3a5   :  { %3068 = vmatpush1.bf16.msra.mxu0 %v3067_v33  ;;  %3122 = vmatpush1.bf16.msra.mxu1 %v3067_v33 }
 0x3a6   :  { %v2103_v18 = vpop.f32.mrb[116].mxu1  ;;  %3069 = vmatprep.subr.bf16.mxu0 %v3312_v0  ;;  %3107 = vmatprep.subr.bf16.mxu1 %v3312_v0 }
 0x3a7   :  { %v2105_v56 = vpop.f32.mrb[117].mxu1 }
 0x3a8   :  { %v1898_v56 = vcvt.s32.f32 %v1834_v16 }
 0x3aa   :  { %v2108_v19 = vpop.f32.mrb[118].mxu1 }
 0x3ab   :  { %v3070_v20 = vpack.c.bf16 %v2108_v19, %v2103_v18  ;;  %v2110_v21 = vpop.f32.mrb[119].mxu1  ;;  %v1858_v18 = vcvt.s32.f32 %v1794_v15  ;;  %v1796_v19 = vunpack.c.1.s8 %v1778_v9 }
 0x3ac   :  { %v1861_v21 = vcvt.s32.f32 %v1797_v13 }
 0x3ad   :  { %3071 = vmatpush1.bf16.msra.mxu0 %v3070_v20  ;;  %3123 = vmatpush1.bf16.msra.mxu1 %v3070_v20  ;;  %v1836_v20 = vunpack.c.1.s8 %v1788_v10 }
 0x3ae   :  { %v2113_v46 = vpop.f32.mrb[120].mxu1  ;;  %3072 = vmatprep.subr.bf16.mxu0 %v3312_v0  ;;  %3108 = vmatprep.subr.bf16.mxu1 %v3312_v0 }
 0x3af   :  { %v2115_v55 = vpop.f32.mrb[121].mxu1 }
 0x3b0   :  { %v1839_v55 = vunpack.c.2.s8 %v4061_v37 }
 0x3b2   :  { %v2118_v62 = vpop.f32.mrb[122].mxu1 }
 0x3b3   :  { %v3073_v22 = vpack.c.bf16 %v2118_v62, %v2113_v46  ;;  %v2120_v40 = vpop.f32.mrb[123].mxu1  ;;  %v1901_v46 = vcvt.s32.f32 %v1837_v53  ;;  %v1860_v62 = vcvt.s32.f32 %v1796_v19 }
 0x3b4   :  { %v1798_v40 = vunpack.c.2.s8 %v1778_v9 }
 0x3b5   :  { %3074 = vmatpush1.bf16.msra.mxu0 %v3073_v22  ;;  %3124 = vmatpush1.bf16.msra.mxu1 %v3073_v22  ;;  %v1900_v22 = vcvt.s32.f32 %v1836_v20 }
 0x3b6   :  { %v2123_v11 = vpop.f32.mrb[124].mxu1  ;;  %3075 = vmatprep.subr.bf16.mxu0 %v3312_v0  ;;  %3109 = vmatprep.subr.bf16.mxu1 %v3312_v0 }
 0x3b7   :  { %v2125_v58 = vpop.f32.mrb[125].mxu1 }
 0x3ba   :  { %v2128_v45 = vpop.f32.mrb[126].mxu1 }
 0x3bb   :  { %v3076_v25 = vpack.c.bf16 %v2128_v45, %v2123_v11  ;;  %v2130_v26 = vpop.f32.mrb[127].mxu1  ;;  %v1838_v11 = vunpack.c.2.s8 %v1788_v10  ;;  %v1903_v45 = vcvt.s32.f32 %v1839_v55 }
 0x3bc   :  { %v1841_v26 = vunpack.c.3.s8 %v4061_v37 }
 0x3bd   :  { %3077 = vmatpush1.bf16.msra.mxu0 %v3076_v25  ;;  %3125 = vmatpush1.bf16.msra.mxu1 %v3076_v25  ;;  %v1801_v25 = vunpack.c.3.s8 %v4056_v42 }
 0x3be   :  { %v2133_v27 = vpop.f32.mrb[128].mxu1  ;;  %3078 = vmatprep.subr.bf16.mxu0 %v3312_v0  ;;  %3110 = vmatprep.subr.bf16.mxu1 %v3312_v0 }
 0x3bf   :  { %v2135_v12 = vpop.f32.mrb[129].mxu1 }
 0x3c0   :  { %v1791_v12 = vld [vmem:[%s4248_s5 + $0x68] sm:$0xff] }
 0x3c1   :  { %v1843_v37 = vunpack.c.0.s8 %v1791_v12 }
 0x3c2   :  { %v2138_v61 = vpop.f32.mrb[130].mxu1 }
 0x3c3   :  { %v3079_v48 = vpack.c.bf16 %v2138_v61, %v2133_v27  ;;  %v2140_v28 = vpop.f32.mrb[131].mxu1  ;;  %v1781_v27 = vld [vmem:[%s4248_s5 + $0x18] sm:$0xff]  ;;  %v1862_v61 = vcvt.s32.f32 %v1798_v40 }
 0x3c4   :  { %v1800_v28 = vunpack.c.3.s8 %v1778_v9  ;;  %v1793_v9 = vld [vmem:[%s4248_s5 + $0x78] sm:$0xff] }
 0x3c5   :  { %3080 = vmatpush1.bf16.msra.mxu0 %v3079_v48  ;;  %3126 = vmatpush1.bf16.msra.mxu1 %v3079_v48  ;;  %v1902_v48 = vcvt.s32.f32 %v1838_v11  ;;  %v1853_v55 = vunpack.c.1.s8 %v1793_v9 }
 0x3c6   :  { %v2143_v29 = vpop.f32.mrb[132].mxu1  ;;  %3081 = vmatprep.subr.bf16.mxu0 %v3312_v0  ;;  %3111 = vmatprep.subr.bf16.mxu1 %v3312_v0 }
 0x3c7   :  { %v2145_v60 = vpop.f32.mrb[133].mxu1 }
 0x3c8   :  { %v1865_v60 = vcvt.s32.f32 %v1801_v25 }
 0x3ca   :  { %v2148_v39 = vpop.f32.mrb[134].mxu1 }
 0x3cb   :  { %v3082_v59 = vpack.c.bf16 %v2148_v39, %v2143_v29  ;;  %v2150_v24 = vpop.f32.mrb[135].mxu1  ;;  %v1840_v29 = vunpack.c.3.s8 %v1788_v10  ;;  %v1803_v39 = vunpack.c.0.s8 %v1781_v27 }
 0x3cc   :  { %v1790_v24 = vld [vmem:[%s4248_s5 + $0x60] sm:$0xff] }
 0x3cd   :  { %3083 = vmatpush1.bf16.msra.mxu0 %v3082_v59  ;;  %3127 = vmatpush1.bf16.msra.mxu1 %v3082_v59  ;;  %v1780_v59 = vld [vmem:[%s4248_s5 + $0x10] sm:$0xff]  ;;  %v1848_v15 = vunpack.c.3.s8 %v1790_v24 }
 0x3ce   :  { %v2153_v31 = vpop.f32.mrb[136].mxu1  ;;  %3084 = vmatprep.subr.bf16.mxu0 %v3312_v0  ;;  %3112 = vmatprep.subr.bf16.mxu1 %v3312_v0 }
 0x3cf   :  { %v2155_v57 = vpop.f32.mrb[137].mxu1 }
 0x3d0   :  { %v1904_v57 = vcvt.s32.f32 %v1840_v29 }
 0x3d2   :  { %v2158_v32 = vpop.f32.mrb[138].mxu1 }
 0x3d3   :  { %v3085_v35 = vpack.c.bf16 %v2158_v32, %v2153_v31  ;;  %v2160_v50 = vpop.f32.mrb[139].mxu1  ;;  %v1864_v31 = vcvt.s32.f32 %v1800_v28  ;;  %v1802_v32 = vunpack.c.0.s8 %v1780_v59 }
 0x3d4   :  { %v1867_v50 = vcvt.s32.f32 %v1803_v39  ;;  %v1785_v39 = vld [vmem:[%s4248_s5 + $0x38] sm:$0xff] }
 0x3d5   :  { %3086 = vmatpush1.bf16.msra.mxu0 %v3085_v35  ;;  %3128 = vmatpush1.bf16.msra.mxu1 %v3085_v35  ;;  %v1842_v35 = vunpack.c.0.s8 %v1790_v24 }
 0x3d6   :  { %v2163_v36 = vpop.f32.mrb[140].mxu1  ;;  %3087 = vmatprep.subr.bf16.mxu0 %v3312_v0  ;;  %3113 = vmatprep.subr.bf16.mxu1 %v3312_v0 }
 0x3d7   :  { %v2165_v5 = vpop.f32.mrb[141].mxu1 }
 0x3d8   :  { %v1805_v5 = vunpack.c.1.s8 %v1781_v27 }
 0x3da   :  { %v2168_v30 = vpop.f32.mrb[142].mxu1 }
 0x3db   :  { %v3088_v47 = vpack.c.bf16 %v2168_v30, %v2163_v36  ;;  %v2170_v38 = vpop.f32.mrb[143].mxu1  ;;  %v1907_v36 = vcvt.s32.f32 %v1843_v37  ;;  %v1845_v30 = vunpack.c.1.s8 %v1791_v12 }
 0x3dc   :  { %v1906_v38 = vcvt.s32.f32 %v1842_v35  ;;  %v1819_v35 = vunpack.c.0.s8 %v1785_v39 }
 0x3dd   :  { %3089 = vmatpush1.bf16.msra.mxu0 %v3088_v47  ;;  %3129 = vmatpush1.bf16.msra.mxu1 %v3088_v47  ;;  %v1866_v47 = vcvt.s32.f32 %v1802_v32 }
 0x3de   :  { %v2173_v49 = vpop.f32.mrb[144].mxu1  ;;  %3090 = vmatprep.subr.bf16.mxu0 %v3312_v0  ;;  %3114 = vmatprep.subr.bf16.mxu1 %v3312_v0 }
 0x3df   :  { %v2175_v23 = vpop.f32.mrb[145].mxu1 }
 0x3e0   :  { %v1844_v23 = vunpack.c.1.s8 %v1790_v24 }
 0x3e2   :  { %v2178_v63 = vpop.f32.mrb[146].mxu1 }
 0x3e3   :  { %v3091_v52 = vpack.c.bf16 %v2178_v63, %v2173_v49  ;;  %v2180_v1 = vpop.f32.mrb[147].mxu1  ;;  %v1804_v49 = vunpack.c.1.s8 %v1780_v59  ;;  %v1869_v63 = vcvt.s32.f32 %v1805_v5 }
 0x3e4   :  { %v1807_v1 = vunpack.c.2.s8 %v1781_v27 }
 0x3e5   :  { %3092 = vmatpush1.bf16.msra.mxu0 %v3091_v52  ;;  %3130 = vmatpush1.bf16.msra.mxu1 %v3091_v52  ;;  %v1909_v52 = vcvt.s32.f32 %v1845_v30 }
 0x3e6   :  { %v2183_v2 = vpop.f32.mrb[148].mxu1  ;;  %3093 = vmatprep.subr.bf16.mxu0 %v3312_v0  ;;  %3115 = vmatprep.subr.bf16.mxu1 %v3312_v0 }
 0x3e7   :  { %v2185_v3 = vpop.f32.mrb[149].mxu1 }
 0x3e8   :  { %v1868_v3 = vcvt.s32.f32 %v1804_v49 }
 0x3ea   :  { %v2188_v41 = vpop.f32.mrb[150].mxu1 }
 0x3eb   :  { %v3094_v6 = vpack.c.bf16 %v2188_v41, %v2183_v2  ;;  %v2190_v4 = vpop.f32.mrb[151].mxu1  ;;  %v1847_v2 = vunpack.c.2.s8 %v1791_v12  ;;  %v1908_v41 = vcvt.s32.f32 %v1844_v23 }
 0x3ec   :  { %v1846_v4 = vunpack.c.2.s8 %v1790_v24 }
 0x3ed   :  { %3095 = vmatpush1.bf16.msra.mxu0 %v3094_v6  ;;  %3131 = vmatpush1.bf16.msra.mxu1 %v3094_v6  ;;  %v1806_v6 = vunpack.c.2.s8 %v1780_v59 }
 0x3ee   :  { %v2193_v51 = vpop.f32.mrb[152].mxu1  ;;  %3096 = vmatprep.subr.bf16.mxu0 %v3312_v0  ;;  %3116 = vmatprep.subr.bf16.mxu1 %v3312_v0 }
 0x3ef   :  { %v2195_v7 = vpop.f32.mrb[153].mxu1  ;;  %v1870_v10 = vcvt.s32.f32 %v1806_v6  ;;  %v1787_v6 = vld [vmem:[%s4248_s5 + $0x48] sm:$0xff] }
 0x3f0   :  { %v1911_v7 = vcvt.s32.f32 %v1847_v2 }
 0x3f2   :  { %v2198_v34 = vpop.f32.mrb[154].mxu1 }
 0x3f3   :  { %v3097_v8 = vpack.c.bf16 %v2198_v34, %v2193_v51  ;;  %v2200_v44 = vpop.f32.mrb[155].mxu1  ;;  %v1871_v51 = vcvt.s32.f32 %v1807_v1  ;;  %v1809_v34 = vunpack.c.3.s8 %v1781_v27 }
 0x3f4   :  { %v1783_v44 = vld [vmem:[%s4248_s5 + $0x28] sm:$0xff] }
 0x3f5   :  { %3098 = vmatpush1.bf16.msra.mxu0 %v3097_v8  ;;  %3132 = vmatpush1.bf16.msra.mxu1 %v3097_v8  ;;  %v1849_v8 = vunpack.c.3.s8 %v1791_v12  ;;  %v1873_v16 = vcvt.s32.f32 %v1809_v34  ;;  %v1811_v53 = vunpack.c.0.s8 %v1783_v44  ;;  %v1815_v25 = vunpack.c.2.s8 %v1783_v44 }
 0x3f6   :  { %v2203_v54 = vpop.f32.mrb[156].mxu1  ;;  %3099 = vmatprep.subr.bf16.mxu0 %v3312_v0  ;;  %3117 = vmatprep.subr.bf16.mxu1 %v3312_v0  ;;  %v1799_v0 = vunpack.c.2.s8 %v4056_v42  ;;  %v1905_v42 = vcvt.s32.f32 %v1841_v26  ;;  %v1855_v26 = vunpack.c.2.s8 %v1793_v9  ;;  %v1827_v34 = vunpack.c.0.s8 %v1787_v6 }
 0x3f7   :  { %v2205_v14 = vpop.f32.mrb[157].mxu1  ;;  %v1913_v13 = vcvt.s32.f32 %v1849_v8  ;;  %v1879_v28 = vcvt.s32.f32 %v1815_v25  ;;  %v1786_v8 = vld [vmem:[%s4248_s5 + $0x40] sm:$0xff] }
 0x3f8   :  { %v1863_v58 = vcvt.s32.f32 %v1799_v0  ;;  %v1808_v14 = vunpack.c.3.s8 %v1780_v59  ;;  %v1813_v0 = vunpack.c.1.s8 %v1783_v44  ;;  %v1919_v29 = vcvt.s32.f32 %v1855_v26 }
 0x3fa   :  { %v2208_v43 = vpop.f32.mrb[158].mxu1 }
 0x3fb   :  { %v3100_v33 = vpack.c.bf16 %v2208_v43, %v2203_v54  ;;  %v2210_v17 = vpop.f32.mrb[159].mxu1  ;;  %v1910_v54 = vcvt.s32.f32 %v1846_v4  ;;  %v1851_v43 = vunpack.c.0.s8 %v1793_v9 }
 0x3fc   :  { %v1792_v17 = vld [vmem:[%s4248_s5 + $0x70] sm:$0xff] }
 0x3fd   :  { %3101 = vmatpush1.bf16.msra.mxu0 %v3100_v33  ;;  %3133 = vmatpush1.bf16.msra.mxu1 %v3100_v33  ;;  %v1782_v33 = vld [vmem:[%s4248_s5 + $0x20] sm:$0xff]  ;;  %v1850_v20 = vunpack.c.0.s8 %v1792_v17  ;;  %v1852_v11 = vunpack.c.1.s8 %v1792_v17 }
 0x3fe   :  { %v1810_v19 = vunpack.c.0.s8 %v1782_v33  ;;  %v1812_v40 = vunpack.c.1.s8 %v1782_v33  ;;  %v1816_v24 = vunpack.c.3.s8 %v1782_v33 }
 0x3ff   :  { %v1916_v12 = vcvt.s32.f32 %v1852_v11 }
 0x400   :  { %2277 = vmatmul.mubr.f32.vlgmr.msra.gmra.mrb[64].mxu0 %v1858_v18  ;;  %2377 = vmatmul.mubr.f32.vlgmr.msra.gmra.mrb[160].mxu1 %v1898_v56  ;;  %v1872_v18 = vcvt.s32.f32 %v1808_v14  ;;  %v1912_v56 = vcvt.s32.f32 %v1848_v15  ;;  %v1876_v27 = vcvt.s32.f32 %v1812_v40  ;;  %v1828_v15 = vunpack.c.1.s8 %v1786_v8 }
 0x401   :  { %2281 = vmatprep.mubr.f32.mxu0 %v1861_v21  ;;  %2381 = vmatprep.mubr.f32.mxu1 %v1901_v46  ;;  %v1875_v21 = vcvt.s32.f32 %v1811_v53  ;;  %v1915_v46 = vcvt.s32.f32 %v1851_v43  ;;  %v1830_v43 = vunpack.c.2.s8 %v1786_v8 }
 0x402   :  { %v1892_v53 = vcvt.s32.f32 %v1828_v15 }
 0x404   :  { %2282 = vmatmul.mubr.f32.gmra.mrb[66].mxu0 %v1860_v62  ;;  %2382 = vmatmul.mubr.f32.gmra.mrb[162].mxu1 %v1900_v22  ;;  %v1874_v62 = vcvt.s32.f32 %v1810_v19  ;;  %v1914_v22 = vcvt.s32.f32 %v1850_v20 }
 0x405   :  { %2286 = vmatprep.mubr.f32.mxu0 %v1863_v58  ;;  %2386 = vmatprep.mubr.f32.mxu1 %v1903_v45  ;;  %v1877_v58 = vcvt.s32.f32 %v1813_v0  ;;  %v1917_v45 = vcvt.s32.f32 %v1853_v55 }
 0x408   :  { %2287 = vmatmul.mubr.f32.gmra.mrb[68].mxu0 %v1862_v61  ;;  %2387 = vmatmul.mubr.f32.gmra.mrb[164].mxu1 %v1902_v48  ;;  %v1814_v61 = vunpack.c.2.s8 %v1782_v33  ;;  %v1854_v48 = vunpack.c.2.s8 %v1792_v17 }
 0x409   :  { %2291 = vmatprep.mubr.f32.mxu0 %v1865_v60  ;;  %2391 = vmatprep.mubr.f32.mxu1 %v1905_v42  ;;  %v1817_v60 = vunpack.c.3.s8 %v1783_v44  ;;  %v1857_v42 = vunpack.c.3.s8 %v1793_v9  ;;  %v1826_v9 = vunpack.c.0.s8 %v1786_v8 }
 0x40a   :  { %v1878_v37 = vcvt.s32.f32 %v1814_v61  ;;  %v1918_v59 = vcvt.s32.f32 %v1854_v48 }
 0x40b   :  { %v1921_v32 = vcvt.s32.f32 %v1857_v42  ;;  %v1890_v14 = vcvt.s32.f32 %v1826_v9 }
 0x40c   :  { %2292 = vmatmul.mubr.f32.gmra.mrb[70].mxu0 %v1864_v31  ;;  %2392 = vmatmul.mubr.f32.gmra.mrb[166].mxu1 %v1904_v57  ;;  %v1856_v31 = vunpack.c.3.s8 %v1792_v17  ;;  %v1881_v57 = vcvt.s32.f32 %v1817_v60  ;;  %v1833_v17 = vunpack.c.3.s8 %v1787_v6 }
 0x40d   :  { %2296 = vmatprep.mubr.f32.mxu0 %v1867_v50  ;;  %2396 = vmatprep.mubr.f32.mxu1 %v1907_v36  ;;  %v1784_v50 = vld [vmem:[%s4248_s5 + $0x30] sm:$0xff]  ;;  %v1880_v36 = vcvt.s32.f32 %v1816_v24 }
 0x40e   :  { %v1920_v5 = vcvt.s32.f32 %v1856_v31  ;;  %v1818_v30 = vunpack.c.0.s8 %v1784_v50  ;;  %v1820_v23 = vunpack.c.1.s8 %v1784_v50  ;;  %v1822_v2 = vunpack.c.2.s8 %v1784_v50 }
 0x40f   :  { %v1897_v19 = vcvt.s32.f32 %v1833_v17 }
 0x410   :  { %2297 = vmatmul.mubr.f32.gmra.mrb[72].mxu0 %v1866_v47  ;;  %2397 = vmatmul.mubr.f32.gmra.mrb[168].mxu1 %v1906_v38  ;;  %v1883_v47 = vcvt.s32.f32 %v1819_v35  ;;  %v1821_v38 = vunpack.c.1.s8 %v1785_v39  ;;  %v1882_v49 = vcvt.s32.f32 %v1818_v30  ;;  %v1884_v1 = vcvt.s32.f32 %v1820_v23 }
 0x411   :  { %2301 = vmatprep.mubr.f32.mxu0 %v1869_v63  ;;  %2401 = vmatprep.mubr.f32.mxu1 %v1909_v52  ;;  %v1823_v52 = vunpack.c.2.s8 %v1785_v39  ;;  %v1886_v4 = vcvt.s32.f32 %v1822_v2 }
 0x412   :  { %v1885_v63 = vcvt.s32.f32 %v1821_v38 }
 0x414   :  { %2302 = vmatmul.mubr.f32.gmra.mrb[74].mxu0 %v1868_v3  ;;  %2402 = vmatmul.mubr.f32.gmra.mrb[170].mxu1 %v1908_v41  ;;  %v1887_v3 = vcvt.s32.f32 %v1823_v52  ;;  %v1825_v41 = vunpack.c.3.s8 %v1785_v39 }
 0x415   :  { %2306 = vmatprep.mubr.f32.mxu0 %v1871_v51  ;;  %2406 = vmatprep.mubr.f32.mxu1 %v1911_v7  ;;  %v1824_v51 = vunpack.c.3.s8 %v1784_v50 }
 0x416   :  { %v1889_v7 = vcvt.s32.f32 %v1825_v41 }
 0x417   :  { %v1888_v44 = vcvt.s32.f32 %v1824_v51 }
 0x418   :  { %2307 = vmatmul.mubr.f32.gmra.mrb[76].mxu0 %v1870_v10  ;;  %2407 = vmatmul.mubr.f32.gmra.mrb[172].mxu1 %v1910_v54  ;;  %v1891_v10 = vcvt.s32.f32 %v1827_v34  ;;  %v1829_v54 = vunpack.c.1.s8 %v1787_v6 }
 0x419   :  { %2311 = vmatprep.mubr.f32.mxu0 %v1873_v16  ;;  %2411 = vmatprep.mubr.f32.mxu1 %v1913_v13  ;;  %v1831_v13 = vunpack.c.2.s8 %v1787_v6 }
 0x41a   :  { %v1893_v16 = vcvt.s32.f32 %v1829_v54 }
 0x41b   :  { %v1895_v33 = vcvt.s32.f32 %v1831_v13 }
 0x41c   :  { %2312 = vmatmul.mubr.f32.gmra.mrb[78].mxu0 %v1872_v18  ;;  %2412 = vmatmul.mubr.f32.gmra.mrb[174].mxu1 %v1912_v56  ;;  %v1894_v18 = vcvt.s32.f32 %v1830_v43  ;;  %v1832_v56 = vunpack.c.3.s8 %v1786_v8 }
 0x41d   :  { %2316 = vmatprep.mubr.f32.mxu0 %v1875_v21  ;;  %2416 = vmatprep.mubr.f32.mxu1 %v1915_v46  ;;  %v2440_v21 = vpop.permute.xlu0 %2439  ;;  %v2445_v46 = vpop.permute.xlu1 %2444 }
 0x41e   :  { %v1896_v20 = vcvt.s32.f32 %v1832_v56 }
 0x420   :  { %2317 = vmatmul.mubr.f32.gmra.mrb[80].mxu0 %v1874_v62  ;;  %2417 = vmatmul.mubr.f32.gmra.mrb[176].mxu1 %v1914_v22 }
 0x421   :  { %2321 = vmatprep.mubr.f32.mxu0 %v1877_v58  ;;  %2421 = vmatprep.mubr.f32.mxu1 %v1917_v45  ;;  %v2450_v0 = vpop.permute.xlu0 %2449  ;;  %v2455_v55 = vpop.permute.xlu1 %2454 }
 0x424   :  { %2322 = vmatmul.mubr.f32.gmra.mrb[82].mxu0 %v1876_v27  ;;  %2422 = vmatmul.mubr.f32.gmra.mrb[178].mxu1 %v1916_v12 }
 0x425   :  { %2326 = vmatprep.mubr.f32.mxu0 %v1879_v28  ;;  %2426 = vmatprep.mubr.f32.mxu1 %v1919_v29  ;;  %v4143_v62 = vpop.permute.xlu0 %2459  ;;  %v4145_v22 = vpop.permute.xlu1 %2464 }
 0x428   :  { %2327 = vmatmul.mubr.f32.gmra.mrb[84].mxu0 %v1878_v37  ;;  %2427 = vmatmul.mubr.f32.gmra.mrb[180].mxu1 %v1918_v59  ;;  %v4178_v37 = vld [vmem:[%s4251_s8] ss:$0 sm:$0xff]  ;;  %s3315_s8 = smov [#allocation8]  }
 0x429   :  { %2331 = vmatprep.mubr.f32.mxu0 %v1881_v57  ;;  %2431 = vmatprep.mubr.f32.mxu1 %v1921_v32  ;;  %v4147_v40 = vpop.permute.xlu0 %2469  ;;  %v4149_v11 = vpop.permute.xlu1 %2474  ;;  %s2704_s14 = sshll.u32 %s3315_s8, 4  ;;  %s2705_s14 = int_to_ptr.vmem [resolvable:$true] %s2704_s14 }
 0x42a   :  { %s3277_s15 = scalar_lea.vmem %s2705_s14, 4096  ;;  %p3282_p11 = scmp.lt.s32.totalorder %s2705_s14, %s2705_s14 }
 0x42b   :  { %p3278_p10 = scmp.ne.s32.totalorder %s2705_s14, %s3277_s15  ;;  %p3283_p12 = scmp.lt.s32.totalorder %s3277_s15, %s3277_s15 }
 0x42c   :  { %2332 = vmatmul.mubr.f32.gmra.mrb[86].mxu0 %v1880_v36  ;;  %2432 = vmatmul.mubr.f32.gmra.mrb[182].mxu1 %v1920_v5 }
 0x42d   :  { %2336 = vmatprep.mubr.f32.mxu0 %v1883_v47  ;;  %v4151_v58 = vpop.permute.xlu0 %2479  ;;  %v4153_v45 = vpop.permute.xlu1 %2484  ;;  %p3284_p13 = por %p3283_p12, %p3282_p11 }
 0x42f   :  { %p3285_p0 = pnand %p3284_p13, %p3278_p10 }
 0x430   :  { %2337 = vmatmul.mubr.f32.gmra.mrb[88].mxu0 %v1882_v49 }
 0x431   :  { %2341 = vmatprep.mubr.f32.mxu0 %v1885_v63  ;;  %v4155_v25 = vpop.permute.xlu0 %2489  ;;  %v4157_v26 = vpop.permute.xlu1 %2494 }
 0x434   :  { %2342 = vmatmul.mubr.f32.gmra.mrb[90].mxu0 %v1884_v1 }
 0x435   :  { %2346 = vmatprep.mubr.f32.mxu0 %v1887_v3  ;;  %v4159_v27 = vpop.permute.xlu0 %2499  ;;  %v4161_v12 = vpop.permute.xlu1 %2504 }
 0x438   :  { %2347 = vmatmul.mubr.f32.gmra.mrb[92].mxu0 %v1886_v4 }
 0x439   :  { %2351 = vmatprep.mubr.f32.mxu0 %v1889_v7  ;;  %v4163_v61 = vpop.permute.xlu0 %2509  ;;  %v4165_v48 = vpop.permute.xlu1 %2514 }
 0x43c   :  { %2352 = vmatmul.mubr.f32.gmra.mrb[94].mxu0 %v1888_v44 }
 0x43d   :  { %2356 = vmatprep.mubr.f32.mxu0 %v1891_v10  ;;  %v4167_v28 = vpop.permute.xlu0 %2519  ;;  %v4169_v29 = vpop.permute.xlu1 %2524 }
 0x440   :  { %2357 = vmatmul.mubr.f32.gmra.mrb[96].mxu0 %v1890_v14 }
 0x441   :  { %2361 = vmatprep.mubr.f32.mxu0 %v1893_v16  ;;  %v4171_v60 = vpop.permute.xlu0 %2529  ;;  %v4173_v42 = vpop.permute.xlu1 %2534 }
 0x444   :  { %2362 = vmatmul.mubr.f32.gmra.mrb[98].mxu0 %v1892_v53 }
 0x445   :  { %2366 = vmatprep.mubr.f32.mxu0 %v1895_v33  ;;  %v2540_v39 = vpop.permute.xlu0 %2539  ;;  %v2545_v50 = vpop.permute.xlu1 %2544 }
 0x448   :  { %2367 = vmatmul.mubr.f32.gmra.mrb[100].mxu0 %v1894_v18 }
 0x449   :  { %2371 = vmatprep.mubr.f32.mxu0 %v1897_v19  ;;  %v2550_v52 = vpop.permute.xlu0 %2549  ;;  %v2555_v34 = vpop.permute.xlu1 %2554 }
 0x44c   :  { %2372 = vmatmul.mubr.f32.gmra.mrb[102].mxu0 %v1896_v20 }
 0x44d   :  { %v2560_v13 = vpop.permute.xlu0 %2559 }
 0x4d3   :  { %v2278_v59 = vpop.f32.mrb[64].mxu0  ;;  %v2378_v24 = vpop.f32.mrb[160].mxu1 }
 0x4d4   :  { %v2597_v31 = vmul.f32 %v2440_v21, %v2278_v59  ;;  %v2617_v57 = vmul.f32 %v2540_v39, %v2378_v24  ;;  %v2280_v32 = vpop.f32.mrb[65].mxu0  ;;  %v2380_v35 = vpop.f32.mrb[161].mxu1 }
 0x4d5   :  { %v2565_v21 = vpop.permute.xlu1 %2564  ;;  %v2570_v32 = vpop.permute.xlu0 %2569 }
 0x4d6   :  { %v2635_v36 = vadd.f32 %v4178_v37, %v2597_v31  ;;  %v2655_v5 = vadd.f32 %v4178_v37, %v2617_v57 }
 0x4d7   :  { %v2283_v30 = vpop.f32.mrb[66].mxu0  ;;  %v2383_v47 = vpop.f32.mrb[162].mxu1 }
 0x4d8   :  { %2667 = vst [vmem:[#allocation8] sm:$0xff] %v2635_v36  ;;  %2687 = vst [vmem:[#allocation8 + $0xa0] sm:$0xff] %v2655_v5  ;;  %v2598_v38 = vmul.f32 %v2445_v46, %v2283_v30  ;;  %v2618_v49 = vmul.f32 %v2545_v50, %v2383_v47  ;;  %v2285_v23 = vpop.f32.mrb[67].mxu0  ;;  %v2385_v63 = vpop.f32.mrb[163].mxu1 }
 0x4da   :  { %v2636_v1 = vadd.f32 %v4178_v37, %v2598_v38  ;;  %v2656_v2 = vadd.f32 %v4178_v37, %v2618_v49  ;;  %v2575_v49 = vpop.permute.xlu1 %2574 }
 0x4db   :  { %v2288_v3 = vpop.f32.mrb[68].mxu0  ;;  %v2388_v41 = vpop.f32.mrb[164].mxu1 }
 0x4dc   :  { %2668 = vst [vmem:[#allocation8 + $0x8] sm:$0xff] %v2636_v1  ;;  %2688 = vst [vmem:[#allocation8 + $0xa8] sm:$0xff] %v2656_v2  ;;  %v2599_v6 = vmul.f32 %v2450_v0, %v2288_v3  ;;  %v2619_v4 = vmul.f32 %v2550_v52, %v2388_v41  ;;  %v2290_v51 = vpop.f32.mrb[69].mxu0  ;;  %v2390_v7 = vpop.f32.mrb[165].mxu1 }
 0x4de   :  { %v2637_v8 = vadd.f32 %v4178_v37, %v2599_v6  ;;  %v2657_v44 = vadd.f32 %v4178_v37, %v2619_v4  ;;  %v2580_v6 = vpop.permute.xlu0 %2579 }
 0x4df   :  { %v2293_v9 = vpop.f32.mrb[70].mxu0  ;;  %v2393_v10 = vpop.f32.mrb[166].mxu1 }
 0x4e0   :  { %2669 = vst [vmem:[#allocation8 + $0x10] sm:$0xff] %v2637_v8  ;;  %2689 = vst [vmem:[#allocation8 + $0xb0] sm:$0xff] %v2657_v44  ;;  %v2600_v54 = vmul.f32 %v2455_v55, %v2293_v9  ;;  %v2620_v14 = vmul.f32 %v2555_v34, %v2393_v10  ;;  %v2295_v15 = vpop.f32.mrb[71].mxu0  ;;  %v2395_v16 = vpop.f32.mrb[167].mxu1 }
 0x4e1   :  { %v2585_v10 = vpop.permute.xlu1 %2584 }
 0x4e2   :  { %v2638_v53 = vadd.f32 %v4178_v37, %v2600_v54  ;;  %v2658_v43 = vadd.f32 %v4178_v37, %v2620_v14 }
 0x4e3   :  { %v2298_v33 = vpop.f32.mrb[72].mxu0  ;;  %v2398_v17 = vpop.f32.mrb[168].mxu1 }
 0x4e4   :  { %2670 = vst [vmem:[#allocation8 + $0x18] sm:$0xff] %v2638_v53  ;;  %2690 = vst [vmem:[#allocation8 + $0xb8] sm:$0xff] %v2658_v43  ;;  %v2601_v18 = vmul.f32 %v4143_v62, %v2298_v33  ;;  %v2621_v56 = vmul.f32 %v2560_v13, %v2398_v17  ;;  %v2300_v19 = vpop.f32.mrb[73].mxu0  ;;  %v2400_v20 = vpop.f32.mrb[169].mxu1 }
 0x4e5   :  { %v2590_v33 = vpop.permute.xlu0 %2589 }
 0x4e6   :  { %v2639_v46 = vadd.f32 %v4178_v37, %v2601_v18  ;;  %v2659_v0 = vadd.f32 %v4178_v37, %v2621_v56 }
 0x4e7   :  { %v2303_v55 = vpop.f32.mrb[74].mxu0  ;;  %v2403_v39 = vpop.f32.mrb[170].mxu1 }
 0x4e8   :  { %2671 = vst [vmem:[#allocation8 + $0x20] sm:$0xff] %v2639_v46  ;;  %2691 = vst [vmem:[#allocation8 + $0xc0] sm:$0xff] %v2659_v0  ;;  %v2602_v59 = vmul.f32 %v4145_v22, %v2303_v55  ;;  %v2622_v24 = vmul.f32 %v2565_v21, %v2403_v39  ;;  %v2305_v31 = vpop.f32.mrb[75].mxu0  ;;  %v2405_v57 = vpop.f32.mrb[171].mxu1 }
 0x4e9   :  { %v2595_v0 = vpop.permute.xlu1 %2594 }
 0x4ea   :  { %v2640_v62 = vadd.f32 %v4178_v37, %v2602_v59  ;;  %v2660_v35 = vadd.f32 %v4178_v37, %v2622_v24 }
 0x4eb   :  { %v2308_v50 = vpop.f32.mrb[76].mxu0  ;;  %v2408_v36 = vpop.f32.mrb[172].mxu1 }
 0x4ec   :  { %2672 = vst [vmem:[#allocation8 + $0x28] sm:$0xff] %v2640_v62  ;;  %2692 = vst [vmem:[#allocation8 + $0xc8] sm:$0xff] %v2660_v35  ;;  %v2603_v5 = vmul.f32 %v4147_v40, %v2308_v50  ;;  %v2623_v30 = vmul.f32 %v2570_v32, %v2408_v36  ;;  %v2310_v47 = vpop.f32.mrb[77].mxu0  ;;  %v2410_v38 = vpop.f32.mrb[173].mxu1 }
 0x4ee   :  { %v2641_v22 = vadd.f32 %v4178_v37, %v2603_v5  ;;  %v2661_v23 = vadd.f32 %v4178_v37, %v2623_v30 }
 0x4ef   :  { %v2313_v63 = vpop.f32.mrb[78].mxu0  ;;  %v2413_v52 = vpop.f32.mrb[174].mxu1 }
 0x4f0   :  { %2673 = vst [vmem:[#allocation8 + $0x30] sm:$0xff] %v2641_v22  ;;  %2693 = vst [vmem:[#allocation8 + $0xd0] sm:$0xff] %v2661_v23  ;;  %v2604_v1 = vmul.f32 %v4149_v11, %v2313_v63  ;;  %v2624_v2 = vmul.f32 %v2575_v49, %v2413_v52  ;;  %v2315_v3 = vpop.f32.mrb[79].mxu0  ;;  %v2415_v41 = vpop.f32.mrb[175].mxu1 }
 0x4f2   :  { %v2642_v40 = vadd.f32 %v4178_v37, %v2604_v1  ;;  %v2662_v4 = vadd.f32 %v4178_v37, %v2624_v2 }
 0x4f3   :  { %v2318_v51 = vpop.f32.mrb[80].mxu0  ;;  %v2418_v7 = vpop.f32.mrb[176].mxu1 }
 0x4f4   :  { %2674 = vst [vmem:[#allocation8 + $0x38] sm:$0xff] %v2642_v40  ;;  %2694 = vst [vmem:[#allocation8 + $0xd8] sm:$0xff] %v2662_v4  ;;  %v2605_v34 = vmul.f32 %v4151_v58, %v2318_v51  ;;  %v2625_v8 = vmul.f32 %v2580_v6, %v2418_v7  ;;  %v2320_v44 = vpop.f32.mrb[81].mxu0  ;;  %v2420_v9 = vpop.f32.mrb[177].mxu1 }
 0x4f6   :  { %v2643_v11 = vadd.f32 %v4178_v37, %v2605_v34  ;;  %v2663_v54 = vadd.f32 %v4178_v37, %v2625_v8 }
 0x4f7   :  { %v2323_v14 = vpop.f32.mrb[82].mxu0  ;;  %v2423_v15 = vpop.f32.mrb[178].mxu1 }
 0x4f8   :  { %2675 = vst [vmem:[#allocation8 + $0x40] sm:$0xff] %v2643_v11  ;;  %2695 = vst [vmem:[#allocation8 + $0xe0] sm:$0xff] %v2663_v54  ;;  %v2606_v16 = vmul.f32 %v4153_v45, %v2323_v14  ;;  %v2626_v13 = vmul.f32 %v2585_v10, %v2423_v15  ;;  %v2325_v53 = vpop.f32.mrb[83].mxu0  ;;  %v2425_v43 = vpop.f32.mrb[179].mxu1 }
 0x4fa   :  { %v2644_v58 = vadd.f32 %v4178_v37, %v2606_v16  ;;  %v2664_v17 = vadd.f32 %v4178_v37, %v2626_v13 }
 0x4fb   :  { %v2328_v18 = vpop.f32.mrb[84].mxu0  ;;  %v2428_v56 = vpop.f32.mrb[180].mxu1 }
 0x4fc   :  { %2676 = vst [vmem:[#allocation8 + $0x48] sm:$0xff] %v2644_v58  ;;  %2696 = vst [vmem:[#allocation8 + $0xe8] sm:$0xff] %v2664_v17  ;;  %v2607_v19 = vmul.f32 %v4155_v25, %v2328_v18  ;;  %v2627_v20 = vmul.f32 %v2590_v33, %v2428_v56  ;;  %v2330_v21 = vpop.f32.mrb[85].mxu0  ;;  %v2430_v46 = vpop.f32.mrb[181].mxu1 }
 0x4fe   :  { %v2645_v45 = vadd.f32 %v4178_v37, %v2607_v19  ;;  %v2665_v55 = vadd.f32 %v4178_v37, %v2627_v20 }
 0x4ff   :  { %v2333_v39 = vpop.f32.mrb[86].mxu0  ;;  %v2433_v59 = vpop.f32.mrb[182].mxu1 }
 0x500   :  { %2677 = vst [vmem:[#allocation8 + $0x50] sm:$0xff] %v2645_v45  ;;  %2697 = vst [vmem:[#allocation8 + $0xf0] sm:$0xff] %v2665_v55  ;;  %v2608_v24 = vmul.f32 %v4157_v26, %v2333_v39  ;;  %v2628_v31 = vmul.f32 %v2595_v0, %v2433_v59  ;;  %v2335_v57 = vpop.f32.mrb[87].mxu0  ;;  %v2435_v32 = vpop.f32.mrb[183].mxu1 }
 0x502   :  { %v2646_v62 = vadd.f32 %v4178_v37, %v2608_v24  ;;  %v2666_v25 = vadd.f32 %v4178_v37, %v2628_v31 }
 0x503   :  { %v2338_v35 = vpop.f32.mrb[88].mxu0 }
 0x504   :  { %2678 = vst [vmem:[#allocation8 + $0x58] sm:$0xff] %v2646_v62  ;;  %2698 = vst [vmem:[#allocation8 + $0xf8] sm:$0xff] %v2666_v25  ;;  %v2609_v50 = vmul.f32 %v4159_v27, %v2338_v35  ;;  %v2340_v36 = vpop.f32.mrb[89].mxu0 }
 0x506   :  { %v2647_v5 = vadd.f32 %v4178_v37, %v2609_v50 }
 0x507   :  { %v2343_v30 = vpop.f32.mrb[90].mxu0 }
 0x508   :  { %2679 = vst [vmem:[#allocation8 + $0x60] sm:$0xff] %v2647_v5  ;;  %v2610_v47 = vmul.f32 %v4161_v12, %v2343_v30  ;;  %v2345_v26 = vpop.f32.mrb[91].mxu0 }
 0x50a   :  { %v2648_v38 = vadd.f32 %v4178_v37, %v2610_v47 }
 0x50b   :  { %v2348_v49 = vpop.f32.mrb[92].mxu0 }
 0x50c   :  { %2680 = vst [vmem:[#allocation8 + $0x68] sm:$0xff] %v2648_v38  ;;  %v2611_v22 = vmul.f32 %v4163_v61, %v2348_v49  ;;  %v2350_v23 = vpop.f32.mrb[93].mxu0 }
 0x50e   :  { %v2649_v63 = vadd.f32 %v4178_v37, %v2611_v22 }
 0x50f   :  { %v2353_v52 = vpop.f32.mrb[94].mxu0 }
 0x510   :  { %2681 = vst [vmem:[#allocation8 + $0x70] sm:$0xff] %v2649_v63  ;;  %v2612_v27 = vmul.f32 %v4165_v48, %v2353_v52  ;;  %v2355_v1 = vpop.f32.mrb[95].mxu0 }
 0x512   :  { %v2650_v2 = vadd.f32 %v4178_v37, %v2612_v27 }
 0x513   :  { %v2358_v3 = vpop.f32.mrb[96].mxu0 }
 0x514   :  { %2682 = vst [vmem:[#allocation8 + $0x78] sm:$0xff] %v2650_v2  ;;  %v2613_v12 = vmul.f32 %v4167_v28, %v2358_v3  ;;  %v2360_v41 = vpop.f32.mrb[97].mxu0 }
 0x516   :  { %v2651_v6 = vadd.f32 %v4178_v37, %v2613_v12 }
 0x517   :  { %v2363_v40 = vpop.f32.mrb[98].mxu0 }
 0x518   :  { %2683 = vst [vmem:[#allocation8 + $0x80] sm:$0xff] %v2651_v6  ;;  %v2614_v61 = vmul.f32 %v4169_v29, %v2363_v40  ;;  %v2365_v4 = vpop.f32.mrb[99].mxu0 }
 0x51a   :  { %v2652_v51 = vadd.f32 %v4178_v37, %v2614_v61 }
 0x51b   :  { %v2368_v7 = vpop.f32.mrb[100].mxu0 }
 0x51c   :  { %2684 = vst [vmem:[#allocation8 + $0x88] sm:$0xff] %v2652_v51  ;;  %v2615_v48 = vmul.f32 %v4171_v60, %v2368_v7  ;;  %v2370_v34 = vpop.f32.mrb[101].mxu0 }
 0x51e   :  { %v2653_v8 = vadd.f32 %v4178_v37, %v2615_v48 }
 0x51f   :  { %v2373_v44 = vpop.f32.mrb[102].mxu0 }
 0x520   :  { %2685 = vst [vmem:[#allocation8 + $0x90] sm:$0xff] %v2653_v8  ;;  %v2616_v28 = vmul.f32 %v4173_v42, %v2373_v44  ;;  %v2375_v9 = vpop.f32.mrb[103].mxu0 }
 0x522   :  { %v2654_v10 = vadd.f32 %v4178_v37, %v2616_v28 }
 0x524   :  { %2686 = vst [vmem:[#allocation8 + $0x98] sm:$0xff] %v2654_v10 }
 0x525   :  { %3288 = shalt.err (!%p3285_p0)
}
 0x526   :  { %s3289_s18 = scalar_lea.hbm %s4252_s9, 4096 }
 0x527   :  { %p3290_p1 = scmp.ne.s32.totalorder %s4252_s9, %s3289_s18  ;;  %p3293_p2 = scmp.lt.u32.totalorder %s3289_s18, %s4252_s9 }
 0x529   :  { %p3295_p3 = pnand %p3293_p2, %p3290_p1 }
 0x52b   :  { %3298 = shalt.err (!%p3295_p3)
}
 0x52c   :  { %2710 = dma.vmem_to_hbm [thread:$0]  %s2705_s14, 4096, %s4252_s9, [#allocation4], %s3309_s3, %s3309_s3, %s3310_s10  }
 0x52d   :  { %3303 = dma.done.wait [#allocation4], 4096  }
 0x52e   :  { %3304 = vsyncadd [#allocation4], 4294963200 }
 0x52f   :  { %2714 = vsyncpa [#allocation3], 1 }
 0x530   :  { %2715 = vsyncpa [#allocation6], 1 }
 0x531   :  { %2716 = vsyncpa [#allocation4], 1 }

</bundles_post_ra>
